<compile_context>
chip_gen: v6e
topology: v6e:2x2x1
jax: 0.10.0
libtpu: 0.0.40
codegen_flags: <defaults>
</compile_context>

<pallas_src>
import functools

import jax
import jax.numpy as jnp
from jax.experimental import pallas as pl
from jax.experimental.pallas import tpu as pltpu

sentences = [
    'Machine learning is transforming the world.',
    'I love exploring deep learning models.',
    'I enjoy going for Marathon but this weather does not allow me to do so.',
]

_STACKED_KEYS = ('wqkv', 'bqkv', 'wo', 'bo', 'g1', 'be1',
                 'w1', 'b1', 'w2', 'b2', 'g2', 'be2')


# ----------------------------------------------------------------------------
# helpers
# ----------------------------------------------------------------------------
def _layer_norm(x, gamma, beta, eps=1e-12):
    mu = jnp.mean(x, axis=-1, keepdims=True)
    var = jnp.mean(jnp.square(x - mu), axis=-1, keepdims=True)
    return (x - mu) * jax.lax.rsqrt(var + eps) * gamma + beta


# ----------------------------------------------------------------------------
# fused forward kernel (single invocation, no grid)
# ----------------------------------------------------------------------------
def _fused_forward_kernel(h_ref, bias_ref, pool_ref,
                          emb_g, emb_b,
                          wqkv, bqkv, wo, bo,
                          g1, be1, w1, b1, w2, b2, g2, be2,
                          hw, hb,
                          out_ref, *, num_heads, num_layers):
    """Whole MiniLM-style forward for the flattened batch.

    h_ref:    (B*S, D)   token + position embeddings (pre-LayerNorm)
    bias_ref: (B*S, B*S) additive attention bias (block-diag + key padding)
    pool_ref: (B, B*S)   pooling matrix = mask / clamp(count, 1e-9)
    wqkv..be2: per-layer params stacked along a leading L axis
    hw, hb:   task head weight / bias
    out_ref:  (B, n_out) logits
    """
    BS, D = h_ref.shape
    dh = D // num_heads
    scale = 1.0 / float(dh) ** 0.5

    bias = bias_ref[...]                                        # (BS, BS)
    h = _layer_norm(h_ref[...], emb_g[...], emb_b[...])          # (BS, D)

    for l in range(num_layers):                                  # static unroll
        # ---- self attention (fused QKV: one MXU matmul) ---------------------
        qkv = jnp.dot(h, wqkv[l], preferred_element_type=jnp.float32) + bqkv[l]
        q = qkv[:, 0 * D:1 * D]
        k = qkv[:, 1 * D:2 * D]
        v = qkv[:, 2 * D:3 * D]

        wo_l = wo[l]                                             # (D, D)
        attn = jnp.zeros((BS, D), jnp.float32)
        for hd in range(num_heads):                              # static unroll
            sl = slice(hd * dh, (hd + 1) * dh)
            s = jax.lax.dot_general(q[:, sl], k[:, sl],
                                    (((1,), (1,)), ((), ())),
                                    preferred_element_type=jnp.float32)
            s = s * scale + bias
            s = s - jnp.max(s, axis=-1, keepdims=True)
            e = jnp.exp(s)
            p = e * pl.reciprocal(jnp.sum(e, axis=-1, keepdims=True),
                                  approx=True)
            ctx = jnp.dot(p, v[:, sl], preferred_element_type=jnp.float32)
            # output projection folded per head -> no lane-axis concatenate
            attn = attn + jnp.dot(ctx, wo_l[sl, :],
                                  preferred_element_type=jnp.float32)
        attn = attn + bo[l]

        h1 = _layer_norm(h + attn, g1[l], be1[l])

        # ---- feed forward ----------------------------------------------------
        ff = jnp.dot(h1, w1[l], preferred_element_type=jnp.float32) + b1[l]
        ff = jax.nn.gelu(ff, approximate=True)
        ff = jnp.dot(ff, w2[l], preferred_element_type=jnp.float32) + b2[l]
        h = _layer_norm(h1 + ff, g2[l], be2[l])

    # ---- masked mean pooling (one tiny matmul) + task head epilogue ---------
    emb = jnp.dot(pool_ref[...], h, preferred_element_type=jnp.float32)  # (B, D)
    out_ref[...] = (jnp.dot(emb, hw[...], preferred_element_type=jnp.float32)
                    + hb[...])


def fused_forward_pallas(h0f, bias, pool, emb_g, emb_b, stacked, head_w, head_b,
                         *, num_heads, num_layers):
    B = pool.shape[0]
    n_out = head_w.shape[1]
    inputs = ([h0f, bias, pool, emb_g, emb_b]
              + [stacked[k] for k in _STACKED_KEYS]
              + [head_w, head_b])
    vmem = pl.BlockSpec(memory_space=pltpu.MemorySpace.VMEM)
    return pl.pallas_call(
        functools.partial(_fused_forward_kernel,
                          num_heads=num_heads, num_layers=num_layers),
        out_shape=jax.ShapeDtypeStruct((B, n_out), jnp.float32),
        in_specs=[vmem] * len(inputs),
        out_specs=vmem,
    )(*inputs)


# ----------------------------------------------------------------------------
# synthetic deterministic tokenizer (stand-in for SentenceTransformer.tokenize)
# ----------------------------------------------------------------------------
def tokenize(sents, max_len, vocab):
    ids, att = [], []
    for s in sents:
        words = s.lower().replace('.', ' ').replace(',', ' ').split()
        toks = [2 + (sum(ord(c) for c in w) % (vocab - 2)) for w in words][:max_len]
        pad = max_len - len(toks)
        ids.append(toks + [0] * pad)
        att.append([1.0] * len(toks) + [0.0] * pad)
    return jnp.array(ids, jnp.int32), jnp.array(att, jnp.float32)


# ----------------------------------------------------------------------------
# model
# ----------------------------------------------------------------------------
class MultiTaskTransformerPallas:
    def __init__(self, dim=32, num_heads=4, ffn_dim=128, num_layers=2,
                 n_topic=3, n_sent=3, vocab=64, max_len=8, seed=0):
        self.dim, self.num_heads, self.num_layers = dim, num_heads, num_layers
        self.max_len, self.vocab = max_len, vocab
        key = jax.random.PRNGKey(seed)
        n_keys = 2 + 6 * num_layers + 2
        keys = iter(jax.random.split(key, n_keys))

        def nrm(shape):
            return 0.02 * jax.random.normal(next(keys), shape, jnp.float32)

        def ones(shape):
            return jnp.ones(shape, jnp.float32)

        def zeros(shape):
            return jnp.zeros(shape, jnp.float32)

        self.word_emb = nrm((vocab, dim))
        self.pos_emb = nrm((max_len, dim))
        self.emb_gamma = ones((1, dim))
        self.emb_beta = zeros((1, dim))

        per_layer = []
        for _ in range(num_layers):
            wq, wk, wv = nrm((dim, dim)), nrm((dim, dim)), nrm((dim, dim))
            per_layer.append(dict(
                wqkv=jnp.concatenate([wq, wk, wv], axis=1),     # (D, 3D) fused
                bqkv=zeros((1, 3 * dim)),
                wo=nrm((dim, dim)), bo=zeros((1, dim)),
                g1=ones((1, dim)), be1=zeros((1, dim)),
                w1=nrm((dim, ffn_dim)), b1=zeros((1, ffn_dim)),
                w2=nrm((ffn_dim, dim)), b2=zeros((1, dim)),
                g2=ones((1, dim)), be2=zeros((1, dim)),
            ))
        # stack per-layer params along a leading L axis -> 12 refs total
        self.stacked = {k: jnp.stack([lp[k] for lp in per_layer], axis=0)
                        for k in _STACKED_KEYS}

        self.topic_w = nrm((dim, n_topic))
        self.topic_b = zeros((1, n_topic))
        self.sent_w = nrm((dim, n_sent))
        self.sent_b = zeros((1, n_sent))

    def forward(self, sents, task):
        ids, att = tokenize(sents, self.max_len, self.vocab)   # (B,S), (B,S)
        B, S = ids.shape
        BS = B * S
        D = self.dim

        # glue: embedding gather (data-dependent lookup stays in XLA)
        h0 = (self.word_emb[ids] + self.pos_emb[None, :S, :]).reshape(BS, D)

        # glue: block-diagonal + key-padding additive attention bias, (BS, BS)
        col = jnp.arange(BS)
        same_batch = (col[:, None] // S) == (col[None, :] // S)
        key_valid = att.reshape(BS)[None, :] > 0.5
        bias = jnp.where(same_batch & key_valid, 0.0, -1e9).astype(jnp.float32)

        # glue: pooling matrix  pool[b, b*S+s] = att[b,s] / clamp(count_b, 1e-9)
        counted = jnp.maximum(jnp.sum(att, axis=1, keepdims=True), 1e-9)
        att_norm = (att / counted).reshape(1, BS)
        row_sel = (jnp.arange(B)[:, None] == (col[None, :] // S)).astype(jnp.float32)
        pool = att_norm * row_sel                               # (B, BS)

        if task == 'A':
            hw, hb = self.topic_w, self.topic_b
        elif task == 'B':
            hw, hb = self.sent_w, self.sent_b
        else:
            raise ValueError("task must be 'A' or 'B'")

        return fused_forward_pallas(h0, bias, pool,
                                    self.emb_gamma, self.emb_beta,
                                    self.stacked, hw, hb,
                                    num_heads=self.num_heads,
                                    num_layers=self.num_layers)


# ----------------------------------------------------------------------------
if __name__ == "__main__":
    model = MultiTaskTransformerPallas(dim=32, num_heads=4, ffn_dim=128,
                                       num_layers=2, n_topic=3, n_sent=3,
                                       vocab=64, max_len=8, seed=0)

    logits_topic = model.forward(sentences, 'A')   # task A -> topic head
    logits_sent = model.forward(sentences, 'B')    # task B -> sentiment head

    jax.block_until_ready((logits_topic, logits_sent))

    assert logits_topic.shape == (len(sentences), 3)
    assert logits_sent.shape == (len(sentences), 3)
    assert bool(jnp.all(jnp.isfinite(logits_topic)))
    assert bool(jnp.all(jnp.isfinite(logits_sent)))
    print("KERNEL_OK")
</pallas_src>

<mosaic_0001>
module attributes {stable_mosaic.version = 11 : i64} {
  func.func @_fused_forward_kernel(%arg0: memref<24x32xf32, #tpu.memory_space<vmem>>, %arg1: memref<24x24xf32, #tpu.memory_space<vmem>>, %arg2: memref<3x24xf32, #tpu.memory_space<vmem>>, %arg3: memref<1x32xf32, #tpu.memory_space<vmem>>, %arg4: memref<1x32xf32, #tpu.memory_space<vmem>>, %arg5: memref<2x32x96xf32, #tpu.memory_space<vmem>>, %arg6: memref<2x1x96xf32, #tpu.memory_space<vmem>>, %arg7: memref<2x32x32xf32, #tpu.memory_space<vmem>>, %arg8: memref<2x1x32xf32, #tpu.memory_space<vmem>>, %arg9: memref<2x1x32xf32, #tpu.memory_space<vmem>>, %arg10: memref<2x1x32xf32, #tpu.memory_space<vmem>>, %arg11: memref<2x32x128xf32, #tpu.memory_space<vmem>>, %arg12: memref<2x1x128xf32, #tpu.memory_space<vmem>>, %arg13: memref<2x128x32xf32, #tpu.memory_space<vmem>>, %arg14: memref<2x1x32xf32, #tpu.memory_space<vmem>>, %arg15: memref<2x1x32xf32, #tpu.memory_space<vmem>>, %arg16: memref<2x1x32xf32, #tpu.memory_space<vmem>>, %arg17: memref<32x3xf32, #tpu.memory_space<vmem>>, %arg18: memref<1x3xf32, #tpu.memory_space<vmem>>, %arg19: memref<3x3xf32, #tpu.memory_space<vmem>>) attributes {dimension_semantics = [], scalar_prefetch = 0 : i64, scratch_operands = 0 : i64, tpu.core_type = #tpu.core_type<tc>} {
    %c0 = arith.constant 0 : index
    %c0_0 = arith.constant 0 : index
    %0 = vector.load %arg1[%c0, %c0_0] : memref<24x24xf32, #tpu.memory_space<vmem>>, vector<24x24xf32>
    %c0_1 = arith.constant 0 : index
    %c0_2 = arith.constant 0 : index
    %1 = vector.load %arg0[%c0_1, %c0_2] : memref<24x32xf32, #tpu.memory_space<vmem>>, vector<24x32xf32>
    %c0_3 = arith.constant 0 : index
    %c0_4 = arith.constant 0 : index
    %2 = vector.load %arg3[%c0_3, %c0_4] : memref<1x32xf32, #tpu.memory_space<vmem>>, vector<1x32xf32>
    %c0_5 = arith.constant 0 : index
    %c0_6 = arith.constant 0 : index
    %3 = vector.load %arg4[%c0_5, %c0_6] : memref<1x32xf32, #tpu.memory_space<vmem>>, vector<1x32xf32>
    %cst = arith.constant dense<0.000000e+00> : vector<24xf32>
    %4 = vector.multi_reduction <add>, %1, %cst [1] : vector<24x32xf32> to vector<24xf32>
    %5 = vector.shape_cast %4 : vector<24xf32> to vector<24x1xf32>
    %cst_7 = arith.constant 3.200000e+01 : f32
    %6 = vector.broadcast %cst_7 : f32 to vector<24x1xf32>
    %7 = arith.divf %5, %6 : vector<24x1xf32>
    %8 = vector.broadcast %7 : vector<24x1xf32> to vector<24x32xf32>
    %9 = arith.subf %1, %8 : vector<24x32xf32>
    %10 = arith.mulf %9, %9 : vector<24x32xf32>
    %cst_8 = arith.constant dense<0.000000e+00> : vector<24xf32>
    %11 = vector.multi_reduction <add>, %10, %cst_8 [1] : vector<24x32xf32> to vector<24xf32>
    %12 = vector.shape_cast %11 : vector<24xf32> to vector<24x1xf32>
    %cst_9 = arith.constant 3.200000e+01 : f32
    %13 = vector.broadcast %cst_9 : f32 to vector<24x1xf32>
    %14 = arith.divf %12, %13 : vector<24x1xf32>
    %15 = vector.broadcast %7 : vector<24x1xf32> to vector<24x32xf32>
    %16 = arith.subf %1, %15 : vector<24x32xf32>
    %cst_10 = arith.constant 9.99999996E-13 : f32
    %17 = vector.broadcast %cst_10 : f32 to vector<24x1xf32>
    %18 = arith.addf %14, %17 : vector<24x1xf32>
    %19 = math.rsqrt %18 : vector<24x1xf32>
    %20 = vector.broadcast %19 : vector<24x1xf32> to vector<24x32xf32>
    %21 = arith.mulf %16, %20 : vector<24x32xf32>
    %22 = vector.broadcast %2 : vector<1x32xf32> to vector<24x32xf32>
    %23 = arith.mulf %21, %22 : vector<24x32xf32>
    %24 = vector.broadcast %3 : vector<1x32xf32> to vector<24x32xf32>
    %25 = arith.addf %23, %24 : vector<24x32xf32>
    %c0_11 = arith.constant 0 : index
    %c0_12 = arith.constant 0 : index
    %c0_13 = arith.constant 0 : index
    %26 = vector.load %arg5[%c0_11, %c0_12, %c0_13] : memref<2x32x96xf32, #tpu.memory_space<vmem>>, vector<1x32x96xf32>
    %27 = vector.shape_cast %26 : vector<1x32x96xf32> to vector<32x96xf32>
    %cst_14 = arith.constant dense<0.000000e+00> : vector<24x96xf32>
    %28 = tpu.matmul %25, %27, %cst_14 {dimension_numbers = #tpu.dot_dimension_numbers<[1], [0], [0], [1], [0, 0, 1, 1], [], []>} : vector<24x32xf32>, vector<32x96xf32>, vector<24x96xf32> -> vector<24x96xf32>
    %c0_15 = arith.constant 0 : index
    %c0_16 = arith.constant 0 : index
    %c0_17 = arith.constant 0 : index
    %29 = vector.load %arg6[%c0_15, %c0_16, %c0_17] : memref<2x1x96xf32, #tpu.memory_space<vmem>>, vector<1x1x96xf32>
    %30 = vector.shape_cast %29 : vector<1x1x96xf32> to vector<1x96xf32>
    %31 = vector.broadcast %30 : vector<1x96xf32> to vector<24x96xf32>
    %32 = arith.addf %28, %31 : vector<24x96xf32>
    %33 = vector.extract_strided_slice %32 {offsets = [0, 0], sizes = [24, 32], strides = [1, 1]} : vector<24x96xf32> to vector<24x32xf32>
    %34 = vector.extract_strided_slice %32 {offsets = [0, 32], sizes = [24, 32], strides = [1, 1]} : vector<24x96xf32> to vector<24x32xf32>
    %35 = vector.extract_strided_slice %32 {offsets = [0, 64], sizes = [24, 32], strides = [1, 1]} : vector<24x96xf32> to vector<24x32xf32>
    %c0_18 = arith.constant 0 : index
    %c0_19 = arith.constant 0 : index
    %c0_20 = arith.constant 0 : index
    %36 = vector.load %arg7[%c0_18, %c0_19, %c0_20] : memref<2x32x32xf32, #tpu.memory_space<vmem>>, vector<1x32x32xf32>
    %37 = vector.shape_cast %36 : vector<1x32x32xf32> to vector<32x32xf32>
    %cst_21 = arith.constant 0.000000e+00 : f32
    %38 = vector.broadcast %cst_21 : f32 to vector<24x32xf32>
    %39 = vector.extract_strided_slice %33 {offsets = [0, 0], sizes = [24, 8], strides = [1, 1]} : vector<24x32xf32> to vector<24x8xf32>
    %40 = vector.extract_strided_slice %34 {offsets = [0, 0], sizes = [24, 8], strides = [1, 1]} : vector<24x32xf32> to vector<24x8xf32>
    %cst_22 = arith.constant dense<0.000000e+00> : vector<24x24xf32>
    %41 = tpu.matmul %39, %40, %cst_22 {dimension_numbers = #tpu.dot_dimension_numbers<[1], [1], [0], [0], [0, 0, 1, 0], [], []>} : vector<24x8xf32>, vector<24x8xf32>, vector<24x24xf32> -> vector<24x24xf32>
    %cst_23 = arith.constant 0.353553385 : f32
    %42 = vector.broadcast %cst_23 : f32 to vector<24x24xf32>
    %43 = arith.mulf %41, %42 : vector<24x24xf32>
    %44 = arith.addf %43, %0 : vector<24x24xf32>
    %cst_24 = arith.constant dense<0xFF800000> : vector<24xf32>
    %45 = vector.multi_reduction <maximumf>, %44, %cst_24 [1] : vector<24x24xf32> to vector<24xf32>
    %46 = vector.shape_cast %45 : vector<24xf32> to vector<24x1xf32>
    %47 = vector.broadcast %46 : vector<24x1xf32> to vector<24x24xf32>
    %48 = arith.subf %44, %47 : vector<24x24xf32>
    %49 = math.exp %48 : vector<24x24xf32>
    %cst_25 = arith.constant dense<0.000000e+00> : vector<24xf32>
    %50 = vector.multi_reduction <add>, %49, %cst_25 [1] : vector<24x24xf32> to vector<24xf32>
    %51 = vector.shape_cast %50 : vector<24xf32> to vector<24x1xf32>
    %52 = tpu.reciprocal %51 {approx = true} : vector<24x1xf32> -> vector<24x1xf32>
    %53 = vector.broadcast %52 : vector<24x1xf32> to vector<24x24xf32>
    %54 = arith.mulf %49, %53 : vector<24x24xf32>
    %55 = vector.extract_strided_slice %35 {offsets = [0, 0], sizes = [24, 8], strides = [1, 1]} : vector<24x32xf32> to vector<24x8xf32>
    %cst_26 = arith.constant dense<0.000000e+00> : vector<24x8xf32>
    %56 = tpu.matmul %54, %55, %cst_26 {dimension_numbers = #tpu.dot_dimension_numbers<[1], [0], [0], [1], [0, 0, 1, 1], [], []>} : vector<24x24xf32>, vector<24x8xf32>, vector<24x8xf32> -> vector<24x8xf32>
    %57 = vector.extract_strided_slice %37 {offsets = [0, 0], sizes = [8, 32], strides = [1, 1]} : vector<32x32xf32> to vector<8x32xf32>
    %cst_27 = arith.constant dense<0.000000e+00> : vector<24x32xf32>
    %58 = tpu.matmul %56, %57, %cst_27 {dimension_numbers = #tpu.dot_dimension_numbers<[1], [0], [0], [1], [0, 0, 1, 1], [], []>} : vector<24x8xf32>, vector<8x32xf32>, vector<24x32xf32> -> vector<24x32xf32>
    %59 = arith.addf %38, %58 : vector<24x32xf32>
    %60 = vector.extract_strided_slice %33 {offsets = [0, 8], sizes = [24, 8], strides = [1, 1]} : vector<24x32xf32> to vector<24x8xf32>
    %61 = vector.extract_strided_slice %34 {offsets = [0, 8], sizes = [24, 8], strides = [1, 1]} : vector<24x32xf32> to vector<24x8xf32>
    %cst_28 = arith.constant dense<0.000000e+00> : vector<24x24xf32>
    %62 = tpu.matmul %60, %61, %cst_28 {dimension_numbers = #tpu.dot_dimension_numbers<[1], [1], [0], [0], [0, 0, 1, 0], [], []>} : vector<24x8xf32>, vector<24x8xf32>, vector<24x24xf32> -> vector<24x24xf32>
    %cst_29 = arith.constant 0.353553385 : f32
    %63 = vector.broadcast %cst_29 : f32 to vector<24x24xf32>
    %64 = arith.mulf %62, %63 : vector<24x24xf32>
    %65 = arith.addf %64, %0 : vector<24x24xf32>
    %cst_30 = arith.constant dense<0xFF800000> : vector<24xf32>
    %66 = vector.multi_reduction <maximumf>, %65, %cst_30 [1] : vector<24x24xf32> to vector<24xf32>
    %67 = vector.shape_cast %66 : vector<24xf32> to vector<24x1xf32>
    %68 = vector.broadcast %67 : vector<24x1xf32> to vector<24x24xf32>
    %69 = arith.subf %65, %68 : vector<24x24xf32>
    %70 = math.exp %69 : vector<24x24xf32>
    %cst_31 = arith.constant dense<0.000000e+00> : vector<24xf32>
    %71 = vector.multi_reduction <add>, %70, %cst_31 [1] : vector<24x24xf32> to vector<24xf32>
    %72 = vector.shape_cast %71 : vector<24xf32> to vector<24x1xf32>
    %73 = tpu.reciprocal %72 {approx = true} : vector<24x1xf32> -> vector<24x1xf32>
    %74 = vector.broadcast %73 : vector<24x1xf32> to vector<24x24xf32>
    %75 = arith.mulf %70, %74 : vector<24x24xf32>
    %76 = vector.extract_strided_slice %35 {offsets = [0, 8], sizes = [24, 8], strides = [1, 1]} : vector<24x32xf32> to vector<24x8xf32>
    %cst_32 = arith.constant dense<0.000000e+00> : vector<24x8xf32>
    %77 = tpu.matmul %75, %76, %cst_32 {dimension_numbers = #tpu.dot_dimension_numbers<[1], [0], [0], [1], [0, 0, 1, 1], [], []>} : vector<24x24xf32>, vector<24x8xf32>, vector<24x8xf32> -> vector<24x8xf32>
    %78 = vector.extract_strided_slice %37 {offsets = [8, 0], sizes = [8, 32], strides = [1, 1]} : vector<32x32xf32> to vector<8x32xf32>
    %cst_33 = arith.constant dense<0.000000e+00> : vector<24x32xf32>
    %79 = tpu.matmul %77, %78, %cst_33 {dimension_numbers = #tpu.dot_dimension_numbers<[1], [0], [0], [1], [0, 0, 1, 1], [], []>} : vector<24x8xf32>, vector<8x32xf32>, vector<24x32xf32> -> vector<24x32xf32>
    %80 = arith.addf %59, %79 : vector<24x32xf32>
    %81 = vector.extract_strided_slice %33 {offsets = [0, 16], sizes = [24, 8], strides = [1, 1]} : vector<24x32xf32> to vector<24x8xf32>
    %82 = vector.extract_strided_slice %34 {offsets = [0, 16], sizes = [24, 8], strides = [1, 1]} : vector<24x32xf32> to vector<24x8xf32>
    %cst_34 = arith.constant dense<0.000000e+00> : vector<24x24xf32>
    %83 = tpu.matmul %81, %82, %cst_34 {dimension_numbers = #tpu.dot_dimension_numbers<[1], [1], [0], [0], [0, 0, 1, 0], [], []>} : vector<24x8xf32>, vector<24x8xf32>, vector<24x24xf32> -> vector<24x24xf32>
    %cst_35 = arith.constant 0.353553385 : f32
    %84 = vector.broadcast %cst_35 : f32 to vector<24x24xf32>
    %85 = arith.mulf %83, %84 : vector<24x24xf32>
    %86 = arith.addf %85, %0 : vector<24x24xf32>
    %cst_36 = arith.constant dense<0xFF800000> : vector<24xf32>
    %87 = vector.multi_reduction <maximumf>, %86, %cst_36 [1] : vector<24x24xf32> to vector<24xf32>
    %88 = vector.shape_cast %87 : vector<24xf32> to vector<24x1xf32>
    %89 = vector.broadcast %88 : vector<24x1xf32> to vector<24x24xf32>
    %90 = arith.subf %86, %89 : vector<24x24xf32>
    %91 = math.exp %90 : vector<24x24xf32>
    %cst_37 = arith.constant dense<0.000000e+00> : vector<24xf32>
    %92 = vector.multi_reduction <add>, %91, %cst_37 [1] : vector<24x24xf32> to vector<24xf32>
    %93 = vector.shape_cast %92 : vector<24xf32> to vector<24x1xf32>
    %94 = tpu.reciprocal %93 {approx = true} : vector<24x1xf32> -> vector<24x1xf32>
    %95 = vector.broadcast %94 : vector<24x1xf32> to vector<24x24xf32>
    %96 = arith.mulf %91, %95 : vector<24x24xf32>
    %97 = vector.extract_strided_slice %35 {offsets = [0, 16], sizes = [24, 8], strides = [1, 1]} : vector<24x32xf32> to vector<24x8xf32>
    %cst_38 = arith.constant dense<0.000000e+00> : vector<24x8xf32>
    %98 = tpu.matmul %96, %97, %cst_38 {dimension_numbers = #tpu.dot_dimension_numbers<[1], [0], [0], [1], [0, 0, 1, 1], [], []>} : vector<24x24xf32>, vector<24x8xf32>, vector<24x8xf32> -> vector<24x8xf32>
    %99 = vector.extract_strided_slice %37 {offsets = [16, 0], sizes = [8, 32], strides = [1, 1]} : vector<32x32xf32> to vector<8x32xf32>
    %cst_39 = arith.constant dense<0.000000e+00> : vector<24x32xf32>
    %100 = tpu.matmul %98, %99, %cst_39 {dimension_numbers = #tpu.dot_dimension_numbers<[1], [0], [0], [1], [0, 0, 1, 1], [], []>} : vector<24x8xf32>, vector<8x32xf32>, vector<24x32xf32> -> vector<24x32xf32>
    %101 = arith.addf %80, %100 : vector<24x32xf32>
    %102 = vector.extract_strided_slice %33 {offsets = [0, 24], sizes = [24, 8], strides = [1, 1]} : vector<24x32xf32> to vector<24x8xf32>
    %103 = vector.extract_strided_slice %34 {offsets = [0, 24], sizes = [24, 8], strides = [1, 1]} : vector<24x32xf32> to vector<24x8xf32>
    %cst_40 = arith.constant dense<0.000000e+00> : vector<24x24xf32>
    %104 = tpu.matmul %102, %103, %cst_40 {dimension_numbers = #tpu.dot_dimension_numbers<[1], [1], [0], [0], [0, 0, 1, 0], [], []>} : vector<24x8xf32>, vector<24x8xf32>, vector<24x24xf32> -> vector<24x24xf32>
    %cst_41 = arith.constant 0.353553385 : f32
    %105 = vector.broadcast %cst_41 : f32 to vector<24x24xf32>
    %106 = arith.mulf %104, %105 : vector<24x24xf32>
    %107 = arith.addf %106, %0 : vector<24x24xf32>
    %cst_42 = arith.constant dense<0xFF800000> : vector<24xf32>
    %108 = vector.multi_reduction <maximumf>, %107, %cst_42 [1] : vector<24x24xf32> to vector<24xf32>
    %109 = vector.shape_cast %108 : vector<24xf32> to vector<24x1xf32>
    %110 = vector.broadcast %109 : vector<24x1xf32> to vector<24x24xf32>
    %111 = arith.subf %107, %110 : vector<24x24xf32>
    %112 = math.exp %111 : vector<24x24xf32>
    %cst_43 = arith.constant dense<0.000000e+00> : vector<24xf32>
    %113 = vector.multi_reduction <add>, %112, %cst_43 [1] : vector<24x24xf32> to vector<24xf32>
    %114 = vector.shape_cast %113 : vector<24xf32> to vector<24x1xf32>
    %115 = tpu.reciprocal %114 {approx = true} : vector<24x1xf32> -> vector<24x1xf32>
    %116 = vector.broadcast %115 : vector<24x1xf32> to vector<24x24xf32>
    %117 = arith.mulf %112, %116 : vector<24x24xf32>
    %118 = vector.extract_strided_slice %35 {offsets = [0, 24], sizes = [24, 8], strides = [1, 1]} : vector<24x32xf32> to vector<24x8xf32>
    %cst_44 = arith.constant dense<0.000000e+00> : vector<24x8xf32>
    %119 = tpu.matmul %117, %118, %cst_44 {dimension_numbers = #tpu.dot_dimension_numbers<[1], [0], [0], [1], [0, 0, 1, 1], [], []>} : vector<24x24xf32>, vector<24x8xf32>, vector<24x8xf32> -> vector<24x8xf32>
    %120 = vector.extract_strided_slice %37 {offsets = [24, 0], sizes = [8, 32], strides = [1, 1]} : vector<32x32xf32> to vector<8x32xf32>
    %cst_45 = arith.constant dense<0.000000e+00> : vector<24x32xf32>
    %121 = tpu.matmul %119, %120, %cst_45 {dimension_numbers = #tpu.dot_dimension_numbers<[1], [0], [0], [1], [0, 0, 1, 1], [], []>} : vector<24x8xf32>, vector<8x32xf32>, vector<24x32xf32> -> vector<24x32xf32>
    %122 = arith.addf %101, %121 : vector<24x32xf32>
    %c0_46 = arith.constant 0 : index
    %c0_47 = arith.constant 0 : index
    %c0_48 = arith.constant 0 : index
    %123 = vector.load %arg8[%c0_46, %c0_47, %c0_48] : memref<2x1x32xf32, #tpu.memory_space<vmem>>, vector<1x1x32xf32>
    %124 = vector.shape_cast %123 : vector<1x1x32xf32> to vector<1x32xf32>
    %125 = vector.broadcast %124 : vector<1x32xf32> to vector<24x32xf32>
    %126 = arith.addf %122, %125 : vector<24x32xf32>
    %127 = arith.addf %25, %126 : vector<24x32xf32>
    %c0_49 = arith.constant 0 : index
    %c0_50 = arith.constant 0 : index
    %c0_51 = arith.constant 0 : index
    %128 = vector.load %arg9[%c0_49, %c0_50, %c0_51] : memref<2x1x32xf32, #tpu.memory_space<vmem>>, vector<1x1x32xf32>
    %129 = vector.shape_cast %128 : vector<1x1x32xf32> to vector<1x32xf32>
    %c0_52 = arith.constant 0 : index
    %c0_53 = arith.constant 0 : index
    %c0_54 = arith.constant 0 : index
    %130 = vector.load %arg10[%c0_52, %c0_53, %c0_54] : memref<2x1x32xf32, #tpu.memory_space<vmem>>, vector<1x1x32xf32>
    %131 = vector.shape_cast %130 : vector<1x1x32xf32> to vector<1x32xf32>
    %cst_55 = arith.constant dense<0.000000e+00> : vector<24xf32>
    %132 = vector.multi_reduction <add>, %127, %cst_55 [1] : vector<24x32xf32> to vector<24xf32>
    %133 = vector.shape_cast %132 : vector<24xf32> to vector<24x1xf32>
    %cst_56 = arith.constant 3.200000e+01 : f32
    %134 = vector.broadcast %cst_56 : f32 to vector<24x1xf32>
    %135 = arith.divf %133, %134 : vector<24x1xf32>
    %136 = vector.broadcast %135 : vector<24x1xf32> to vector<24x32xf32>
    %137 = arith.subf %127, %136 : vector<24x32xf32>
    %138 = arith.mulf %137, %137 : vector<24x32xf32>
    %cst_57 = arith.constant dense<0.000000e+00> : vector<24xf32>
    %139 = vector.multi_reduction <add>, %138, %cst_57 [1] : vector<24x32xf32> to vector<24xf32>
    %140 = vector.shape_cast %139 : vector<24xf32> to vector<24x1xf32>
    %cst_58 = arith.constant 3.200000e+01 : f32
    %141 = vector.broadcast %cst_58 : f32 to vector<24x1xf32>
    %142 = arith.divf %140, %141 : vector<24x1xf32>
    %143 = vector.broadcast %135 : vector<24x1xf32> to vector<24x32xf32>
    %144 = arith.subf %127, %143 : vector<24x32xf32>
    %cst_59 = arith.constant 9.99999996E-13 : f32
    %145 = vector.broadcast %cst_59 : f32 to vector<24x1xf32>
    %146 = arith.addf %142, %145 : vector<24x1xf32>
    %147 = math.rsqrt %146 : vector<24x1xf32>
    %148 = vector.broadcast %147 : vector<24x1xf32> to vector<24x32xf32>
    %149 = arith.mulf %144, %148 : vector<24x32xf32>
    %150 = vector.broadcast %129 : vector<1x32xf32> to vector<24x32xf32>
    %151 = arith.mulf %149, %150 : vector<24x32xf32>
    %152 = vector.broadcast %131 : vector<1x32xf32> to vector<24x32xf32>
    %153 = arith.addf %151, %152 : vector<24x32xf32>
    %c0_60 = arith.constant 0 : index
    %c0_61 = arith.constant 0 : index
    %c0_62 = arith.constant 0 : index
    %154 = vector.load %arg11[%c0_60, %c0_61, %c0_62] : memref<2x32x128xf32, #tpu.memory_space<vmem>>, vector<1x32x128xf32>
    %155 = vector.shape_cast %154 : vector<1x32x128xf32> to vector<32x128xf32>
    %cst_63 = arith.constant dense<0.000000e+00> : vector<24x128xf32>
    %156 = tpu.matmul %153, %155, %cst_63 {dimension_numbers = #tpu.dot_dimension_numbers<[1], [0], [0], [1], [0, 0, 1, 1], [], []>} : vector<24x32xf32>, vector<32x128xf32>, vector<24x128xf32> -> vector<24x128xf32>
    %c0_64 = arith.constant 0 : index
    %c0_65 = arith.constant 0 : index
    %c0_66 = arith.constant 0 : index
    %157 = vector.load %arg12[%c0_64, %c0_65, %c0_66] : memref<2x1x128xf32, #tpu.memory_space<vmem>>, vector<1x1x128xf32>
    %158 = vector.shape_cast %157 : vector<1x1x128xf32> to vector<1x128xf32>
    %159 = vector.broadcast %158 : vector<1x128xf32> to vector<24x128xf32>
    %160 = arith.addf %156, %159 : vector<24x128xf32>
    %161 = arith.mulf %160, %160 : vector<24x128xf32>
    %162 = arith.mulf %160, %161 : vector<24x128xf32>
    %cst_67 = arith.constant 4.471500e-02 : f32
    %163 = vector.broadcast %cst_67 : f32 to vector<24x128xf32>
    %164 = arith.mulf %163, %162 : vector<24x128xf32>
    %165 = arith.addf %160, %164 : vector<24x128xf32>
    %cst_68 = arith.constant 0.797884583 : f32
    %166 = vector.broadcast %cst_68 : f32 to vector<24x128xf32>
    %167 = arith.mulf %166, %165 : vector<24x128xf32>
    %168 = math.tanh %167 : vector<24x128xf32>
    %cst_69 = arith.constant 1.000000e+00 : f32
    %169 = vector.broadcast %cst_69 : f32 to vector<24x128xf32>
    %170 = arith.addf %169, %168 : vector<24x128xf32>
    %cst_70 = arith.constant 5.000000e-01 : f32
    %171 = vector.broadcast %cst_70 : f32 to vector<24x128xf32>
    %172 = arith.mulf %171, %170 : vector<24x128xf32>
    %173 = arith.mulf %160, %172 : vector<24x128xf32>
    %c0_71 = arith.constant 0 : index
    %c0_72 = arith.constant 0 : index
    %c0_73 = arith.constant 0 : index
    %174 = vector.load %arg13[%c0_71, %c0_72, %c0_73] : memref<2x128x32xf32, #tpu.memory_space<vmem>>, vector<1x128x32xf32>
    %175 = vector.shape_cast %174 : vector<1x128x32xf32> to vector<128x32xf32>
    %cst_74 = arith.constant dense<0.000000e+00> : vector<24x32xf32>
    %176 = tpu.matmul %173, %175, %cst_74 {dimension_numbers = #tpu.dot_dimension_numbers<[1], [0], [0], [1], [0, 0, 1, 1], [], []>} : vector<24x128xf32>, vector<128x32xf32>, vector<24x32xf32> -> vector<24x32xf32>
    %c0_75 = arith.constant 0 : index
    %c0_76 = arith.constant 0 : index
    %c0_77 = arith.constant 0 : index
    %177 = vector.load %arg14[%c0_75, %c0_76, %c0_77] : memref<2x1x32xf32, #tpu.memory_space<vmem>>, vector<1x1x32xf32>
    %178 = vector.shape_cast %177 : vector<1x1x32xf32> to vector<1x32xf32>
    %179 = vector.broadcast %178 : vector<1x32xf32> to vector<24x32xf32>
    %180 = arith.addf %176, %179 : vector<24x32xf32>
    %181 = arith.addf %153, %180 : vector<24x32xf32>
    %c0_78 = arith.constant 0 : index
    %c0_79 = arith.constant 0 : index
    %c0_80 = arith.constant 0 : index
    %182 = vector.load %arg15[%c0_78, %c0_79, %c0_80] : memref<2x1x32xf32, #tpu.memory_space<vmem>>, vector<1x1x32xf32>
    %183 = vector.shape_cast %182 : vector<1x1x32xf32> to vector<1x32xf32>
    %c0_81 = arith.constant 0 : index
    %c0_82 = arith.constant 0 : index
    %c0_83 = arith.constant 0 : index
    %184 = vector.load %arg16[%c0_81, %c0_82, %c0_83] : memref<2x1x32xf32, #tpu.memory_space<vmem>>, vector<1x1x32xf32>
    %185 = vector.shape_cast %184 : vector<1x1x32xf32> to vector<1x32xf32>
    %cst_84 = arith.constant dense<0.000000e+00> : vector<24xf32>
    %186 = vector.multi_reduction <add>, %181, %cst_84 [1] : vector<24x32xf32> to vector<24xf32>
    %187 = vector.shape_cast %186 : vector<24xf32> to vector<24x1xf32>
    %cst_85 = arith.constant 3.200000e+01 : f32
    %188 = vector.broadcast %cst_85 : f32 to vector<24x1xf32>
    %189 = arith.divf %187, %188 : vector<24x1xf32>
    %190 = vector.broadcast %189 : vector<24x1xf32> to vector<24x32xf32>
    %191 = arith.subf %181, %190 : vector<24x32xf32>
    %192 = arith.mulf %191, %191 : vector<24x32xf32>
    %cst_86 = arith.constant dense<0.000000e+00> : vector<24xf32>
    %193 = vector.multi_reduction <add>, %192, %cst_86 [1] : vector<24x32xf32> to vector<24xf32>
    %194 = vector.shape_cast %193 : vector<24xf32> to vector<24x1xf32>
    %cst_87 = arith.constant 3.200000e+01 : f32
    %195 = vector.broadcast %cst_87 : f32 to vector<24x1xf32>
    %196 = arith.divf %194, %195 : vector<24x1xf32>
    %197 = vector.broadcast %189 : vector<24x1xf32> to vector<24x32xf32>
    %198 = arith.subf %181, %197 : vector<24x32xf32>
    %cst_88 = arith.constant 9.99999996E-13 : f32
    %199 = vector.broadcast %cst_88 : f32 to vector<24x1xf32>
    %200 = arith.addf %196, %199 : vector<24x1xf32>
    %201 = math.rsqrt %200 : vector<24x1xf32>
    %202 = vector.broadcast %201 : vector<24x1xf32> to vector<24x32xf32>
    %203 = arith.mulf %198, %202 : vector<24x32xf32>
    %204 = vector.broadcast %183 : vector<1x32xf32> to vector<24x32xf32>
    %205 = arith.mulf %203, %204 : vector<24x32xf32>
    %206 = vector.broadcast %185 : vector<1x32xf32> to vector<24x32xf32>
    %207 = arith.addf %205, %206 : vector<24x32xf32>
    %c1 = arith.constant 1 : index
    %c0_89 = arith.constant 0 : index
    %c0_90 = arith.constant 0 : index
    %208 = vector.load %arg5[%c1, %c0_89, %c0_90] : memref<2x32x96xf32, #tpu.memory_space<vmem>>, vector<1x32x96xf32>
    %209 = vector.shape_cast %208 : vector<1x32x96xf32> to vector<32x96xf32>
    %cst_91 = arith.constant dense<0.000000e+00> : vector<24x96xf32>
    %210 = tpu.matmul %207, %209, %cst_91 {dimension_numbers = #tpu.dot_dimension_numbers<[1], [0], [0], [1], [0, 0, 1, 1], [], []>} : vector<24x32xf32>, vector<32x96xf32>, vector<24x96xf32> -> vector<24x96xf32>
    %c1_92 = arith.constant 1 : index
    %c0_93 = arith.constant 0 : index
    %c0_94 = arith.constant 0 : index
    %211 = vector.load %arg6[%c1_92, %c0_93, %c0_94] : memref<2x1x96xf32, #tpu.memory_space<vmem>>, vector<1x1x96xf32>
    %212 = vector.shape_cast %211 : vector<1x1x96xf32> to vector<1x96xf32>
    %213 = vector.broadcast %212 : vector<1x96xf32> to vector<24x96xf32>
    %214 = arith.addf %210, %213 : vector<24x96xf32>
    %215 = vector.extract_strided_slice %214 {offsets = [0, 0], sizes = [24, 32], strides = [1, 1]} : vector<24x96xf32> to vector<24x32xf32>
    %216 = vector.extract_strided_slice %214 {offsets = [0, 32], sizes = [24, 32], strides = [1, 1]} : vector<24x96xf32> to vector<24x32xf32>
    %217 = vector.extract_strided_slice %214 {offsets = [0, 64], sizes = [24, 32], strides = [1, 1]} : vector<24x96xf32> to vector<24x32xf32>
    %c1_95 = arith.constant 1 : index
    %c0_96 = arith.constant 0 : index
    %c0_97 = arith.constant 0 : index
    %218 = vector.load %arg7[%c1_95, %c0_96, %c0_97] : memref<2x32x32xf32, #tpu.memory_space<vmem>>, vector<1x32x32xf32>
    %219 = vector.shape_cast %218 : vector<1x32x32xf32> to vector<32x32xf32>
    %cst_98 = arith.constant 0.000000e+00 : f32
    %220 = vector.broadcast %cst_98 : f32 to vector<24x32xf32>
    %221 = vector.extract_strided_slice %215 {offsets = [0, 0], sizes = [24, 8], strides = [1, 1]} : vector<24x32xf32> to vector<24x8xf32>
    %222 = vector.extract_strided_slice %216 {offsets = [0, 0], sizes = [24, 8], strides = [1, 1]} : vector<24x32xf32> to vector<24x8xf32>
    %cst_99 = arith.constant dense<0.000000e+00> : vector<24x24xf32>
    %223 = tpu.matmul %221, %222, %cst_99 {dimension_numbers = #tpu.dot_dimension_numbers<[1], [1], [0], [0], [0, 0, 1, 0], [], []>} : vector<24x8xf32>, vector<24x8xf32>, vector<24x24xf32> -> vector<24x24xf32>
    %cst_100 = arith.constant 0.353553385 : f32
    %224 = vector.broadcast %cst_100 : f32 to vector<24x24xf32>
    %225 = arith.mulf %223, %224 : vector<24x24xf32>
    %226 = arith.addf %225, %0 : vector<24x24xf32>
    %cst_101 = arith.constant dense<0xFF800000> : vector<24xf32>
    %227 = vector.multi_reduction <maximumf>, %226, %cst_101 [1] : vector<24x24xf32> to vector<24xf32>
    %228 = vector.shape_cast %227 : vector<24xf32> to vector<24x1xf32>
    %229 = vector.broadcast %228 : vector<24x1xf32> to vector<24x24xf32>
    %230 = arith.subf %226, %229 : vector<24x24xf32>
    %231 = math.exp %230 : vector<24x24xf32>
    %cst_102 = arith.constant dense<0.000000e+00> : vector<24xf32>
    %232 = vector.multi_reduction <add>, %231, %cst_102 [1] : vector<24x24xf32> to vector<24xf32>
    %233 = vector.shape_cast %232 : vector<24xf32> to vector<24x1xf32>
    %234 = tpu.reciprocal %233 {approx = true} : vector<24x1xf32> -> vector<24x1xf32>
    %235 = vector.broadcast %234 : vector<24x1xf32> to vector<24x24xf32>
    %236 = arith.mulf %231, %235 : vector<24x24xf32>
    %237 = vector.extract_strided_slice %217 {offsets = [0, 0], sizes = [24, 8], strides = [1, 1]} : vector<24x32xf32> to vector<24x8xf32>
    %cst_103 = arith.constant dense<0.000000e+00> : vector<24x8xf32>
    %238 = tpu.matmul %236, %237, %cst_103 {dimension_numbers = #tpu.dot_dimension_numbers<[1], [0], [0], [1], [0, 0, 1, 1], [], []>} : vector<24x24xf32>, vector<24x8xf32>, vector<24x8xf32> -> vector<24x8xf32>
    %239 = vector.extract_strided_slice %219 {offsets = [0, 0], sizes = [8, 32], strides = [1, 1]} : vector<32x32xf32> to vector<8x32xf32>
    %cst_104 = arith.constant dense<0.000000e+00> : vector<24x32xf32>
    %240 = tpu.matmul %238, %239, %cst_104 {dimension_numbers = #tpu.dot_dimension_numbers<[1], [0], [0], [1], [0, 0, 1, 1], [], []>} : vector<24x8xf32>, vector<8x32xf32>, vector<24x32xf32> -> vector<24x32xf32>
    %241 = arith.addf %220, %240 : vector<24x32xf32>
    %242 = vector.extract_strided_slice %215 {offsets = [0, 8], sizes = [24, 8], strides = [1, 1]} : vector<24x32xf32> to vector<24x8xf32>
    %243 = vector.extract_strided_slice %216 {offsets = [0, 8], sizes = [24, 8], strides = [1, 1]} : vector<24x32xf32> to vector<24x8xf32>
    %cst_105 = arith.constant dense<0.000000e+00> : vector<24x24xf32>
    %244 = tpu.matmul %242, %243, %cst_105 {dimension_numbers = #tpu.dot_dimension_numbers<[1], [1], [0], [0], [0, 0, 1, 0], [], []>} : vector<24x8xf32>, vector<24x8xf32>, vector<24x24xf32> -> vector<24x24xf32>
    %cst_106 = arith.constant 0.353553385 : f32
    %245 = vector.broadcast %cst_106 : f32 to vector<24x24xf32>
    %246 = arith.mulf %244, %245 : vector<24x24xf32>
    %247 = arith.addf %246, %0 : vector<24x24xf32>
    %cst_107 = arith.constant dense<0xFF800000> : vector<24xf32>
    %248 = vector.multi_reduction <maximumf>, %247, %cst_107 [1] : vector<24x24xf32> to vector<24xf32>
    %249 = vector.shape_cast %248 : vector<24xf32> to vector<24x1xf32>
    %250 = vector.broadcast %249 : vector<24x1xf32> to vector<24x24xf32>
    %251 = arith.subf %247, %250 : vector<24x24xf32>
    %252 = math.exp %251 : vector<24x24xf32>
    %cst_108 = arith.constant dense<0.000000e+00> : vector<24xf32>
    %253 = vector.multi_reduction <add>, %252, %cst_108 [1] : vector<24x24xf32> to vector<24xf32>
    %254 = vector.shape_cast %253 : vector<24xf32> to vector<24x1xf32>
    %255 = tpu.reciprocal %254 {approx = true} : vector<24x1xf32> -> vector<24x1xf32>
    %256 = vector.broadcast %255 : vector<24x1xf32> to vector<24x24xf32>
    %257 = arith.mulf %252, %256 : vector<24x24xf32>
    %258 = vector.extract_strided_slice %217 {offsets = [0, 8], sizes = [24, 8], strides = [1, 1]} : vector<24x32xf32> to vector<24x8xf32>
    %cst_109 = arith.constant dense<0.000000e+00> : vector<24x8xf32>
    %259 = tpu.matmul %257, %258, %cst_109 {dimension_numbers = #tpu.dot_dimension_numbers<[1], [0], [0], [1], [0, 0, 1, 1], [], []>} : vector<24x24xf32>, vector<24x8xf32>, vector<24x8xf32> -> vector<24x8xf32>
    %260 = vector.extract_strided_slice %219 {offsets = [8, 0], sizes = [8, 32], strides = [1, 1]} : vector<32x32xf32> to vector<8x32xf32>
    %cst_110 = arith.constant dense<0.000000e+00> : vector<24x32xf32>
    %261 = tpu.matmul %259, %260, %cst_110 {dimension_numbers = #tpu.dot_dimension_numbers<[1], [0], [0], [1], [0, 0, 1, 1], [], []>} : vector<24x8xf32>, vector<8x32xf32>, vector<24x32xf32> -> vector<24x32xf32>
    %262 = arith.addf %241, %261 : vector<24x32xf32>
    %263 = vector.extract_strided_slice %215 {offsets = [0, 16], sizes = [24, 8], strides = [1, 1]} : vector<24x32xf32> to vector<24x8xf32>
    %264 = vector.extract_strided_slice %216 {offsets = [0, 16], sizes = [24, 8], strides = [1, 1]} : vector<24x32xf32> to vector<24x8xf32>
    %cst_111 = arith.constant dense<0.000000e+00> : vector<24x24xf32>
    %265 = tpu.matmul %263, %264, %cst_111 {dimension_numbers = #tpu.dot_dimension_numbers<[1], [1], [0], [0], [0, 0, 1, 0], [], []>} : vector<24x8xf32>, vector<24x8xf32>, vector<24x24xf32> -> vector<24x24xf32>
    %cst_112 = arith.constant 0.353553385 : f32
    %266 = vector.broadcast %cst_112 : f32 to vector<24x24xf32>
    %267 = arith.mulf %265, %266 : vector<24x24xf32>
    %268 = arith.addf %267, %0 : vector<24x24xf32>
    %cst_113 = arith.constant dense<0xFF800000> : vector<24xf32>
    %269 = vector.multi_reduction <maximumf>, %268, %cst_113 [1] : vector<24x24xf32> to vector<24xf32>
    %270 = vector.shape_cast %269 : vector<24xf32> to vector<24x1xf32>
    %271 = vector.broadcast %270 : vector<24x1xf32> to vector<24x24xf32>
    %272 = arith.subf %268, %271 : vector<24x24xf32>
    %273 = math.exp %272 : vector<24x24xf32>
    %cst_114 = arith.constant dense<0.000000e+00> : vector<24xf32>
    %274 = vector.multi_reduction <add>, %273, %cst_114 [1] : vector<24x24xf32> to vector<24xf32>
    %275 = vector.shape_cast %274 : vector<24xf32> to vector<24x1xf32>
    %276 = tpu.reciprocal %275 {approx = true} : vector<24x1xf32> -> vector<24x1xf32>
    %277 = vector.broadcast %276 : vector<24x1xf32> to vector<24x24xf32>
    %278 = arith.mulf %273, %277 : vector<24x24xf32>
    %279 = vector.extract_strided_slice %217 {offsets = [0, 16], sizes = [24, 8], strides = [1, 1]} : vector<24x32xf32> to vector<24x8xf32>
    %cst_115 = arith.constant dense<0.000000e+00> : vector<24x8xf32>
    %280 = tpu.matmul %278, %279, %cst_115 {dimension_numbers = #tpu.dot_dimension_numbers<[1], [0], [0], [1], [0, 0, 1, 1], [], []>} : vector<24x24xf32>, vector<24x8xf32>, vector<24x8xf32> -> vector<24x8xf32>
    %281 = vector.extract_strided_slice %219 {offsets = [16, 0], sizes = [8, 32], strides = [1, 1]} : vector<32x32xf32> to vector<8x32xf32>
    %cst_116 = arith.constant dense<0.000000e+00> : vector<24x32xf32>
    %282 = tpu.matmul %280, %281, %cst_116 {dimension_numbers = #tpu.dot_dimension_numbers<[1], [0], [0], [1], [0, 0, 1, 1], [], []>} : vector<24x8xf32>, vector<8x32xf32>, vector<24x32xf32> -> vector<24x32xf32>
    %283 = arith.addf %262, %282 : vector<24x32xf32>
    %284 = vector.extract_strided_slice %215 {offsets = [0, 24], sizes = [24, 8], strides = [1, 1]} : vector<24x32xf32> to vector<24x8xf32>
    %285 = vector.extract_strided_slice %216 {offsets = [0, 24], sizes = [24, 8], strides = [1, 1]} : vector<24x32xf32> to vector<24x8xf32>
    %cst_117 = arith.constant dense<0.000000e+00> : vector<24x24xf32>
    %286 = tpu.matmul %284, %285, %cst_117 {dimension_numbers = #tpu.dot_dimension_numbers<[1], [1], [0], [0], [0, 0, 1, 0], [], []>} : vector<24x8xf32>, vector<24x8xf32>, vector<24x24xf32> -> vector<24x24xf32>
    %cst_118 = arith.constant 0.353553385 : f32
    %287 = vector.broadcast %cst_118 : f32 to vector<24x24xf32>
    %288 = arith.mulf %286, %287 : vector<24x24xf32>
    %289 = arith.addf %288, %0 : vector<24x24xf32>
    %cst_119 = arith.constant dense<0xFF800000> : vector<24xf32>
    %290 = vector.multi_reduction <maximumf>, %289, %cst_119 [1] : vector<24x24xf32> to vector<24xf32>
    %291 = vector.shape_cast %290 : vector<24xf32> to vector<24x1xf32>
    %292 = vector.broadcast %291 : vector<24x1xf32> to vector<24x24xf32>
    %293 = arith.subf %289, %292 : vector<24x24xf32>
    %294 = math.exp %293 : vector<24x24xf32>
    %cst_120 = arith.constant dense<0.000000e+00> : vector<24xf32>
    %295 = vector.multi_reduction <add>, %294, %cst_120 [1] : vector<24x24xf32> to vector<24xf32>
    %296 = vector.shape_cast %295 : vector<24xf32> to vector<24x1xf32>
    %297 = tpu.reciprocal %296 {approx = true} : vector<24x1xf32> -> vector<24x1xf32>
    %298 = vector.broadcast %297 : vector<24x1xf32> to vector<24x24xf32>
    %299 = arith.mulf %294, %298 : vector<24x24xf32>
    %300 = vector.extract_strided_slice %217 {offsets = [0, 24], sizes = [24, 8], strides = [1, 1]} : vector<24x32xf32> to vector<24x8xf32>
    %cst_121 = arith.constant dense<0.000000e+00> : vector<24x8xf32>
    %301 = tpu.matmul %299, %300, %cst_121 {dimension_numbers = #tpu.dot_dimension_numbers<[1], [0], [0], [1], [0, 0, 1, 1], [], []>} : vector<24x24xf32>, vector<24x8xf32>, vector<24x8xf32> -> vector<24x8xf32>
    %302 = vector.extract_strided_slice %219 {offsets = [24, 0], sizes = [8, 32], strides = [1, 1]} : vector<32x32xf32> to vector<8x32xf32>
    %cst_122 = arith.constant dense<0.000000e+00> : vector<24x32xf32>
    %303 = tpu.matmul %301, %302, %cst_122 {dimension_numbers = #tpu.dot_dimension_numbers<[1], [0], [0], [1], [0, 0, 1, 1], [], []>} : vector<24x8xf32>, vector<8x32xf32>, vector<24x32xf32> -> vector<24x32xf32>
    %304 = arith.addf %283, %303 : vector<24x32xf32>
    %c1_123 = arith.constant 1 : index
    %c0_124 = arith.constant 0 : index
    %c0_125 = arith.constant 0 : index
    %305 = vector.load %arg8[%c1_123, %c0_124, %c0_125] : memref<2x1x32xf32, #tpu.memory_space<vmem>>, vector<1x1x32xf32>
    %306 = vector.shape_cast %305 : vector<1x1x32xf32> to vector<1x32xf32>
    %307 = vector.broadcast %306 : vector<1x32xf32> to vector<24x32xf32>
    %308 = arith.addf %304, %307 : vector<24x32xf32>
    %309 = arith.addf %207, %308 : vector<24x32xf32>
    %c1_126 = arith.constant 1 : index
    %c0_127 = arith.constant 0 : index
    %c0_128 = arith.constant 0 : index
    %310 = vector.load %arg9[%c1_126, %c0_127, %c0_128] : memref<2x1x32xf32, #tpu.memory_space<vmem>>, vector<1x1x32xf32>
    %311 = vector.shape_cast %310 : vector<1x1x32xf32> to vector<1x32xf32>
    %c1_129 = arith.constant 1 : index
    %c0_130 = arith.constant 0 : index
    %c0_131 = arith.constant 0 : index
    %312 = vector.load %arg10[%c1_129, %c0_130, %c0_131] : memref<2x1x32xf32, #tpu.memory_space<vmem>>, vector<1x1x32xf32>
    %313 = vector.shape_cast %312 : vector<1x1x32xf32> to vector<1x32xf32>
    %cst_132 = arith.constant dense<0.000000e+00> : vector<24xf32>
    %314 = vector.multi_reduction <add>, %309, %cst_132 [1] : vector<24x32xf32> to vector<24xf32>
    %315 = vector.shape_cast %314 : vector<24xf32> to vector<24x1xf32>
    %cst_133 = arith.constant 3.200000e+01 : f32
    %316 = vector.broadcast %cst_133 : f32 to vector<24x1xf32>
    %317 = arith.divf %315, %316 : vector<24x1xf32>
    %318 = vector.broadcast %317 : vector<24x1xf32> to vector<24x32xf32>
    %319 = arith.subf %309, %318 : vector<24x32xf32>
    %320 = arith.mulf %319, %319 : vector<24x32xf32>
    %cst_134 = arith.constant dense<0.000000e+00> : vector<24xf32>
    %321 = vector.multi_reduction <add>, %320, %cst_134 [1] : vector<24x32xf32> to vector<24xf32>
    %322 = vector.shape_cast %321 : vector<24xf32> to vector<24x1xf32>
    %cst_135 = arith.constant 3.200000e+01 : f32
    %323 = vector.broadcast %cst_135 : f32 to vector<24x1xf32>
    %324 = arith.divf %322, %323 : vector<24x1xf32>
    %325 = vector.broadcast %317 : vector<24x1xf32> to vector<24x32xf32>
    %326 = arith.subf %309, %325 : vector<24x32xf32>
    %cst_136 = arith.constant 9.99999996E-13 : f32
    %327 = vector.broadcast %cst_136 : f32 to vector<24x1xf32>
    %328 = arith.addf %324, %327 : vector<24x1xf32>
    %329 = math.rsqrt %328 : vector<24x1xf32>
    %330 = vector.broadcast %329 : vector<24x1xf32> to vector<24x32xf32>
    %331 = arith.mulf %326, %330 : vector<24x32xf32>
    %332 = vector.broadcast %311 : vector<1x32xf32> to vector<24x32xf32>
    %333 = arith.mulf %331, %332 : vector<24x32xf32>
    %334 = vector.broadcast %313 : vector<1x32xf32> to vector<24x32xf32>
    %335 = arith.addf %333, %334 : vector<24x32xf32>
    %c1_137 = arith.constant 1 : index
    %c0_138 = arith.constant 0 : index
    %c0_139 = arith.constant 0 : index
    %336 = vector.load %arg11[%c1_137, %c0_138, %c0_139] : memref<2x32x128xf32, #tpu.memory_space<vmem>>, vector<1x32x128xf32>
    %337 = vector.shape_cast %336 : vector<1x32x128xf32> to vector<32x128xf32>
    %cst_140 = arith.constant dense<0.000000e+00> : vector<24x128xf32>
    %338 = tpu.matmul %335, %337, %cst_140 {dimension_numbers = #tpu.dot_dimension_numbers<[1], [0], [0], [1], [0, 0, 1, 1], [], []>} : vector<24x32xf32>, vector<32x128xf32>, vector<24x128xf32> -> vector<24x128xf32>
    %c1_141 = arith.constant 1 : index
    %c0_142 = arith.constant 0 : index
    %c0_143 = arith.constant 0 : index
    %339 = vector.load %arg12[%c1_141, %c0_142, %c0_143] : memref<2x1x128xf32, #tpu.memory_space<vmem>>, vector<1x1x128xf32>
    %340 = vector.shape_cast %339 : vector<1x1x128xf32> to vector<1x128xf32>
    %341 = vector.broadcast %340 : vector<1x128xf32> to vector<24x128xf32>
    %342 = arith.addf %338, %341 : vector<24x128xf32>
    %343 = arith.mulf %342, %342 : vector<24x128xf32>
    %344 = arith.mulf %342, %343 : vector<24x128xf32>
    %cst_144 = arith.constant 4.471500e-02 : f32
    %345 = vector.broadcast %cst_144 : f32 to vector<24x128xf32>
    %346 = arith.mulf %345, %344 : vector<24x128xf32>
    %347 = arith.addf %342, %346 : vector<24x128xf32>
    %cst_145 = arith.constant 0.797884583 : f32
    %348 = vector.broadcast %cst_145 : f32 to vector<24x128xf32>
    %349 = arith.mulf %348, %347 : vector<24x128xf32>
    %350 = math.tanh %349 : vector<24x128xf32>
    %cst_146 = arith.constant 1.000000e+00 : f32
    %351 = vector.broadcast %cst_146 : f32 to vector<24x128xf32>
    %352 = arith.addf %351, %350 : vector<24x128xf32>
    %cst_147 = arith.constant 5.000000e-01 : f32
    %353 = vector.broadcast %cst_147 : f32 to vector<24x128xf32>
    %354 = arith.mulf %353, %352 : vector<24x128xf32>
    %355 = arith.mulf %342, %354 : vector<24x128xf32>
    %c1_148 = arith.constant 1 : index
    %c0_149 = arith.constant 0 : index
    %c0_150 = arith.constant 0 : index
    %356 = vector.load %arg13[%c1_148, %c0_149, %c0_150] : memref<2x128x32xf32, #tpu.memory_space<vmem>>, vector<1x128x32xf32>
    %357 = vector.shape_cast %356 : vector<1x128x32xf32> to vector<128x32xf32>
    %cst_151 = arith.constant dense<0.000000e+00> : vector<24x32xf32>
    %358 = tpu.matmul %355, %357, %cst_151 {dimension_numbers = #tpu.dot_dimension_numbers<[1], [0], [0], [1], [0, 0, 1, 1], [], []>} : vector<24x128xf32>, vector<128x32xf32>, vector<24x32xf32> -> vector<24x32xf32>
    %c1_152 = arith.constant 1 : index
    %c0_153 = arith.constant 0 : index
    %c0_154 = arith.constant 0 : index
    %359 = vector.load %arg14[%c1_152, %c0_153, %c0_154] : memref<2x1x32xf32, #tpu.memory_space<vmem>>, vector<1x1x32xf32>
    %360 = vector.shape_cast %359 : vector<1x1x32xf32> to vector<1x32xf32>
    %361 = vector.broadcast %360 : vector<1x32xf32> to vector<24x32xf32>
    %362 = arith.addf %358, %361 : vector<24x32xf32>
    %363 = arith.addf %335, %362 : vector<24x32xf32>
    %c1_155 = arith.constant 1 : index
    %c0_156 = arith.constant 0 : index
    %c0_157 = arith.constant 0 : index
    %364 = vector.load %arg15[%c1_155, %c0_156, %c0_157] : memref<2x1x32xf32, #tpu.memory_space<vmem>>, vector<1x1x32xf32>
    %365 = vector.shape_cast %364 : vector<1x1x32xf32> to vector<1x32xf32>
    %c1_158 = arith.constant 1 : index
    %c0_159 = arith.constant 0 : index
    %c0_160 = arith.constant 0 : index
    %366 = vector.load %arg16[%c1_158, %c0_159, %c0_160] : memref<2x1x32xf32, #tpu.memory_space<vmem>>, vector<1x1x32xf32>
    %367 = vector.shape_cast %366 : vector<1x1x32xf32> to vector<1x32xf32>
    %cst_161 = arith.constant dense<0.000000e+00> : vector<24xf32>
    %368 = vector.multi_reduction <add>, %363, %cst_161 [1] : vector<24x32xf32> to vector<24xf32>
    %369 = vector.shape_cast %368 : vector<24xf32> to vector<24x1xf32>
    %cst_162 = arith.constant 3.200000e+01 : f32
    %370 = vector.broadcast %cst_162 : f32 to vector<24x1xf32>
    %371 = arith.divf %369, %370 : vector<24x1xf32>
    %372 = vector.broadcast %371 : vector<24x1xf32> to vector<24x32xf32>
    %373 = arith.subf %363, %372 : vector<24x32xf32>
    %374 = arith.mulf %373, %373 : vector<24x32xf32>
    %cst_163 = arith.constant dense<0.000000e+00> : vector<24xf32>
    %375 = vector.multi_reduction <add>, %374, %cst_163 [1] : vector<24x32xf32> to vector<24xf32>
    %376 = vector.shape_cast %375 : vector<24xf32> to vector<24x1xf32>
    %cst_164 = arith.constant 3.200000e+01 : f32
    %377 = vector.broadcast %cst_164 : f32 to vector<24x1xf32>
    %378 = arith.divf %376, %377 : vector<24x1xf32>
    %379 = vector.broadcast %371 : vector<24x1xf32> to vector<24x32xf32>
    %380 = arith.subf %363, %379 : vector<24x32xf32>
    %cst_165 = arith.constant 9.99999996E-13 : f32
    %381 = vector.broadcast %cst_165 : f32 to vector<24x1xf32>
    %382 = arith.addf %378, %381 : vector<24x1xf32>
    %383 = math.rsqrt %382 : vector<24x1xf32>
    %384 = vector.broadcast %383 : vector<24x1xf32> to vector<24x32xf32>
    %385 = arith.mulf %380, %384 : vector<24x32xf32>
    %386 = vector.broadcast %365 : vector<1x32xf32> to vector<24x32xf32>
    %387 = arith.mulf %385, %386 : vector<24x32xf32>
    %388 = vector.broadcast %367 : vector<1x32xf32> to vector<24x32xf32>
    %389 = arith.addf %387, %388 : vector<24x32xf32>
    %c0_166 = arith.constant 0 : index
    %c0_167 = arith.constant 0 : index
    %390 = vector.load %arg2[%c0_166, %c0_167] : memref<3x24xf32, #tpu.memory_space<vmem>>, vector<3x24xf32>
    %cst_168 = arith.constant dense<0.000000e+00> : vector<3x32xf32>
    %391 = tpu.matmul %390, %389, %cst_168 {dimension_numbers = #tpu.dot_dimension_numbers<[1], [0], [0], [1], [0, 0, 1, 1], [], []>} : vector<3x24xf32>, vector<24x32xf32>, vector<3x32xf32> -> vector<3x32xf32>
    %c0_169 = arith.constant 0 : index
    %c0_170 = arith.constant 0 : index
    %392 = vector.load %arg17[%c0_169, %c0_170] : memref<32x3xf32, #tpu.memory_space<vmem>>, vector<32x3xf32>
    %cst_171 = arith.constant dense<0.000000e+00> : vector<3x3xf32>
    %393 = tpu.matmul %391, %392, %cst_171 {dimension_numbers = #tpu.dot_dimension_numbers<[1], [0], [0], [1], [0, 0, 1, 1], [], []>} : vector<3x32xf32>, vector<32x3xf32>, vector<3x3xf32> -> vector<3x3xf32>
    %c0_172 = arith.constant 0 : index
    %c0_173 = arith.constant 0 : index
    %394 = vector.load %arg18[%c0_172, %c0_173] : memref<1x3xf32, #tpu.memory_space<vmem>>, vector<1x3xf32>
    %395 = vector.broadcast %394 : vector<1x3xf32> to vector<3x3xf32>
    %396 = arith.addf %393, %395 : vector<3x3xf32>
    %c0_174 = arith.constant 0 : index
    %c0_175 = arith.constant 0 : index
    %397 = vector.load %arg19[%c0_174, %c0_175] : memref<3x3xf32, #tpu.memory_space<vmem>>, vector<3x3xf32>
    tpu.vector_store %arg19[%c0_174, %c0_175], %396 {strides = array<i32>} : memref<3x3xf32, #tpu.memory_space<vmem>>, vector<3x3xf32>,
    return
  }
}

</mosaic_0001>

<bundles_post_ra>
// kernel: tpu_custom_call.1
= control target key start
LH: loop header
LB: loop body
LE: loop exit
PB: predicated region body
PF: predicated region fallthrough
CT: control target
= control target key end

     0   :  { %s6098_s0 = inlined_call_operand.vmem [shape: f32[24,32], index: 0, kind: input, shape index: {}]   ;;  %s6099_s1 = inlined_call_operand.vmem [shape: f32[24,24], index: 1, kind: input, shape index: {}]   ;;  %s6100_s2 = inlined_call_operand.vmem [shape: f32[3,24], index: 2, kind: input, shape index: {}]   ;;  %s6101_s3 = inlined_call_operand.vmem [shape: f32[1,32], index: 3, kind: input, shape index: {}]   ;;  %s6102_s4 = inlined_call_operand.vmem [shape: f32[1,32], index: 4, kind: input, shape index: {}]   ;;  %s6103_s5 = inlined_call_operand.vmem [shape: f32[2,32,96], index: 5, kind: input, shape index: {}]   ;;  %s6104_s6 = inlined_call_operand.vmem [shape: f32[2,1,96], index: 6, kind: input, shape index: {}]   ;;  %s6105_s7 = inlined_call_operand.vmem [shape: f32[2,32,32], index: 7, kind: input, shape index: {}]   ;;  %s6106_s8 = inlined_call_operand.vmem [shape: f32[2,1,32], index: 8, kind: input, shape index: {}]   ;;  %s6107_s9 = inlined_call_operand.vmem [shape: f32[2,1,32], index: 9, kind: input, shape index: {}]   ;;  %s6108_s10 = inlined_call_operand.vmem [shape: f32[2,1,32], index: 10, kind: input, shape index: {}]   ;;  %s6109_s11 = inlined_call_operand.vmem [shape: f32[2,32,128], index: 11, kind: input, shape index: {}]   ;;  %s6110_s12 = inlined_call_operand.vmem [shape: f32[2,1,128], index: 12, kind: input, shape index: {}]   ;;  %s6111_s13 = inlined_call_operand.vmem [shape: f32[2,128,32], index: 13, kind: input, shape index: {}]   ;;  %s6112_s14 = inlined_call_operand.vmem [shape: f32[2,1,32], index: 14, kind: input, shape index: {}]   ;;  %s6113_s15 = inlined_call_operand.vmem [shape: f32[2,1,32], index: 15, kind: input, shape index: {}]   ;;  %s6114_s16 = inlined_call_operand.vmem [shape: f32[2,1,32], index: 16, kind: input, shape index: {}]   ;;  %s6115_s17 = inlined_call_operand.vmem [shape: f32[32,3], index: 17, kind: input, shape index: {}]   ;;  %s6116_s18 = inlined_call_operand.vmem [shape: f32[1,3], index: 18, kind: input, shape index: {}]   ;;  %s6117_s19 = inlined_call_operand.hbm [shape: f32[3,3], index: 19, kind: output, shape index: {}]  }
   0x1   :  { %6128 = sst [smem:[#allocation5_spill]] %s6098_s0 }
   0x2   :  { %6129 = sst [smem:[#allocation6_spill]] %s6099_s1 }
   0x3   :  { %6130 = sst [smem:[#allocation7_spill]] %s6100_s2 }
   0x4   :  { %6131 = sst [smem:[#allocation8_spill]] %s6101_s3 }
   0x5   :  { %s6132_s20 = sld [smem:[#allocation5_spill]]  ;;  %vm71_vm0 = vcmask 261120  }
   0xb   :  { %v66_v0 = vld [vmem:[%s6132_s20] sm:$0xff]  ;;  %v68_v1 = vld [vmem:[%s6132_s20 + $0x10] sm:$0xff]  ;;  %v67_v2 = vld [vmem:[%s6132_s20 + $0x8] sm:$0xff] }
   0xc   :  { %v72_v3 = vsel %vm71_vm0, %v66_v0, 0.0  ;;  %v78_v4 = vsel %vm71_vm0, %v68_v1, 0.0 }
   0xd   :  { %24 = vsyncpa [#allocation3], 0  ;;  %73 = vadd.xlane.f32.xlu0 %v72_v3  ;;  %79 = vadd.xlane.f32.xlu1 %v78_v4  ;;  %v75_v5 = vsel %vm71_vm0, %v67_v2, 0.0  ;;  %v133_v21 = vld [vmem:[%s6103_s5 + $0x18] sm:$0xff]  ;;  %v4949_v22 = vmov 0.0   ;;  %v132_v23 = vld [vmem:[%s6103_s5 + $0x10] sm:$0xff] }
   0xe   :  { %4268 = vmatprep.subr.mxu0 %v4949_v22  ;;  %vm4950_vm1 = vmmov 0   ;;  %4285 = vmatprep.subr.mxu1 %v4949_v22  ;;  %v131_v24 = vld [vmem:[%s6103_s5 + $0x8] sm:$0xff]  ;;  %v130_v25 = vld [vmem:[%s6103_s5] sm:$0xff]  ;;  %s6133_s20 = sld [smem:[#allocation8_spill]]  ;;  %s4951_s2 = smov 96   ;;  %vm243_vm2 = vcmask 64512  }
   0xf   :  { %4276 = vmatprep.mubr.msk.f32.mxu0 %vm4950_vm1, %v4949_v22  ;;  %4269 = vmatpush3.msra.mxu0 %v133_v21  ;;  %v3901_v38 = vld [vmem:[%s6102_s4] ss:$0 sm:$0xff]  ;;  %s6134_s25 = sld [smem:[#allocation6_spill]]  ;;  %vm342_vm3 = vcmask 195584   ;;  %s4952_s29 = smov 64   ;;  %vm3884_vm4 = vcmask 18432  }
  0x10   :  { %4270 = vmatprep.subr.mxu0 %v4949_v22  ;;  %4291 = vmatprep.mubr.msk.f32.mxu1 %vm4950_vm1, %v4949_v22  ;;  %v3902_v51 = vld [vmem:[%s6104_s6] ss:$0 sm:$0xff]  ;;  %s4953_s0 = smov 88   ;;  %s4954_s30 = smov 120  }
  0x11   :  { %76 = vadd.xlane.f32.xlu0 %v75_v5  ;;  %4271 = vmatpush3.msra.mxu0 %v132_v23  ;;  %s4956_s21 = smov 80   ;;  %s4957_s1 = smov 112  }
  0x12   :  { %4272 = vmatprep.subr.mxu0 %v4949_v22  ;;  %s6126_s3 = smov 48   ;;  %s6124_s26 = smov 72  }
  0x13   :  { %4273 = vmatpush3.msra.mxu0 %v131_v24  ;;  %s6122_s27 = smov 104   ;;  %s6120_s22 = smov 40  }
  0x14   :  { %4274 = vmatprep.subr.mxu0 %v4949_v22  ;;  %v3900_v36 = vld [vmem:[%s6133_s20] ss:$0 sm:$0xff]  ;;  %s4955_s20 = smov 56   ;;  %s6136_s4 = smov 72  }
  0x15   :  { %4275 = vmatpush3.msra.mxu0 %v130_v25  ;;  %v5160_v63 = vld [vmem:[%s6134_s25] sm:$0xff]  ;;  %v5166_v4 = vld [vmem:[%s6134_s25 + $0x8] sm:$0xff] }
  0x16   :  { %4300 = vmatprep.subr.mxu0 %v4949_v22 }
  0x96   :  { %v74_v6 = vpop.xlane.xlu0 %73  ;;  %v80_v7 = vpop.xlane.xlu1 %79 }
  0x97   :  { %v82_v8 = vmul.f32 0.03125, %v74_v6  ;;  %v84_v9 = vmul.f32 0.03125, %v80_v7 }
  0x99   :  { %v85_v10 = vsub.f32 %v66_v0, %v82_v8  ;;  %v87_v11 = vsub.f32 %v68_v1, %v84_v9 }
  0x9a   :  { %v77_v12 = vpop.xlane.xlu0 %76 }
  0x9b   :  { %v83_v13 = vmul.f32 0.03125, %v77_v12  ;;  %v88_v14 = vmul.f32 %v85_v10, %v85_v10  ;;  %v90_v15 = vmul.f32 %v87_v11, %v87_v11 }
  0x9d   :  { %v86_v16 = vsub.f32 %v67_v2, %v83_v13  ;;  %v91_v17 = vsel %vm71_vm0, %v88_v14, 0.0  ;;  %v97_v18 = vsel %vm71_vm0, %v90_v15, 0.0 }
  0x9e   :  { %92 = vadd.xlane.f32.xlu1 %v91_v17 }
  0x9f   :  { %v89_v19 = vmul.f32 %v86_v16, %v86_v16 }
  0xa1   :  { %v94_v20 = vsel %vm71_vm0, %v89_v19, 0.0 }
  0xa2   :  { %98 = vadd.xlane.f32.xlu1 %v97_v18  ;;  %95 = vadd.xlane.f32.xlu0 %v94_v20 }
 0x127   :  { %v93_v26 = vpop.xlane.xlu1 %92 }
 0x128   :  { %v100_v27 = vmul.f32 0.03125, %v93_v26 }
 0x12a   :  { %v103_v28 = vadd.f32 1e-12, %v100_v27 }
 0x12b   :  { %v99_v29 = vpop.xlane.xlu1 %98  ;;  %v96_v30 = vpop.xlane.xlu0 %95 }
 0x12c   :  { %4786 = vrsqrt.f32 %v103_v28  ;;  %v102_v31 = vmul.f32 0.03125, %v99_v29  ;;  %v101_v32 = vmul.f32 0.03125, %v96_v30 }
 0x12e   :  { %v105_v33 = vadd.f32 1e-12, %v102_v31  ;;  %v104_v34 = vadd.f32 1e-12, %v101_v32 }
 0x130   :  { %4788 = vrsqrt.f32 %v105_v33 }
 0x131   :  { %4790 = vrsqrt.f32 %v104_v34 }
 0x139   :  { %v4787_v35 = vpop.eup %4786 }
 0x13a   :  { %v109_v37 = vmul.f32 %v4787_v35, %v85_v10  ;;  %v5173_v10 = vld [vmem:[%s6134_s25 + $0x10] sm:$0xff] }
 0x13c   :  { %v118_v39 = vmul.f32 %v3900_v36, %v109_v37 }
 0x13d   :  { %v4789_v40 = vpop.eup %4788 }
 0x13e   :  { %v4791_v41 = vpop.eup %4790  ;;  %v5106_v42 = vadd.f32 %v3901_v38, %v118_v39  ;;  %v111_v44 = vmul.f32 %v4789_v40, %v87_v11 }
 0x13f   :  { %v110_v43 = vmul.f32 %v4791_v41, %v86_v16 }
 0x140   :  { %4277 = vmatmul.mubr.msk.f32.vlgmr.msra.gmra.mxu0 %vm71_vm0, %v5106_v42  ;;  %v120_v47 = vmul.f32 %v3900_v36, %v111_v44 }
 0x141   :  { %4279 = vmatprep.mubr.msk.f32.mxu0 %vm4950_vm1, %v4949_v22  ;;  %v119_v45 = vmul.f32 %v3900_v36, %v110_v43 }
 0x142   :  { %v5118_v48 = vadd.f32 %v3901_v38, %v120_v47 }
 0x143   :  { %v5112_v46 = vadd.f32 %v3901_v38, %v119_v45 }
 0x145   :  { %4280 = vmatmul.mubr.msk.f32.gmra.mxu0 %vm71_vm0, %v5112_v46 }
 0x146   :  { %4282 = vmatprep.mubr.msk.f32.mxu0 %vm4950_vm1, %v4949_v22 }
 0x149   :  { %4283 = vmatmul.mubr.msk.f32.gmra.mxu0 %vm71_vm0, %v5118_v48 }
 0x14a   :  { %4306 = vmatprep.mubr.msk.f32.mxu0 %vm4950_vm1, %v4949_v22 }
 0x200   :  { %v216_v49 = vpop.f32.mrf.mxu0 }
 0x201   :  { %v5131_v56 = vadd.f32 %v3902_v51, %v216_v49 }
 0x202   :  { %v4278_v50 = vpop.f32.mrf.mxu0 }
 0x205   :  { %v221_v52 = vpop.f32.mrf.mxu0 }
 0x206   :  { %v5127_v53 = vadd.f32 %v3902_v51, %v221_v52 }
 0x207   :  { %v4281_v54 = vpop.f32.mrf.mxu0 }
 0x208   :  { %239 = vrot.lane.b32.xlu1 %v5127_v53, %s4951_s2 }
 0x209   :  { %v226_v55 = vpop.f32.mrf.mxu0 }
 0x20a   :  { %v5133_v57 = vadd.f32 %v3902_v51, %v226_v55 }
 0x20b   :  { %v4284_v58 = vpop.f32.mrf.mxu0 }
 0x20c   :  { %237 = vrot.lane.b32.xlu1 %v5131_v56, %s4951_s2  ;;  %241 = vrot.lane.b32.xlu0 %v5133_v57, %s4951_s2 }
 0x27a   :  { %v240_v60 = vpop.permute.xlu1 %239 }
 0x27e   :  { %v242_v59 = vpop.permute.xlu0 %241  ;;  %v238_v61 = vpop.permute.xlu1 %237 }
 0x27f   :  { %4286 = vmatpush3.xpose.msk.msra.mxu1 %vm243_vm2, %v242_v59 }
 0x280   :  { %4287 = vmatprep.subr.mxu1 %v4949_v22 }
 0x283   :  { %4288 = vmatpush3.xpose.msk.msra.mxu1 %vm243_vm2, %v240_v60 }
 0x284   :  { %4289 = vmatprep.subr.mxu1 %v4949_v22 }
 0x287   :  { %4290 = vmatpush3.xpose.msk.msra.mxu1 %vm243_vm2, %v238_v61 }
 0x288   :  { %4766 = vmatprep.subr.mxu1 %v4949_v22 }
 0x28a   :  { %4292 = vmatmul.mubr.msk.f32.vlgmr.msra.gmra.mxu1 %vm243_vm2, %v5131_v56 }
 0x28b   :  { %4294 = vmatprep.mubr.msk.f32.mxu1 %vm4950_vm1, %v4949_v22 }
 0x28e   :  { %4295 = vmatmul.mubr.msk.f32.gmra.mxu1 %vm243_vm2, %v5127_v53 }
 0x28f   :  { %4297 = vmatprep.mubr.msk.f32.mxu1 %vm4950_vm1, %v4949_v22 }
 0x292   :  { %4298 = vmatmul.mubr.msk.f32.gmra.mxu1 %vm243_vm2, %v5133_v57 }
 0x293   :  { %4327 = vmatprep.mubr.msk.f32.mxu1 %vm4950_vm1, %v4949_v22 }
 0x34a   :  { %v322_v62 = vpop.f32.mrf.mxu1 }
 0x34b   :  { %v336_v0 = vmul.f32 0.35355338, %v322_v62 }
 0x34c   :  { %v4293_v1 = vpop.f32.mrf.mxu1 }
 0x34d   :  { %v339_v2 = vadd.f32 %v336_v0, %v5160_v63 }
 0x34e   :  { %v327_v3 = vpop.f32.mrf.mxu1 }
 0x34f   :  { %v337_v5 = vmul.f32 0.35355338, %v327_v3  ;;  %v343_v6 = vsel %vm342_vm3, %v339_v2, -inf }
 0x350   :  { %v4296_v7 = vpop.f32.mrf.mxu1  ;;  %344 = vmax.xlane.f32.xlu1 %v343_v6 }
 0x351   :  { %v340_v8 = vadd.f32 %v337_v5, %v5166_v4 }
 0x352   :  { %v332_v9 = vpop.f32.mrf.mxu1 }
 0x353   :  { %v338_v11 = vmul.f32 0.35355338, %v332_v9  ;;  %v346_v12 = vsel %vm342_vm3, %v340_v8, -inf }
 0x354   :  { %v4299_v13 = vpop.f32.mrf.mxu1  ;;  %347 = vmax.xlane.f32.xlu0 %v346_v12 }
 0x355   :  { %v341_v14 = vadd.f32 %v338_v11, %v5173_v10 }
 0x357   :  { %v349_v15 = vsel %vm342_vm3, %v341_v14, -inf }
 0x358   :  { %350 = vmax.xlane.f32.xlu0 %v349_v15 }
 0x361   :  { %380 = vrot.lane.b32.xlu1 %v5133_v57, %s4952_s29 }
 0x365   :  { %376 = vrot.lane.b32.xlu1 %v5131_v56, %s4952_s29 }
 0x369   :  { %484 = vrot.lane.b32.xlu1 %v5133_v57, %s4953_s0 }
 0x36d   :  { %482 = vrot.lane.b32.xlu1 %v5127_v53, %s4953_s0 }
 0x3d9   :  { %v345_v16 = vpop.xlane.xlu1 %344 }
 0x3da   :  { %v352_v17 = vsub.f32 %v339_v2, %v345_v16 }
 0x3dc   :  { %v355_v18 = vmul.f32 1.442695, %v352_v17 }
 0x3dd   :  { %v348_v19 = vpop.xlane.xlu0 %347  ;;  %v381_v20 = vpop.permute.xlu1 %380 }
 0x3de   :  { %4792 = vpow2.f32 %v355_v18  ;;  %v353_v21 = vsub.f32 %v340_v8, %v348_v19  ;;  %4301 = vmatpush3.msra.mxu0 %v381_v20 }
 0x3df   :  { %4302 = vmatprep.subr.mxu0 %v4949_v22 }
 0x3e0   :  { %v357_v23 = vmul.f32 1.442695, %v353_v21 }
 0x3e1   :  { %v377_v24 = vpop.permute.xlu1 %376  ;;  %v351_v31 = vpop.xlane.xlu0 %350 }
 0x3e2   :  { %4794 = vpow2.f32 %v357_v23  ;;  %v354_v32 = vsub.f32 %v341_v14, %v351_v31 }
 0x3e4   :  { %v359_v33 = vmul.f32 1.442695, %v354_v32  ;;  %v231_v32 = vld [vmem:[%s6105_s7 + $0x8] sm:$0xff] }
 0x3e5   :  { %v485_v25 = vpop.permute.xlu1 %484 }
 0x3e6   :  { %4769 = vmatpush3.xpose.msk.msra.mxu1 %vm243_vm2, %v485_v25  ;;  %4796 = vpow2.f32 %v359_v33 }
 0x3e7   :  { %4767 = vmatprep.subr.mxu1 %v4949_v22 }
 0x3e9   :  { %v483_v26 = vpop.permute.xlu1 %482 }
 0x3ea   :  { %4770 = vmatpush3.xpose.msk.msra.mxu1 %vm243_vm2, %v483_v26 }
 0x3eb   :  { %v4793_v27 = vpop.eup %4792  ;;  %4768 = vmatprep.subr.mxu1 %v4949_v22 }
 0x3ec   :  { %v361_v28 = vsel %vm342_vm3, %v4793_v27, 0.0 }
 0x3ed   :  { %362 = vadd.xlane.f32.xlu0 %v361_v28 }
 0x3ef   :  { %v4795_v29 = vpop.eup %4794 }
 0x3f0   :  { %v364_v30 = vsel %vm342_vm3, %v4795_v29, 0.0 }
 0x3f1   :  { %365 = vadd.xlane.f32.xlu1 %v364_v30 }
 0x3f3   :  { %v4797_v34 = vpop.eup %4796 }
 0x3f4   :  { %v367_v35 = vsel %vm342_vm3, %v4797_v34, 0.0 }
 0x402   :  { %474 = vrot.lane.b32.xlu1 %v5131_v56, %s4954_s30 }
 0x403   :  { %378 = vrot.lane.b32.xlu0 %v5127_v53, %s4952_s29 }
 0x406   :  { %478 = vrot.lane.b32.xlu1 %v5133_v57, %s4954_s30 }
 0x422   :  { %368 = vadd.xlane.f32.xlu0 %v367_v35 }
 0x438   :  { %480 = vrot.lane.b32.xlu0 %v5131_v56, %s4953_s0 }
 0x43c   :  { %476 = vrot.lane.b32.xlu0 %v5127_v53, %s4954_s30 }
 0x476   :  { %v363_v36 = vpop.xlane.xlu0 %362 }
 0x477   :  { %4798 = vrcp.f32 %v363_v36 }
 0x47a   :  { %v379_v37 = vpop.permute.xlu0 %378  ;;  %v366_v38 = vpop.xlane.xlu1 %365 }
 0x47b   :  { %4800 = vrcp.f32 %v366_v38  ;;  %4303 = vmatpush3.msra.mxu0 %v379_v37 }
 0x47c   :  { %4304 = vmatprep.subr.mxu0 %v4949_v22 }
 0x47d   :  { %4305 = vmatpush3.msra.mxu0 %v377_v24 }
 0x47e   :  { %4315 = vmatprep.subr.mxu0 %v4949_v22  ;;  %v475_v45 = vpop.permute.xlu1 %474 }
 0x482   :  { %v479_v49 = vpop.permute.xlu1 %478 }
 0x484   :  { %v4799_v39 = vpop.eup %4798 }
 0x485   :  { %v373_v40 = vmul.f32 %v4799_v39, %v4793_v27 }
 0x487   :  { %4307 = vmatmul.mubr.msk.f32.vlgmr.msra.gmra.mxu0 %vm342_vm3, %v373_v40 }
 0x488   :  { %v4801_v41 = vpop.eup %4800  ;;  %4316 = vmatpush3.xpose.msk.msra.mxu0 %vm243_vm2, %v485_v25  ;;  %4309 = vmatprep.mubr.msk.f32.mxu0 %vm4950_vm1, %v4949_v22 }
 0x489   :  { %4317 = vmatprep.subr.mxu0 %v4949_v22  ;;  %v374_v43 = vmul.f32 %v4801_v41, %v4795_v29  ;;  %v230_v41 = vld [vmem:[%s6105_s7] sm:$0xff] }
 0x48b   :  { %4310 = vmatmul.mubr.msk.f32.gmra.mxu0 %vm342_vm3, %v374_v43 }
 0x48c   :  { %4318 = vmatpush3.xpose.msk.msra.mxu0 %vm243_vm2, %v483_v26  ;;  %4312 = vmatprep.mubr.msk.f32.mxu0 %vm4950_vm1, %v4949_v22 }
 0x48d   :  { %4319 = vmatprep.subr.mxu0 %v4949_v22 }
 0x4ab   :  { %v369_v44 = vpop.xlane.xlu0 %368 }
 0x4ac   :  { %4802 = vrcp.f32 %v369_v44 }
 0x4af   :  { %v481_v47 = vpop.permute.xlu0 %480 }
 0x4b0   :  { %4320 = vmatpush3.xpose.msk.msra.mxu0 %vm243_vm2, %v481_v47  ;;  %4771 = vmatpush3.xpose.msk.msra.mxu1 %vm243_vm2, %v481_v47 }
 0x4b1   :  { %4330 = vmatprep.subr.mxu0 %v4949_v22  ;;  %4345 = vmatprep.subr.mxu1 %v4949_v22 }
 0x4b3   :  { %4328 = vmatmul.mubr.msk.f32.vlgmr.msra.gmra.mxu1 %vm243_vm2, %v479_v49  ;;  %v477_v52 = vpop.permute.xlu0 %476 }
 0x4b4   :  { %4347 = vmatprep.mubr.msk.f32.mxu1 %vm4950_vm1, %v4949_v22  ;;  %4346 = vmatpush3.msra.mxu1 %v231_v32 }
 0x4b5   :  { %4367 = vmatprep.subr.mxu1 %v4949_v22 }
 0x4b9   :  { %v4803_v50 = vpop.eup %4802 }
 0x4ba   :  { %v375_v51 = vmul.f32 %v4803_v50, %v4797_v34 }
 0x4bc   :  { %4313 = vmatmul.mubr.msk.f32.gmra.mxu0 %vm342_vm3, %v375_v51 }
 0x4bd   :  { %4321 = vmatprep.mubr.msk.f32.mxu0 %vm4950_vm1, %v4949_v22 }
 0x4c0   :  { %4322 = vmatmul.mubr.msk.f32.vlgmr.msra.gmra.mxu0 %vm243_vm2, %v475_v45 }
 0x4c1   :  { %4324 = vmatprep.mubr.msk.f32.mxu0 %vm4950_vm1, %v4949_v22 }
 0x4c4   :  { %4325 = vmatmul.mubr.msk.f32.gmra.mxu0 %vm243_vm2, %v477_v52 }
 0x4c5   :  { %4336 = vmatprep.mubr.msk.f32.mxu0 %vm4950_vm1, %v4949_v22 }
 0x547   :  { %v5232_v54 = vpop.f32.mrf.mxu0 }
 0x549   :  { %v4308_v55 = vpop.f32.mrf.mxu0 }
 0x54b   :  { %v5234_v58 = vpop.f32.mrf.mxu0 }
 0x54d   :  { %v4311_v59 = vpop.f32.mrf.mxu0 }
 0x573   :  { %v574_v60 = vpop.f32.mrf.mxu1 }
 0x574   :  { %v580_v2 = vmul.f32 0.35355338, %v574_v60 }
 0x575   :  { %v4329_v61 = vpop.f32.mrf.mxu1 }
 0x576   :  { %v583_v11 = vadd.f32 %v580_v2, %v5173_v10 }
 0x578   :  { %v590_v15 = vsel %vm342_vm3, %v583_v11, -inf }
 0x57c   :  { %v5236_v62 = vpop.f32.mrf.mxu0 }
 0x57e   :  { %v4314_v0 = vpop.f32.mrf.mxu0 }
 0x580   :  { %v564_v1 = vpop.f32.mrf.mxu0 }
 0x581   :  { %v578_v3 = vmul.f32 0.35355338, %v564_v1 }
 0x582   :  { %v4323_v5 = vpop.f32.mrf.mxu0 }
 0x583   :  { %v581_v6 = vadd.f32 %v578_v3, %v5160_v63 }
 0x584   :  { %v569_v7 = vpop.f32.mrf.mxu0 }
 0x585   :  { %v579_v8 = vmul.f32 0.35355338, %v569_v7  ;;  %v584_v9 = vsel %vm342_vm3, %v581_v6, -inf }
 0x586   :  { %585 = vmax.xlane.f32.xlu0 %v584_v9  ;;  %v4326_v12 = vpop.f32.mrf.mxu0 }
 0x587   :  { %v582_v13 = vadd.f32 %v579_v8, %v5166_v4 }
 0x589   :  { %v587_v14 = vsel %vm342_vm3, %v582_v13, -inf }
 0x58a   :  { %588 = vmax.xlane.f32.xlu1 %v587_v14  ;;  %591 = vmax.xlane.f32.xlu0 %v590_v15 }
 0x60f   :  { %v586_v16 = vpop.xlane.xlu0 %585 }
 0x610   :  { %v593_v17 = vsub.f32 %v581_v6, %v586_v16 }
 0x612   :  { %v596_v18 = vmul.f32 1.442695, %v593_v17 }
 0x613   :  { %v592_v19 = vpop.xlane.xlu0 %591  ;;  %v589_v20 = vpop.xlane.xlu1 %588 }
 0x614   :  { %4804 = vpow2.f32 %v596_v18  ;;  %v595_v21 = vsub.f32 %v583_v11, %v592_v19  ;;  %v594_v23 = vsub.f32 %v582_v13, %v589_v20 }
 0x616   :  { %v600_v24 = vmul.f32 1.442695, %v595_v21  ;;  %v598_v25 = vmul.f32 1.442695, %v594_v23 }
 0x618   :  { %4806 = vpow2.f32 %v600_v24 }
 0x619   :  { %4808 = vpow2.f32 %v598_v25 }
 0x621   :  { %v4805_v26 = vpop.eup %4804 }
 0x622   :  { %v602_v27 = vsel %vm342_vm3, %v4805_v26, 0.0 }
 0x623   :  { %603 = vadd.xlane.f32.xlu0 %v602_v27 }
 0x625   :  { %v4807_v28 = vpop.eup %4806 }
 0x626   :  { %v4809_v29 = vpop.eup %4808  ;;  %v608_v30 = vsel %vm342_vm3, %v4807_v28, 0.0 }
 0x627   :  { %609 = vadd.xlane.f32.xlu1 %v608_v30  ;;  %v605_v31 = vsel %vm342_vm3, %v4809_v29, 0.0 }
 0x628   :  { %606 = vadd.xlane.f32.xlu0 %v605_v31 }
 0x638   :  { %619 = vrot.lane.b32.xlu1 %v5127_v53, %s4955_s20 }
 0x63c   :  { %617 = vrot.lane.b32.xlu1 %v5131_v56, %s4955_s20 }
 0x63e   :  { %621 = vrot.lane.b32.xlu0 %v5133_v57, %s4955_s20 }
 0x640   :  { %903 = vrot.lane.b32.xlu1 %v5133_v57, %s4956_s21 }
 0x642   :  { %901 = vrot.lane.b32.xlu0 %v5127_v53, %s4956_s21 }
 0x644   :  { %899 = vrot.lane.b32.xlu1 %v5131_v56, %s4956_s21 }
 0x646   :  { %893 = vrot.lane.b32.xlu0 %v5131_v56, %s4957_s1 }
 0x648   :  { %895 = vrot.lane.b32.xlu1 %v5127_v53, %s4957_s1 }
 0x64a   :  { %897 = vrot.lane.b32.xlu0 %v5133_v57, %s4957_s1 }
 0x6ac   :  { %v604_v33 = vpop.xlane.xlu0 %603 }
 0x6ad   :  { %4810 = vrcp.f32 %v604_v33 }
 0x6b0   :  { %v610_v34 = vpop.xlane.xlu1 %609 }
 0x6b1   :  { %v607_v35 = vpop.xlane.xlu0 %606 }
 0x6b2   :  { %4812 = vrcp.f32 %v607_v35 }
 0x6b3   :  { %4814 = vrcp.f32 %v610_v34 }
 0x6b4   :  { %v620_v36 = vpop.permute.xlu1 %619 }
 0x6b5   :  { %v622_v37 = vpop.permute.xlu0 %621 }
 0x6b6   :  { %4331 = vmatpush3.msra.mxu0 %v622_v37 }
 0x6b7   :  { %4332 = vmatprep.subr.mxu0 %v4949_v22 }
 0x6b8   :  { %4333 = vmatpush3.msra.mxu0 %v620_v36  ;;  %v618_v38 = vpop.permute.xlu1 %617 }
 0x6b9   :  { %4334 = vmatprep.subr.mxu0 %v4949_v22 }
 0x6ba   :  { %v4811_v39 = vpop.eup %4810  ;;  %4335 = vmatpush3.msra.mxu0 %v618_v38 }
 0x6bb   :  { %v614_v40 = vmul.f32 %v4811_v39, %v4805_v26  ;;  %4356 = vmatprep.subr.mxu0 %v4949_v22 }
 0x6bc   :  { %v904_v50 = vpop.permute.xlu1 %903 }
 0x6bd   :  { %4337 = vmatmul.mubr.msk.f32.vlgmr.msra.gmra.mxu0 %vm342_vm3, %v614_v40 }
 0x6be   :  { %4339 = vmatprep.mubr.msk.f32.mxu0 %vm4950_vm1, %v4949_v22  ;;  %4357 = vmatpush3.msra.mxu0 %v230_v41 }
 0x6bf   :  { %v4813_v43 = vpop.eup %4812  ;;  %4382 = vmatprep.subr.mxu0 %v4949_v22 }
 0x6c0   :  { %v615_v44 = vmul.f32 %v4813_v43, %v4809_v29  ;;  %v4815_v45 = vpop.eup %4814  ;;  %v900_v59 = vpop.permute.xlu1 %899 }
 0x6c1   :  { %v616_v47 = vmul.f32 %v4815_v45, %v4807_v28 }
 0x6c2   :  { %4340 = vmatmul.mubr.msk.f32.gmra.mxu0 %vm342_vm3, %v615_v44 }
 0x6c3   :  { %4342 = vmatprep.mubr.msk.f32.mxu0 %vm4950_vm1, %v4949_v22 }
 0x6c4   :  { %v896_v1 = vpop.permute.xlu1 %895 }
 0x6c6   :  { %4343 = vmatmul.mubr.msk.f32.gmra.mxu0 %vm342_vm3, %v616_v47 }
 0x6c7   :  { %4358 = vmatprep.mubr.msk.f32.mxu0 %vm4950_vm1, %v4949_v22 }
 0x6ca   :  { %4359 = vmatmul.mubr.msk.f32.vlgmr.msra.gmra.mxu0 %vm243_vm2, %v5232_v54  ;;  %v902_v54 = vpop.permute.xlu0 %901 }
 0x6cb   :  { %4361 = vmatprep.mubr.msk.f32.mxu0 %vm4950_vm1, %v4949_v22 }
 0x6ce   :  { %4362 = vmatmul.mubr.msk.f32.gmra.mxu0 %vm243_vm2, %v5234_v58  ;;  %v894_v61 = vpop.permute.xlu0 %893 }
 0x6cf   :  { %4364 = vmatprep.mubr.msk.f32.mxu0 %vm4950_vm1, %v4949_v22 }
 0x6d2   :  { %4365 = vmatmul.mubr.msk.f32.gmra.mxu0 %vm243_vm2, %v5236_v62  ;;  %v898_v5 = vpop.permute.xlu0 %897 }
 0x6d3   :  { %4388 = vmatprep.mubr.msk.f32.mxu0 %vm4950_vm1, %v4949_v22 }
 0x77d   :  { %v701_v49 = vpop.f32.mrf.mxu0 }
 0x77e   :  { %4348 = vmatmul.mubr.msk.f32.vlgmr.msra.gmra.mxu1 %vm243_vm2, %v701_v49 }
 0x77f   :  { %4368 = vmatpush3.xpose.msk.msra.mxu1 %vm243_vm2, %v904_v50  ;;  %v4338_v51 = vpop.f32.mrf.mxu0  ;;  %4350 = vmatprep.mubr.msk.f32.mxu1 %vm4950_vm1, %v4949_v22 }
 0x780   :  { %4369 = vmatprep.subr.mxu1 %v4949_v22 }
 0x782   :  { %v706_v52 = vpop.f32.mrf.mxu0 }
 0x783   :  { %4351 = vmatmul.mubr.msk.f32.gmra.mxu1 %vm243_vm2, %v706_v52 }
 0x784   :  { %4370 = vmatpush3.xpose.msk.msra.mxu1 %vm243_vm2, %v902_v54  ;;  %v4341_v55 = vpop.f32.mrf.mxu0  ;;  %4353 = vmatprep.mubr.msk.f32.mxu1 %vm4950_vm1, %v4949_v22 }
 0x785   :  { %4371 = vmatprep.subr.mxu1 %v4949_v22 }
 0x786   :  { %v711_v58 = vpop.f32.mrf.mxu0 }
 0x787   :  { %4354 = vmatmul.mubr.msk.f32.gmra.mxu1 %vm243_vm2, %v711_v58 }
 0x788   :  { %4372 = vmatpush3.xpose.msk.msra.mxu1 %vm243_vm2, %v900_v59  ;;  %v4344_v60 = vpop.f32.mrf.mxu0  ;;  %4373 = vmatprep.mubr.msk.f32.mxu1 %vm4950_vm1, %v4949_v22 }
 0x789   :  { %4397 = vmatprep.subr.mxu1 %v4949_v22 }
 0x78a   :  { %v5312_v62 = vpop.f32.mrf.mxu0 }
 0x78b   :  { %4374 = vmatmul.mubr.msk.f32.vlgmr.msra.gmra.mxu1 %vm243_vm2, %v894_v61 }
 0x78c   :  { %v4360_v0 = vpop.f32.mrf.mxu0  ;;  %4376 = vmatprep.mubr.msk.f32.mxu1 %vm4950_vm1, %v4949_v22 }
 0x78e   :  { %v5317_v2 = vpop.f32.mrf.mxu0 }
 0x78f   :  { %4377 = vmatmul.mubr.msk.f32.gmra.mxu1 %vm243_vm2, %v896_v1 }
 0x790   :  { %v4363_v3 = vpop.f32.mrf.mxu0  ;;  %4379 = vmatprep.mubr.msk.f32.mxu1 %vm4950_vm1, %v4949_v22 }
 0x792   :  { %v5322_v6 = vpop.f32.mrf.mxu0 }
 0x793   :  { %4380 = vmatmul.mubr.msk.f32.gmra.mxu1 %vm243_vm2, %v898_v5 }
 0x794   :  { %v4366_v7 = vpop.f32.mrf.mxu0  ;;  %4399 = vmatprep.mubr.msk.f32.mxu1 %vm4950_vm1, %v4949_v22 }
 0x83e   :  { %v5327_v8 = vpop.f32.mrf.mxu1 }
 0x840   :  { %v4349_v9 = vpop.f32.mrf.mxu1 }
 0x843   :  { %v5329_v11 = vpop.f32.mrf.mxu1 }
 0x845   :  { %v4352_v12 = vpop.f32.mrf.mxu1 }
 0x847   :  { %v5331_v13 = vpop.f32.mrf.mxu1 }
 0x849   :  { %v4355_v14 = vpop.f32.mrf.mxu1 }
 0x84b   :  { %v983_v15 = vpop.f32.mrf.mxu1 }
 0x84c   :  { %v997_v16 = vmul.f32 0.35355338, %v983_v15  ;;  %v232_v15 = vld [vmem:[%s6105_s7 + $0x10] sm:$0xff] }
 0x84d   :  { %v4375_v17 = vpop.f32.mrf.mxu1  ;;  %4398 = vmatpush3.msra.mxu1 %v232_v15 }
 0x84e   :  { %v1000_v18 = vadd.f32 %v997_v16, %v5160_v63  ;;  %4423 = vmatprep.subr.mxu1 %v4949_v22 }
 0x84f   :  { %v988_v19 = vpop.f32.mrf.mxu1 }
 0x850   :  { %v998_v20 = vmul.f32 0.35355338, %v988_v19  ;;  %v1003_v21 = vsel %vm342_vm3, %v1000_v18, -inf }
 0x851   :  { %1004 = vmax.xlane.f32.xlu1 %v1003_v21  ;;  %v4378_v23 = vpop.f32.mrf.mxu1 }
 0x852   :  { %v1001_v24 = vadd.f32 %v998_v20, %v5166_v4 }
 0x853   :  { %v993_v25 = vpop.f32.mrf.mxu1 }
 0x854   :  { %v999_v26 = vmul.f32 0.35355338, %v993_v25  ;;  %v1006_v27 = vsel %vm342_vm3, %v1001_v24, -inf }
 0x855   :  { %1007 = vmax.xlane.f32.xlu0 %v1006_v27  ;;  %v4381_v28 = vpop.f32.mrf.mxu1 }
 0x856   :  { %v1002_v29 = vadd.f32 %v999_v26, %v5173_v10 }
 0x858   :  { %v1009_v30 = vsel %vm342_vm3, %v1002_v29, -inf }
 0x859   :  { %1010 = vmax.xlane.f32.xlu0 %v1009_v30 }
 0x862   :  { %1040 = vrot.lane.b32.xlu1 %v5133_v57, %s6126_s3 }
 0x866   :  { %1036 = vrot.lane.b32.xlu1 %v5131_v56, %s6126_s3 }
 0x86a   :  { %1236 = vrot.lane.b32.xlu1 %v5133_v57, %s6124_s26 }
 0x86e   :  { %1234 = vrot.lane.b32.xlu1 %v5127_v53, %s6124_s26 }
 0x8da   :  { %v1005_v31 = vpop.xlane.xlu1 %1004 }
 0x8db   :  { %v1012_v32 = vsub.f32 %v1000_v18, %v1005_v31 }
 0x8dd   :  { %v1015_v33 = vmul.f32 1.442695, %v1012_v32 }
 0x8de   :  { %v1008_v34 = vpop.xlane.xlu0 %1007  ;;  %v1041_v35 = vpop.permute.xlu1 %1040 }
 0x8df   :  { %4816 = vpow2.f32 %v1015_v33  ;;  %v1013_v36 = vsub.f32 %v1001_v24, %v1008_v34  ;;  %4383 = vmatpush3.msra.mxu0 %v1041_v35 }
 0x8e0   :  { %4384 = vmatprep.subr.mxu0 %v4949_v22 }
 0x8e1   :  { %v1017_v37 = vmul.f32 1.442695, %v1013_v36 }
 0x8e2   :  { %v1011_v43 = vpop.xlane.xlu0 %1010  ;;  %v1037_v50 = vpop.permute.xlu1 %1036 }
 0x8e3   :  { %4818 = vpow2.f32 %v1017_v37  ;;  %v1014_v44 = vsub.f32 %v1002_v29, %v1011_v43 }
 0x8e5   :  { %v1019_v45 = vmul.f32 1.442695, %v1014_v44 }
 0x8e6   :  { %v1237_v51 = vpop.permute.xlu1 %1236 }
 0x8e7   :  { %4820 = vpow2.f32 %v1019_v45 }
 0x8ea   :  { %v1235_v52 = vpop.permute.xlu1 %1234 }
 0x8ec   :  { %v4817_v38 = vpop.eup %4816 }
 0x8ed   :  { %v1021_v39 = vsel %vm342_vm3, %v4817_v38, 0.0 }
 0x8ee   :  { %1022 = vadd.xlane.f32.xlu0 %v1021_v39 }
 0x8f0   :  { %v4819_v40 = vpop.eup %4818 }
 0x8f1   :  { %v1024_v41 = vsel %vm342_vm3, %v4819_v40, 0.0 }
 0x8f2   :  { %1025 = vadd.xlane.f32.xlu1 %v1024_v41 }
 0x8f4   :  { %v4821_v47 = vpop.eup %4820 }
 0x8f5   :  { %v1027_v49 = vsel %vm342_vm3, %v4821_v47, 0.0 }
 0x903   :  { %1226 = vrot.lane.b32.xlu1 %v5131_v56, %s6122_s27 }
 0x904   :  { %1038 = vrot.lane.b32.xlu0 %v5127_v53, %s6126_s3 }
 0x907   :  { %1230 = vrot.lane.b32.xlu1 %v5133_v57, %s6122_s27 }
 0x923   :  { %1028 = vadd.xlane.f32.xlu0 %v1027_v49 }
 0x939   :  { %1232 = vrot.lane.b32.xlu0 %v5131_v56, %s6124_s26 }
 0x93d   :  { %1228 = vrot.lane.b32.xlu0 %v5127_v53, %s6122_s27  ;;  %s6138_s27 = smov 40  }
 0x977   :  { %v1023_v54 = vpop.xlane.xlu0 %1022 }
 0x978   :  { %4822 = vrcp.f32 %v1023_v54 }
 0x97b   :  { %v1039_v55 = vpop.permute.xlu0 %1038  ;;  %v1026_v58 = vpop.xlane.xlu1 %1025 }
 0x97c   :  { %4824 = vrcp.f32 %v1026_v58  ;;  %4385 = vmatpush3.msra.mxu0 %v1039_v55 }
 0x97d   :  { %4386 = vmatprep.subr.mxu0 %v4949_v22 }
 0x97e   :  { %4387 = vmatpush3.msra.mxu0 %v1037_v50 }
 0x97f   :  { %4408 = vmatprep.subr.mxu0 %v4949_v22  ;;  %v1227_v9 = vpop.permute.xlu1 %1226 }
 0x983   :  { %v1231_v14 = vpop.permute.xlu1 %1230 }
 0x985   :  { %v4823_v59 = vpop.eup %4822 }
 0x986   :  { %v1033_v60 = vmul.f32 %v4823_v59, %v4817_v38  ;;  %v890_v59 = vadd.f32 %v5322_v6, %v5331_v13 }
 0x988   :  { %4389 = vmatmul.mubr.msk.f32.vlgmr.msra.gmra.mxu0 %vm342_vm3, %v1033_v60 }
 0x989   :  { %v4825_v61 = vpop.eup %4824  ;;  %4409 = vmatpush3.xpose.msk.msra.mxu0 %vm243_vm2, %v1237_v51  ;;  %4391 = vmatprep.mubr.msk.f32.mxu0 %vm4950_vm1, %v4949_v22 }
 0x98a   :  { %4410 = vmatprep.subr.mxu0 %v4949_v22  ;;  %v1034_v0 = vmul.f32 %v4825_v61, %v4819_v40  ;;  %v885_v40 = vadd.f32 %v5317_v2, %v5329_v11 }
 0x98c   :  { %4392 = vmatmul.mubr.msk.f32.gmra.mxu0 %vm342_vm3, %v1034_v0 }
 0x98d   :  { %4411 = vmatpush3.xpose.msk.msra.mxu0 %vm243_vm2, %v1235_v52  ;;  %4394 = vmatprep.mubr.msk.f32.mxu0 %vm4950_vm1, %v4949_v22 }
 0x98e   :  { %4412 = vmatprep.subr.mxu0 %v4949_v22 }
 0x9ac   :  { %v1029_v1 = vpop.xlane.xlu0 %1028 }
 0x9ad   :  { %4826 = vrcp.f32 %v1029_v1  ;;  %v233_v1 = vld [vmem:[%s6105_s7 + $0x18] sm:$0xff] }
 0x9b0   :  { %v1233_v3 = vpop.permute.xlu0 %1232 }
 0x9b1   :  { %4413 = vmatpush3.xpose.msk.msra.mxu0 %vm243_vm2, %v1233_v3 }
 0x9b2   :  { %4438 = vmatprep.subr.mxu0 %v4949_v22 }
 0x9b4   :  { %v1229_v12 = vpop.permute.xlu0 %1228 }
 0x9ba   :  { %v4827_v5 = vpop.eup %4826 }
 0x9bb   :  { %v1035_v7 = vmul.f32 %v4827_v5, %v4821_v47 }
 0x9bd   :  { %4395 = vmatmul.mubr.msk.f32.gmra.mxu0 %vm342_vm3, %v1035_v7 }
 0x9be   :  { %4414 = vmatprep.mubr.msk.f32.mxu0 %vm4950_vm1, %v4949_v22 }
 0x9c1   :  { %4415 = vmatmul.mubr.msk.f32.vlgmr.msra.gmra.mxu0 %vm243_vm2, %v1227_v9 }
 0x9c2   :  { %4417 = vmatprep.mubr.msk.f32.mxu0 %vm4950_vm1, %v4949_v22  ;;  %4439 = vmatpush3.msra.mxu0 %v233_v1 }
 0x9c3   :  { %4466 = vmatprep.subr.mxu0 %v4949_v22 }
 0x9c5   :  { %4418 = vmatmul.mubr.msk.f32.gmra.mxu0 %vm243_vm2, %v1229_v12 }
 0x9c6   :  { %4420 = vmatprep.mubr.msk.f32.mxu0 %vm4950_vm1, %v4949_v22 }
 0x9c9   :  { %4421 = vmatmul.mubr.msk.f32.gmra.mxu0 %vm243_vm2, %v1231_v14 }
 0x9ca   :  { %4440 = vmatprep.mubr.msk.f32.mxu0 %vm4950_vm1, %v4949_v22 }
 0xa48   :  { %v1120_v16 = vpop.f32.mrf.mxu0 }
 0xa49   :  { %4400 = vmatmul.mubr.msk.f32.vlgmr.msra.gmra.mxu1 %vm243_vm2, %v1120_v16 }
 0xa4a   :  { %v4390_v17 = vpop.f32.mrf.mxu0  ;;  %4402 = vmatprep.mubr.msk.f32.mxu1 %vm4950_vm1, %v4949_v22 }
 0xa4c   :  { %v1125_v18 = vpop.f32.mrf.mxu0 }
 0xa4d   :  { %4403 = vmatmul.mubr.msk.f32.gmra.mxu1 %vm243_vm2, %v1125_v18 }
 0xa4e   :  { %v4393_v19 = vpop.f32.mrf.mxu0  ;;  %4405 = vmatprep.mubr.msk.f32.mxu1 %vm4950_vm1, %v4949_v22 }
 0xa7d   :  { %v1130_v20 = vpop.f32.mrf.mxu0 }
 0xa7e   :  { %4406 = vmatmul.mubr.msk.f32.gmra.mxu1 %vm243_vm2, %v1130_v20 }
 0xa7f   :  { %v4396_v21 = vpop.f32.mrf.mxu0  ;;  %4429 = vmatprep.mubr.msk.f32.mxu1 %vm4950_vm1, %v4949_v22 }
 0xa81   :  { %v1316_v23 = vpop.f32.mrf.mxu0 }
 0xa82   :  { %v1330_v24 = vmul.f32 0.35355338, %v1316_v23 }
 0xa83   :  { %v4416_v25 = vpop.f32.mrf.mxu0 }
 0xa84   :  { %v1333_v26 = vadd.f32 %v1330_v24, %v5160_v63  ;;  %v880_v63 = vadd.f32 %v5312_v62, %v5327_v8  ;;  %v3954_v25 = vld [vmem:[%s6106_s8] ss:$0 sm:$0xff] }
 0xa85   :  { %v1321_v27 = vpop.f32.mrf.mxu0 }
 0xa86   :  { %v1331_v28 = vmul.f32 0.35355338, %v1321_v27  ;;  %v1336_v29 = vsel %vm342_vm3, %v1333_v26, -inf }
 0xa87   :  { %1337 = vmax.xlane.f32.xlu0 %v1336_v29  ;;  %v4419_v30 = vpop.f32.mrf.mxu0 }
 0xa88   :  { %v1334_v31 = vadd.f32 %v1331_v28, %v5166_v4 }
 0xa89   :  { %v1326_v32 = vpop.f32.mrf.mxu0 }
 0xa8a   :  { %v1332_v33 = vmul.f32 0.35355338, %v1326_v32  ;;  %v1339_v34 = vsel %vm342_vm3, %v1334_v31, -inf }
 0xa8b   :  { %1340 = vmax.xlane.f32.xlu1 %v1339_v34  ;;  %v4422_v35 = vpop.f32.mrf.mxu0 }
 0xa8c   :  { %v1335_v36 = vadd.f32 %v1332_v33, %v5173_v10 }
 0xa8e   :  { %v1342_v37 = vsel %vm342_vm3, %v1335_v36, -inf }
 0xa8f   :  { %1343 = vmax.xlane.f32.xlu0 %v1342_v37 }
 0xa9c   :  { %1371 = vrot.lane.b32.xlu1 %v5127_v53, %s6120_s22 }
 0xb09   :  { %v1209_v38 = vpop.f32.mrf.mxu1 }
 0xb0a   :  { %v5410_v4 = vadd.f32 %v1209_v38, %v880_v63 }
 0xb0b   :  { %v4401_v39 = vpop.f32.mrf.mxu1 }
 0xb0d   :  { %v1214_v41 = vpop.f32.mrf.mxu1 }
 0xb0e   :  { %v5414_v43 = vadd.f32 %v1214_v41, %v885_v40 }
 0xb0f   :  { %v4404_v10 = vpop.f32.mrf.mxu1 }
 0xb10   :  { %v1338_v44 = vpop.xlane.xlu0 %1337 }
 0xb11   :  { %v1345_v45 = vsub.f32 %v1333_v26, %v1338_v44 }
 0xb13   :  { %v1348_v47 = vmul.f32 1.442695, %v1345_v45 }
 0xb14   :  { %v1341_v49 = vpop.xlane.xlu1 %1340 }
 0xb15   :  { %4828 = vpow2.f32 %v1348_v47  ;;  %v1346_v53 = vsub.f32 %v1334_v31, %v1341_v49 }
 0xb17   :  { %v1350_v50 = vmul.f32 1.442695, %v1346_v53 }
 0xb18   :  { %v1344_v51 = vpop.xlane.xlu0 %1343  ;;  %v1372_v5 = vpop.permute.xlu1 %1371 }
 0xb19   :  { %4830 = vpow2.f32 %v1350_v50  ;;  %v1347_v62 = vsub.f32 %v1335_v36, %v1344_v51 }
 0xb1b   :  { %v1352_v8 = vmul.f32 1.442695, %v1347_v62 }
 0xb1d   :  { %4832 = vpow2.f32 %v1352_v8 }
 0xb22   :  { %v4829_v52 = vpop.eup %4828 }
 0xb23   :  { %v1354_v54 = vsel %vm342_vm3, %v4829_v52, 0.0 }
 0xb24   :  { %1355 = vadd.xlane.f32.xlu0 %v1354_v54  ;;  %v1633_v54 = vld [vmem:[%s6109_s11 + $0x10] sm:$0xff] }
 0xb26   :  { %v4831_v2 = vpop.eup %4830 }
 0xb27   :  { %v1357_v11 = vsel %vm342_vm3, %v4831_v2, 0.0 }
 0xb28   :  { %1358 = vadd.xlane.f32.xlu0 %v1357_v11  ;;  %v1631_v11 = vld [vmem:[%s6109_s11] sm:$0xff] }
 0xb2a   :  { %v4833_v55 = vpop.eup %4832 }
 0xb2b   :  { %v1360_v58 = vsel %vm342_vm3, %v4833_v55, 0.0 }
 0xb2c   :  { %1361 = vadd.xlane.f32.xlu1 %v1360_v58 }
 0xb3d   :  { %1369 = vrot.lane.b32.xlu1 %v5131_v56, %s6120_s22 }
 0xb3e   :  { %v1219_v60 = vpop.f32.mrf.mxu1  ;;  %1373 = vrot.lane.b32.xlu0 %v5133_v57, %s6120_s22 }
 0xb3f   :  { %v1225_v61 = vadd.f32 %v1219_v60, %v890_v59 }
 0xb40   :  { %v4407_v0 = vpop.f32.mrf.mxu1 }
 0xbad   :  { %v1356_v3 = vpop.xlane.xlu0 %1355 }
 0xbae   :  { %4834 = vrcp.f32 %v1356_v3 }
 0xbb1   :  { %v1359_v6 = vpop.xlane.xlu0 %1358 }
 0xbb2   :  { %4836 = vrcp.f32 %v1359_v6 }
 0xbb5   :  { %v1374_v13 = vpop.permute.xlu0 %1373  ;;  %v1362_v56 = vpop.xlane.xlu1 %1361 }
 0xbb6   :  { %4838 = vrcp.f32 %v1362_v56  ;;  %4424 = vmatpush3.msra.mxu1 %v1374_v13  ;;  %v3955_v13 = vld [vmem:[%s6107_s9] ss:$0 sm:$0xff] }
 0xbb7   :  { %4425 = vmatprep.subr.mxu1 %v4949_v22 }
 0xbb8   :  { %4426 = vmatpush3.msra.mxu1 %v1372_v5 }
 0xbb9   :  { %4427 = vmatprep.subr.mxu1 %v4949_v22  ;;  %v1370_v57 = vpop.permute.xlu1 %1369 }
 0xbba   :  { %4428 = vmatpush3.msra.mxu1 %v1370_v57  ;;  %v3956_v57 = vld [vmem:[%s6108_s10] ss:$0 sm:$0xff] }
 0xbbb   :  { %v4835_v7 = vpop.eup %4834  ;;  %4449 = vmatprep.subr.mxu1 %v4949_v22 }
 0xbbc   :  { %v1366_v9 = vmul.f32 %v4835_v7, %v4829_v52  ;;  %v1634_v52 = vld [vmem:[%s6109_s11 + $0x18] sm:$0xff] }
 0xbbe   :  { %4430 = vmatmul.mubr.msk.f32.vlgmr.msra.gmra.mxu1 %vm342_vm3, %v1366_v9 }
 0xbbf   :  { %v4837_v12 = vpop.eup %4836  ;;  %4432 = vmatprep.mubr.msk.f32.mxu1 %vm4950_vm1, %v4949_v22  ;;  %4450 = vmatpush3.msra.mxu1 %v1634_v52 }
 0xbc0   :  { %v1367_v14 = vmul.f32 %v4837_v12, %v4831_v2  ;;  %4451 = vmatprep.subr.mxu1 %v4949_v22  ;;  %v1632_v2 = vld [vmem:[%s6109_s11 + $0x8] sm:$0xff] }
 0xbc1   :  { %4452 = vmatpush3.msra.mxu1 %v1633_v54 }
 0xbc2   :  { %4433 = vmatmul.mubr.msk.f32.gmra.mxu1 %vm342_vm3, %v1367_v14  ;;  %4453 = vmatprep.subr.mxu1 %v4949_v22 }
 0xbc3   :  { %v4839_v15 = vpop.eup %4838  ;;  %4435 = vmatprep.mubr.msk.f32.mxu1 %vm4950_vm1, %v4949_v22  ;;  %4454 = vmatpush3.msra.mxu1 %v1632_v2 }
 0xbc4   :  { %v1368_v16 = vmul.f32 %v4839_v15, %v4833_v55  ;;  %4455 = vmatprep.subr.mxu1 %v4949_v22 }
 0xbc5   :  { %4456 = vmatpush3.msra.mxu1 %v1631_v11 }
 0xbc6   :  { %4436 = vmatmul.mubr.msk.f32.gmra.mxu1 %vm342_vm3, %v1368_v16  ;;  %4507 = vmatprep.subr.mxu1 %v4949_v22 }
 0xbc7   :  { %4457 = vmatprep.mubr.msk.f32.mxu1 %vm4950_vm1, %v4949_v22 }
 0xc7e   :  { %v1453_v17 = vpop.f32.mrf.mxu1 }
 0xc7f   :  { %4441 = vmatmul.mubr.msk.f32.vlgmr.msra.gmra.mxu0 %vm243_vm2, %v1453_v17 }
 0xc80   :  { %v4431_v18 = vpop.f32.mrf.mxu1  ;;  %4443 = vmatprep.mubr.msk.f32.mxu0 %vm4950_vm1, %v4949_v22 }
 0xc82   :  { %v1458_v19 = vpop.f32.mrf.mxu1 }
 0xc83   :  { %4444 = vmatmul.mubr.msk.f32.gmra.mxu0 %vm243_vm2, %v1458_v19 }
 0xc84   :  { %v4434_v20 = vpop.f32.mrf.mxu1  ;;  %4446 = vmatprep.mubr.msk.f32.mxu0 %vm4950_vm1, %v4949_v22 }
 0xc86   :  { %v1463_v21 = vpop.f32.mrf.mxu1 }
 0xc87   :  { %4447 = vmatmul.mubr.msk.f32.gmra.mxu0 %vm243_vm2, %v1463_v21  ;;  %v1773_v21 = vld [vmem:[%s6111_s13 + $0x78] sm:$0xff] }
 0xc88   :  { %v4437_v23 = vpop.f32.mrf.mxu1  ;;  %4498 = vmatprep.mubr.msk.f32.mxu0 %vm4950_vm1, %v4949_v22  ;;  %4467 = vmatpush3.msra.mxu0 %v1773_v21 }
 0xc89   :  { %4468 = vmatprep.subr.mxu0 %v4949_v22  ;;  %v1772_v23 = vld [vmem:[%s6111_s13 + $0x70] sm:$0xff] }
 0xc8a   :  { %4469 = vmatpush3.msra.mxu0 %v1772_v23 }
 0xc8b   :  { %4470 = vmatprep.subr.mxu0 %v4949_v22 }
 0xd3f   :  { %v1542_v24 = vpop.f32.mrf.mxu0 }
 0xd40   :  { %v1556_v26 = vadd.f32 %v1542_v24, %v5410_v4  ;;  %v1771_v24 = vld [vmem:[%s6111_s13 + $0x68] sm:$0xff] }
 0xd41   :  { %v4442_v27 = vpop.f32.mrf.mxu0  ;;  %4471 = vmatpush3.msra.mxu0 %v1771_v24 }
 0xd42   :  { %v1566_v28 = vadd.f32 %v3954_v25, %v1556_v26  ;;  %4472 = vmatprep.subr.mxu0 %v4949_v22  ;;  %v1769_v26 = vld [vmem:[%s6111_s13 + $0x58] sm:$0xff]  ;;  %v1768_v27 = vld [vmem:[%s6111_s13 + $0x50] sm:$0xff] }
 0xd43   :  { %v1547_v29 = vpop.f32.mrf.mxu0 }
 0xd44   :  { %v1557_v30 = vadd.f32 %v1547_v29, %v5414_v43  ;;  %v1569_v31 = vadd.f32 %v1566_v28, %v5106_v42  ;;  %v1767_v28 = vld [vmem:[%s6111_s13 + $0x48] sm:$0xff]  ;;  %v1766_v29 = vld [vmem:[%s6111_s13 + $0x40] sm:$0xff] }
 0xd45   :  { %v4445_v32 = vpop.f32.mrf.mxu0 }
 0xd46   :  { %v1567_v33 = vadd.f32 %v3954_v25, %v1557_v30  ;;  %v1574_v34 = vsel %vm71_vm0, %v1569_v31, 0.0  ;;  %v1765_v30 = vld [vmem:[%s6111_s13 + $0x38] sm:$0xff]  ;;  %v1763_v32 = vld [vmem:[%s6111_s13 + $0x28] sm:$0xff] }
 0xd47   :  { %1575 = vadd.xlane.f32.xlu1 %v1574_v34  ;;  %v1552_v35 = vpop.f32.mrf.mxu0  ;;  %v1761_v34 = vld [vmem:[%s6111_s13 + $0x18] sm:$0xff] }
 0xd48   :  { %v1558_v36 = vadd.f32 %v1552_v35, %v1225_v61  ;;  %v1570_v37 = vadd.f32 %v1567_v33, %v5112_v46  ;;  %v1762_v33 = vld [vmem:[%s6111_s13 + $0x20] sm:$0xff]  ;;  %v1760_v35 = vld [vmem:[%s6111_s13 + $0x10] sm:$0xff] }
 0xd49   :  { %v4448_v63 = vpop.f32.mrf.mxu0 }
 0xd4a   :  { %v1568_v38 = vadd.f32 %v3954_v25, %v1558_v36  ;;  %v1577_v4 = vsel %vm71_vm0, %v1570_v37, 0.0  ;;  %v1770_v25 = vld [vmem:[%s6111_s13 + $0x60] sm:$0xff]  ;;  %v1759_v36 = vld [vmem:[%s6111_s13 + $0x8] sm:$0xff] }
 0xd4b   :  { %1578 = vadd.xlane.f32.xlu0 %v1577_v4  ;;  %4473 = vmatpush3.msra.mxu0 %v1770_v25  ;;  %v3957_v63 = vld [vmem:[%s6110_s12] ss:$0 sm:$0xff] }
 0xd4c   :  { %v1571_v39 = vadd.f32 %v1568_v38, %v5118_v48  ;;  %4474 = vmatprep.subr.mxu0 %v4949_v22 }
 0xd4d   :  { %4475 = vmatpush3.msra.mxu0 %v1769_v26 }
 0xd4e   :  { %v1580_v40 = vsel %vm71_vm0, %v1571_v39, 0.0  ;;  %4476 = vmatprep.subr.mxu0 %v4949_v22 }
 0xd4f   :  { %1581 = vadd.xlane.f32.xlu0 %v1580_v40  ;;  %4477 = vmatpush3.msra.mxu0 %v1768_v27 }
 0xd50   :  { %4478 = vmatprep.subr.mxu0 %v4949_v22 }
 0xd51   :  { %4479 = vmatpush3.msra.mxu0 %v1767_v28 }
 0xd52   :  { %4480 = vmatprep.subr.mxu0 %v4949_v22 }
 0xd53   :  { %4481 = vmatpush3.msra.mxu0 %v1766_v29 }
 0xd54   :  { %4482 = vmatprep.subr.mxu0 %v4949_v22 }
 0xd55   :  { %4483 = vmatpush3.msra.mxu0 %v1765_v30 }
 0xd56   :  { %4484 = vmatprep.subr.mxu0 %v4949_v22 }
 0xdd0   :  { %v1576_v42 = vpop.xlane.xlu1 %1575 }
 0xdd1   :  { %v1583_v41 = vmul.f32 0.03125, %v1576_v42 }
 0xdd3   :  { %v1586_v43 = vsub.f32 %v1569_v31, %v1583_v41  ;;  %v1764_v31 = vld [vmem:[%s6111_s13 + $0x30] sm:$0xff] }
 0xdd4   :  { %v1579_v10 = vpop.xlane.xlu0 %1578  ;;  %4485 = vmatpush3.msra.mxu0 %v1764_v31 }
 0xdd5   :  { %v1584_v44 = vmul.f32 0.03125, %v1579_v10  ;;  %v1589_v45 = vmul.f32 %v1586_v43, %v1586_v43  ;;  %4486 = vmatprep.subr.mxu0 %v4949_v22 }
 0xdd6   :  { %4487 = vmatpush3.msra.mxu0 %v1763_v32 }
 0xdd7   :  { %v1587_v47 = vsub.f32 %v1570_v37, %v1584_v44  ;;  %v1592_v49 = vsel %vm71_vm0, %v1589_v45, 0.0  ;;  %4488 = vmatprep.subr.mxu0 %v4949_v22  ;;  %v1758_v37 = vld [vmem:[%s6111_s13] sm:$0xff] }
 0xdd8   :  { %1593 = vadd.xlane.f32.xlu0 %v1592_v49  ;;  %v1582_v46 = vpop.xlane.xlu0 %1581  ;;  %4489 = vmatpush3.msra.mxu0 %v1762_v33 }
 0xdd9   :  { %v1585_v53 = vmul.f32 0.03125, %v1582_v46  ;;  %v1590_v50 = vmul.f32 %v1587_v47, %v1587_v47  ;;  %4490 = vmatprep.subr.mxu0 %v4949_v22 }
 0xdda   :  { %4491 = vmatpush3.msra.mxu0 %v1761_v34 }
 0xddb   :  { %v1588_v51 = vsub.f32 %v1571_v39, %v1585_v53  ;;  %v1595_v62 = vsel %vm71_vm0, %v1590_v50, 0.0  ;;  %4492 = vmatprep.subr.mxu0 %v4949_v22 }
 0xddc   :  { %1596 = vadd.xlane.f32.xlu1 %v1595_v62  ;;  %4493 = vmatpush3.msra.mxu0 %v1760_v35 }
 0xddd   :  { %v1591_v48 = vmul.f32 %v1588_v51, %v1588_v51  ;;  %4494 = vmatprep.subr.mxu0 %v4949_v22 }
 0xdde   :  { %4495 = vmatpush3.msra.mxu0 %v1759_v36 }
 0xddf   :  { %v1598_v8 = vsel %vm71_vm0, %v1591_v48, 0.0  ;;  %4496 = vmatprep.subr.mxu0 %v4949_v22 }
 0xde0   :  { %1599 = vadd.xlane.f32.xlu0 %v1598_v8  ;;  %4497 = vmatpush3.msra.mxu0 %v1758_v37 }
 0xde1   :  { %4554 = vmatprep.subr.mxu0 %v4949_v22 }
 0xe61   :  { %v1594_v55 = vpop.xlane.xlu0 %1593 }
 0xe62   :  { %v1601_v58 = vmul.f32 0.03125, %v1594_v55 }
 0xe64   :  { %v1604_v59 = vadd.f32 1e-12, %v1601_v58 }
 0xe65   :  { %v1597_v60 = vpop.xlane.xlu1 %1596 }
 0xe66   :  { %4840 = vrsqrt.f32 %v1604_v59  ;;  %v1602_v61 = vmul.f32 0.03125, %v1597_v60 }
 0xe68   :  { %v1605_v0 = vadd.f32 1e-12, %v1602_v61 }
 0xe69   :  { %v1600_v1 = vpop.xlane.xlu0 %1599 }
 0xe6a   :  { %4842 = vrsqrt.f32 %v1605_v0  ;;  %v1603_v3 = vmul.f32 0.03125, %v1600_v1 }
 0xe6c   :  { %v1606_v5 = vadd.f32 1e-12, %v1603_v3 }
 0xe6e   :  { %4844 = vrsqrt.f32 %v1606_v5 }
 0xe73   :  { %v4841_v6 = vpop.eup %4840 }
 0xe74   :  { %v1610_v56 = vmul.f32 %v4841_v6, %v1586_v43 }
 0xe76   :  { %v1619_v7 = vmul.f32 %v3955_v13, %v1610_v56 }
 0xe77   :  { %v4843_v9 = vpop.eup %4842 }
 0xe78   :  { %v5486_v12 = vadd.f32 %v3956_v57, %v1619_v7  ;;  %v1611_v14 = vmul.f32 %v4843_v9, %v1587_v47  ;;  %v3961_v7 = vld [vmem:[%s6112_s14] ss:$0 sm:$0xff] }
 0xe7a   :  { %4458 = vmatmul.mubr.msk.f32.vlgmr.msra.gmra.mxu1 %vm71_vm0, %v5486_v12  ;;  %v1620_v15 = vmul.f32 %v3955_v13, %v1611_v14 }
 0xe7b   :  { %v4845_v16 = vpop.eup %4844  ;;  %4460 = vmatprep.mubr.msk.f32.mxu1 %vm4950_vm1, %v4949_v22 }
 0xe7c   :  { %v5492_v17 = vadd.f32 %v3956_v57, %v1620_v15  ;;  %v1612_v18 = vmul.f32 %v4845_v16, %v1588_v51 }
 0xe7e   :  { %4461 = vmatmul.mubr.msk.f32.gmra.mxu1 %vm71_vm0, %v5492_v17  ;;  %v1621_v19 = vmul.f32 %v3955_v13, %v1612_v18 }
 0xe7f   :  { %4463 = vmatprep.mubr.msk.f32.mxu1 %vm4950_vm1, %v4949_v22 }
 0xe80   :  { %v5498_v20 = vadd.f32 %v3956_v57, %v1621_v19 }
 0xe82   :  { %4464 = vmatmul.mubr.msk.f32.gmra.mxu1 %vm71_vm0, %v5498_v20 }
 0xe83   :  { %4515 = vmatprep.mubr.msk.f32.mxu1 %vm4950_vm1, %v4949_v22 }
 0xf3a   :  { %v1717_v38 = vpop.f32.mrf.mxu1 }
 0xf3b   :  { %v1718_v4 = vadd.f32 %v3957_v63, %v1717_v38 }
 0xf3c   :  { %v4459_v39 = vpop.f32.mrf.mxu1 }
 0xf3d   :  { %v1731_v40 = vmul.f32 %v1718_v4, %v1718_v4 }
 0xf3e   :  { %v1722_v42 = vpop.f32.mrf.mxu1 }
 0xf3f   :  { %v1734_v41 = vmul.f32 %v1731_v40, %v1718_v4  ;;  %v1723_v43 = vadd.f32 %v3957_v63, %v1722_v42  ;;  %v3967_v42 = vld [vmem:[%s6103_s5 + $0x38] sm:$0xff] }
 0xf40   :  { %v4462_v10 = vpop.f32.mrf.mxu1  ;;  %4508 = vmatpush3.msra.mxu1 %v3967_v42 }
 0xf41   :  { %v1737_v44 = vmul.f32 0.044715, %v1734_v41  ;;  %v1732_v45 = vmul.f32 %v1723_v43, %v1723_v43  ;;  %4509 = vmatprep.subr.mxu1 %v4949_v22  ;;  %v3966_v41 = vld [vmem:[%s6103_s5 + $0x30] sm:$0xff]  ;;  %v3964_v10 = vld [vmem:[%s6103_s5 + $0x20] sm:$0xff] }
 0xf42   :  { %v1727_v47 = vpop.f32.mrf.mxu1  ;;  %4510 = vmatpush3.msra.mxu1 %v3966_v41  ;;  %v5706_v41 = vld [vmem:[%s6134_s25 + $0x10] sm:$0xff] }
 0xf43   :  { %v1740_v49 = vadd.f32 %v1737_v44, %v1718_v4  ;;  %v1735_v46 = vmul.f32 %v1732_v45, %v1723_v43  ;;  %v1728_v53 = vadd.f32 %v3957_v63, %v1727_v47  ;;  %4511 = vmatprep.subr.mxu1 %v4949_v22 }
 0xf44   :  { %v4465_v50 = vpop.f32.mrf.mxu1 }
 0xf45   :  { %v1743_v51 = vmul.f32 0.7978846, %v1740_v49  ;;  %v1738_v62 = vmul.f32 0.044715, %v1735_v46  ;;  %v1733_v48 = vmul.f32 %v1728_v53, %v1728_v53 }
 0xf47   :  { %4846 = vtanh.f32 %v1743_v51  ;;  %v1741_v8 = vadd.f32 %v1738_v62, %v1723_v43  ;;  %v1736_v52 = vmul.f32 %v1733_v48, %v1728_v53 }
 0xf49   :  { %v1744_v54 = vmul.f32 0.7978846, %v1741_v8  ;;  %v1739_v2 = vmul.f32 0.044715, %v1736_v52  ;;  %v3962_v8 = vld [vmem:[%s6113_s15] ss:$0 sm:$0xff] }
 0xf4b   :  { %4848 = vtanh.f32 %v1744_v54  ;;  %v1742_v11 = vadd.f32 %v1739_v2, %v1728_v53  ;;  %v3963_v54 = vld [vmem:[%s6114_s16] ss:$0 sm:$0xff] }
 0xf4d   :  { %v1745_v55 = vmul.f32 0.7978846, %v1742_v11 }
 0xf4f   :  { %4850 = vtanh.f32 %v1745_v55 }
 0xf54   :  { %v4847_v58 = vpop.eup %4846 }
 0xf55   :  { %v1749_v59 = vadd.f32 1.0, %v4847_v58 }
 0xf57   :  { %v1752_v60 = vmul.f32 0.5, %v1749_v59 }
 0xf58   :  { %v4849_v61 = vpop.eup %4848 }
 0xf59   :  { %v1755_v0 = vmul.f32 %v1752_v60, %v1718_v4  ;;  %v1750_v1 = vadd.f32 1.0, %v4849_v61 }
 0xf5b   :  { %4499 = vmatmul.mubr.f32.vlgmr.msra.gmra.mxu0 %v1755_v0  ;;  %v1753_v3 = vmul.f32 0.5, %v1750_v1 }
 0xf5c   :  { %v4851_v5 = vpop.eup %4850  ;;  %4501 = vmatprep.mubr.msk.f32.mxu0 %vm4950_vm1, %v4949_v22 }
 0xf5d   :  { %v1756_v6 = vmul.f32 %v1753_v3, %v1723_v43  ;;  %v1751_v13 = vadd.f32 1.0, %v4851_v5  ;;  %v3965_v43 = vld [vmem:[%s6103_s5 + $0x28] sm:$0xff]  ;;  %s6137_s5 = smov 104  }
 0xf5e   :  { %4512 = vmatpush3.msra.mxu1 %v3965_v43 }
 0xf5f   :  { %4502 = vmatmul.mubr.f32.gmra.mxu0 %v1756_v6  ;;  %v1754_v56 = vmul.f32 0.5, %v1751_v13  ;;  %4513 = vmatprep.subr.mxu1 %v4949_v22  ;;  %v3969_v13 = vld [vmem:[%s6104_s6 + $0x1] ss:$0 sm:$0xff] }
 0xf60   :  { %4504 = vmatprep.mubr.msk.f32.mxu0 %vm4950_vm1, %v4949_v22  ;;  %4514 = vmatpush3.msra.mxu1 %v3964_v10 }
 0xf61   :  { %v1757_v57 = vmul.f32 %v1754_v56, %v1728_v53  ;;  %4524 = vmatprep.subr.mxu1 %v4949_v22 }
 0xf63   :  { %4505 = vmatmul.mubr.f32.gmra.mxu0 %v1757_v57 }
 0xf64   :  { %4560 = vmatprep.mubr.msk.f32.mxu0 %vm4950_vm1, %v4949_v22 }
0x101b   :  { %v1847_v9 = vpop.f32.mrf.mxu0 }
0x101c   :  { %v1848_v14 = vadd.f32 %v3961_v7, %v1847_v9 }
0x101d   :  { %v4500_v15 = vpop.f32.mrf.mxu0 }
0x101e   :  { %v1861_v16 = vadd.f32 %v1848_v14, %v5486_v12 }
0x101f   :  { %v1852_v18 = vpop.f32.mrf.mxu0 }
0x1020   :  { %v1853_v19 = vadd.f32 %v3961_v7, %v1852_v18  ;;  %v1866_v21 = vsel %vm71_vm0, %v1861_v16, 0.0 }
0x1021   :  { %1867 = vadd.xlane.f32.xlu1 %v1866_v21  ;;  %v4503_v23 = vpop.f32.mrf.mxu0 }
0x1022   :  { %v1862_v24 = vadd.f32 %v1853_v19, %v5492_v17 }
0x1023   :  { %v1857_v25 = vpop.f32.mrf.mxu0 }
0x1024   :  { %v1858_v26 = vadd.f32 %v3961_v7, %v1857_v25  ;;  %v1869_v27 = vsel %vm71_vm0, %v1862_v24, 0.0 }
0x1025   :  { %1870 = vadd.xlane.f32.xlu0 %v1869_v27  ;;  %v4506_v28 = vpop.f32.mrf.mxu0 }
0x1026   :  { %v1863_v29 = vadd.f32 %v1858_v26, %v5498_v20 }
0x1028   :  { %v1872_v30 = vsel %vm71_vm0, %v1863_v29, 0.0 }
0x1029   :  { %1873 = vadd.xlane.f32.xlu1 %v1872_v30 }
0x10aa   :  { %v1868_v12 = vpop.xlane.xlu1 %1867 }
0x10ab   :  { %v1875_v31 = vmul.f32 0.03125, %v1868_v12 }
0x10ad   :  { %v1878_v32 = vsub.f32 %v1861_v16, %v1875_v31  ;;  %v5692_v31 = vld [vmem:[%s6134_s25] sm:$0xff] }
0x10ae   :  { %v1871_v33 = vpop.xlane.xlu0 %1870 }
0x10af   :  { %v1876_v34 = vmul.f32 0.03125, %v1871_v33  ;;  %v1881_v35 = vmul.f32 %v1878_v32, %v1878_v32 }
0x10b1   :  { %v1879_v36 = vsub.f32 %v1862_v24, %v1876_v34  ;;  %v1884_v17 = vsel %vm71_vm0, %v1881_v35, 0.0 }
0x10b2   :  { %1885 = vadd.xlane.f32.xlu0 %v1884_v17  ;;  %v1874_v37 = vpop.xlane.xlu1 %1873  ;;  %v5699_v17 = vld [vmem:[%s6134_s25 + $0x8] sm:$0xff] }
0x10b3   :  { %v1877_v63 = vmul.f32 0.03125, %v1874_v37  ;;  %v1882_v38 = vmul.f32 %v1879_v36, %v1879_v36 }
0x10b5   :  { %v1880_v4 = vsub.f32 %v1863_v29, %v1877_v63  ;;  %v1887_v39 = vsel %vm71_vm0, %v1882_v38, 0.0 }
0x10b6   :  { %1888 = vadd.xlane.f32.xlu1 %v1887_v39 }
0x10b7   :  { %v1883_v20 = vmul.f32 %v1880_v4, %v1880_v4 }
0x10b9   :  { %v1890_v40 = vsel %vm71_vm0, %v1883_v20, 0.0 }
0x10ba   :  { %1891 = vadd.xlane.f32.xlu0 %v1890_v40 }
0x113b   :  { %v1886_v44 = vpop.xlane.xlu0 %1885 }
0x113c   :  { %v1893_v45 = vmul.f32 0.03125, %v1886_v44 }
0x113e   :  { %v1896_v47 = vadd.f32 1e-12, %v1893_v45 }
0x113f   :  { %v1889_v49 = vpop.xlane.xlu1 %1888 }
0x1140   :  { %4852 = vrsqrt.f32 %v1896_v47  ;;  %v1894_v46 = vmul.f32 0.03125, %v1889_v49 }
0x1142   :  { %v1897_v53 = vadd.f32 1e-12, %v1894_v46 }
0x1143   :  { %v1892_v50 = vpop.xlane.xlu0 %1891 }
0x1144   :  { %4854 = vrsqrt.f32 %v1897_v53  ;;  %v1895_v51 = vmul.f32 0.03125, %v1892_v50 }
0x1146   :  { %v1898_v62 = vadd.f32 1e-12, %v1895_v51 }
0x1148   :  { %4856 = vrsqrt.f32 %v1898_v62 }
0x114d   :  { %v4853_v48 = vpop.eup %4852 }
0x114e   :  { %v1902_v52 = vmul.f32 %v4853_v48, %v1878_v32 }
0x1150   :  { %v1911_v2 = vmul.f32 %v3962_v8, %v1902_v52 }
0x1151   :  { %v4855_v11 = vpop.eup %4854 }
0x1152   :  { %v5611_v55 = vadd.f32 %v3963_v54, %v1911_v2  ;;  %v1903_v58 = vmul.f32 %v4855_v11, %v1879_v36 }
0x1154   :  { %4516 = vmatmul.mubr.msk.f32.vlgmr.msra.gmra.mxu1 %vm71_vm0, %v5611_v55  ;;  %v1912_v59 = vmul.f32 %v3962_v8, %v1903_v58 }
0x1155   :  { %v4857_v60 = vpop.eup %4856  ;;  %4518 = vmatprep.mubr.msk.f32.mxu1 %vm4950_vm1, %v4949_v22 }
0x1156   :  { %v5617_v61 = vadd.f32 %v3963_v54, %v1912_v59  ;;  %v1904_v0 = vmul.f32 %v4857_v60, %v1880_v4 }
0x1158   :  { %4519 = vmatmul.mubr.msk.f32.gmra.mxu1 %vm71_vm0, %v5617_v61  ;;  %v1913_v1 = vmul.f32 %v3962_v8, %v1904_v0 }
0x1159   :  { %4521 = vmatprep.mubr.msk.f32.mxu1 %vm4950_vm1, %v4949_v22 }
0x115a   :  { %v5623_v3 = vadd.f32 %v3963_v54, %v1913_v1 }
0x115c   :  { %4522 = vmatmul.mubr.msk.f32.gmra.mxu1 %vm71_vm0, %v5623_v3 }
0x115d   :  { %4530 = vmatprep.mubr.msk.f32.mxu1 %vm4950_vm1, %v4949_v22 }
0x1214   :  { %v2011_v5 = vpop.f32.mrf.mxu1 }
0x1215   :  { %v5636_v14 = vadd.f32 %v3969_v13, %v2011_v5 }
0x1216   :  { %v4517_v6 = vpop.f32.mrf.mxu1 }
0x1218   :  { %v2016_v56 = vpop.f32.mrf.mxu1 }
0x1219   :  { %v5632_v57 = vadd.f32 %v3969_v13, %v2016_v56 }
0x121a   :  { %v4520_v7 = vpop.f32.mrf.mxu1 }
0x121b   :  { %2035 = vrot.lane.b32.xlu0 %v5632_v57, %s4951_s2 }
0x121c   :  { %v2021_v9 = vpop.f32.mrf.mxu1 }
0x121d   :  { %v5638_v15 = vadd.f32 %v3969_v13, %v2021_v9 }
0x121e   :  { %v4523_v16 = vpop.f32.mrf.mxu1 }
0x121f   :  { %2274 = vrot.lane.b32.xlu0 %v5636_v14, %s4953_s0  ;;  %2037 = vrot.lane.b32.xlu1 %v5638_v15, %s4951_s2 }
0x1223   :  { %2270 = vrot.lane.b32.xlu0 %v5632_v57, %s4954_s30  ;;  %2033 = vrot.lane.b32.xlu1 %v5636_v14, %s4951_s2 }
0x1227   :  { %2278 = vrot.lane.b32.xlu1 %v5638_v15, %s4953_s0 }
0x122b   :  { %2276 = vrot.lane.b32.xlu1 %v5632_v57, %s4953_s0 }
0x122f   :  { %2268 = vrot.lane.b32.xlu1 %v5636_v14, %s4954_s30 }
0x1233   :  { %2272 = vrot.lane.b32.xlu1 %v5638_v15, %s4954_s30 }
0x128d   :  { %v2036_v19 = vpop.permute.xlu0 %2035 }
0x1291   :  { %v2038_v18 = vpop.permute.xlu1 %2037  ;;  %v2275_v25 = vpop.permute.xlu0 %2274 }
0x1292   :  { %4525 = vmatpush3.xpose.msk.msra.mxu1 %vm243_vm2, %v2038_v18 }
0x1293   :  { %4526 = vmatprep.subr.mxu1 %v4949_v22 }
0x1295   :  { %v2034_v21 = vpop.permute.xlu1 %2033  ;;  %v2271_v27 = vpop.permute.xlu0 %2270 }
0x1296   :  { %4527 = vmatpush3.xpose.msk.msra.mxu1 %vm243_vm2, %v2036_v19 }
0x1297   :  { %4528 = vmatprep.subr.mxu1 %v4949_v22 }
0x1299   :  { %v2279_v23 = vpop.permute.xlu1 %2278 }
0x129a   :  { %4529 = vmatpush3.xpose.msk.msra.mxu1 %vm243_vm2, %v2034_v21  ;;  %4555 = vmatpush3.xpose.msk.msra.mxu0 %vm243_vm2, %v2279_v23 }
0x129b   :  { %4556 = vmatprep.subr.mxu0 %v4949_v22  ;;  %4539 = vmatprep.subr.mxu1 %v4949_v22 }
0x129d   :  { %4531 = vmatmul.mubr.msk.f32.vlgmr.msra.gmra.mxu1 %vm243_vm2, %v5636_v14  ;;  %v2277_v24 = vpop.permute.xlu1 %2276 }
0x129e   :  { %4557 = vmatpush3.xpose.msk.msra.mxu0 %vm243_vm2, %v2277_v24  ;;  %4533 = vmatprep.mubr.msk.f32.mxu1 %vm4950_vm1, %v4949_v22 }
0x129f   :  { %4558 = vmatprep.subr.mxu0 %v4949_v22 }
0x12a1   :  { %4534 = vmatmul.mubr.msk.f32.gmra.mxu1 %vm243_vm2, %v5632_v57  ;;  %v2269_v26 = vpop.permute.xlu1 %2268 }
0x12a2   :  { %4559 = vmatpush3.xpose.msk.msra.mxu0 %vm243_vm2, %v2275_v25  ;;  %4536 = vmatprep.mubr.msk.f32.mxu1 %vm4950_vm1, %v4949_v22 }
0x12a3   :  { %4584 = vmatprep.subr.mxu0 %v4949_v22 }
0x12a5   :  { %4537 = vmatmul.mubr.msk.f32.gmra.mxu1 %vm243_vm2, %v5638_v15  ;;  %4561 = vmatmul.mubr.msk.f32.vlgmr.msra.gmra.mxu0 %vm243_vm2, %v2269_v26  ;;  %v2273_v28 = vpop.permute.xlu1 %2272 }
0x12a6   :  { %4563 = vmatprep.mubr.msk.f32.mxu0 %vm4950_vm1, %v4949_v22  ;;  %4545 = vmatprep.mubr.msk.f32.mxu1 %vm4950_vm1, %v4949_v22 }
0x12a9   :  { %4564 = vmatmul.mubr.msk.f32.gmra.mxu0 %vm243_vm2, %v2271_v27 }
0x12aa   :  { %4566 = vmatprep.mubr.msk.f32.mxu0 %vm4950_vm1, %v4949_v22 }
0x12ad   :  { %4567 = vmatmul.mubr.msk.f32.gmra.mxu0 %vm243_vm2, %v2273_v28 }
0x12ae   :  { %4586 = vmatprep.mubr.msk.f32.mxu0 %vm4950_vm1, %v4949_v22 }
0x135d   :  { %v2117_v29 = vpop.f32.mrf.mxu1 }
0x135e   :  { %v2131_v30 = vmul.f32 0.35355338, %v2117_v29 }
0x135f   :  { %v4532_v12 = vpop.f32.mrf.mxu1 }
0x1360   :  { %v2134_v32 = vadd.f32 %v5692_v31, %v2131_v30 }
0x1361   :  { %v2122_v33 = vpop.f32.mrf.mxu1 }
0x1362   :  { %v2132_v34 = vmul.f32 0.35355338, %v2122_v33  ;;  %v2137_v35 = vsel %vm342_vm3, %v2134_v32, -inf }
0x1363   :  { %2138 = vmax.xlane.f32.xlu0 %v2137_v35  ;;  %v4535_v36 = vpop.f32.mrf.mxu1 }
0x1364   :  { %v2135_v37 = vadd.f32 %v5699_v17, %v2132_v34 }
0x1365   :  { %v2127_v63 = vpop.f32.mrf.mxu1  ;;  %v2358_v38 = vpop.f32.mrf.mxu0 }
0x1366   :  { %v2133_v4 = vmul.f32 0.35355338, %v2127_v63  ;;  %v2372_v39 = vmul.f32 0.35355338, %v2358_v38  ;;  %v2140_v20 = vsel %vm342_vm3, %v2135_v37, -inf }
0x1367   :  { %v4562_v40 = vpop.f32.mrf.mxu0  ;;  %2141 = vmax.xlane.f32.xlu1 %v2140_v20  ;;  %v4538_v42 = vpop.f32.mrf.mxu1 }
0x1368   :  { %v2136_v43 = vadd.f32 %v5706_v41, %v2133_v4  ;;  %v2375_v47 = vadd.f32 %v5692_v31, %v2372_v39 }
0x1369   :  { %v2363_v10 = vpop.f32.mrf.mxu0 }
0x136a   :  { %v2373_v44 = vmul.f32 0.35355338, %v2363_v10  ;;  %v2143_v45 = vsel %vm342_vm3, %v2136_v43, -inf  ;;  %v2378_v50 = vsel %vm342_vm3, %v2375_v47, -inf }
0x136b   :  { %v4565_v49 = vpop.f32.mrf.mxu0  ;;  %2144 = vmax.xlane.f32.xlu0 %v2143_v45 }
0x136c   :  { %v2376_v51 = vadd.f32 %v5699_v17, %v2373_v44 }
0x136d   :  { %v2368_v46 = vpop.f32.mrf.mxu0 }
0x136e   :  { %v2374_v53 = vmul.f32 0.35355338, %v2368_v46  ;;  %v2381_v52 = vsel %vm342_vm3, %v2376_v51, -inf }
0x136f   :  { %v4568_v62 = vpop.f32.mrf.mxu0  ;;  %2379 = vmax.xlane.f32.xlu0 %v2378_v50 }
0x1370   :  { %v2377_v48 = vadd.f32 %v5706_v41, %v2374_v53 }
0x1372   :  { %v2384_v8 = vsel %vm342_vm3, %v2377_v48, -inf }
0x1373   :  { %2385 = vmax.xlane.f32.xlu1 %v2384_v8  ;;  %2382 = vmax.xlane.f32.xlu0 %v2381_v52 }
0x1384   :  { %2172 = vrot.lane.b32.xlu1 %v5632_v57, %s4952_s29 }
0x1388   :  { %2170 = vrot.lane.b32.xlu1 %v5636_v14, %s4952_s29 }
0x1389   :  { %2174 = vrot.lane.b32.xlu0 %v5638_v15, %s4952_s29 }
0x138c   :  { %2415 = vrot.lane.b32.xlu1 %v5638_v15, %s4955_s20 }
0x13ec   :  { %v2139_v54 = vpop.xlane.xlu0 %2138 }
0x13ed   :  { %v2146_v2 = vsub.f32 %v2134_v32, %v2139_v54  ;;  %v3973_v54 = vld [vmem:[%s6105_s7 + $0x20] sm:$0xff] }
0x13ef   :  { %v2149_v11 = vmul.f32 1.442695, %v2146_v2  ;;  %v3974_v2 = vld [vmem:[%s6105_s7 + $0x28] sm:$0xff] }
0x13f0   :  { %v2142_v58 = vpop.xlane.xlu1 %2141  ;;  %4585 = vmatpush3.msra.mxu0 %v3974_v2 }
0x13f1   :  { %4858 = vpow2.f32 %v2149_v11  ;;  %v2147_v60 = vsub.f32 %v2135_v37, %v2142_v58  ;;  %4606 = vmatprep.subr.mxu0 %v4949_v22 }
0x13f3   :  { %v2151_v5 = vmul.f32 1.442695, %v2147_v60 }
0x13f4   :  { %v2145_v59 = vpop.xlane.xlu0 %2144 }
0x13f5   :  { %v2148_v13 = vsub.f32 %v2136_v43, %v2145_v59 }
0x13f7   :  { %v2153_v24 = vmul.f32 1.442695, %v2148_v13 }
0x13f8   :  { %v2380_v0 = vpop.xlane.xlu0 %2379 }
0x13f9   :  { %v2387_v1 = vsub.f32 %v2375_v47, %v2380_v0 }
0x13fb   :  { %v2390_v6 = vmul.f32 1.442695, %v2387_v1 }
0x13fc   :  { %v2386_v56 = vpop.xlane.xlu1 %2385  ;;  %v2383_v7 = vpop.xlane.xlu0 %2382 }
0x13fd   :  { %4860 = vpow2.f32 %v2390_v6  ;;  %v2389_v9 = vsub.f32 %v2377_v48, %v2386_v56  ;;  %v2388_v16 = vsub.f32 %v2376_v51, %v2383_v7 }
0x13fe   :  { %v4859_v18 = vpop.eup %4858  ;;  %4862 = vpow2.f32 %v2151_v5 }
0x13ff   :  { %v2394_v19 = vmul.f32 1.442695, %v2389_v9  ;;  %v2392_v21 = vmul.f32 1.442695, %v2388_v16  ;;  %v2155_v23 = vsel %vm342_vm3, %v4859_v18, 0.0 }
0x1400   :  { %v2173_v25 = vpop.permute.xlu1 %2172  ;;  %2156 = vadd.xlane.f32.xlu0 %v2155_v23  ;;  %v2175_v26 = vpop.permute.xlu0 %2174 }
0x1401   :  { %4540 = vmatpush3.msra.mxu1 %v2175_v26  ;;  %4864 = vpow2.f32 %v2392_v21 }
0x1402   :  { %4541 = vmatprep.subr.mxu1 %v4949_v22  ;;  %4866 = vpow2.f32 %v2394_v19 }
0x1403   :  { %4542 = vmatpush3.msra.mxu1 %v2173_v25  ;;  %4868 = vpow2.f32 %v2153_v24 }
0x1404   :  { %v2171_v27 = vpop.permute.xlu1 %2170  ;;  %4543 = vmatprep.subr.mxu1 %v4949_v22 }
0x1405   :  { %4544 = vmatpush3.msra.mxu1 %v2171_v27 }
0x1406   :  { %4569 = vmatprep.subr.mxu1 %v4949_v22 }
0x1408   :  { %v2416_v38 = vpop.permute.xlu1 %2415 }
0x140a   :  { %v4861_v28 = vpop.eup %4860 }
0x140b   :  { %v2396_v29 = vsel %vm342_vm3, %v4861_v28, 0.0  ;;  %v4863_v30 = vpop.eup %4862 }
0x140c   :  { %2397 = vadd.xlane.f32.xlu1 %v2396_v29  ;;  %v2158_v32 = vsel %vm342_vm3, %v4863_v30, 0.0 }
0x140e   :  { %v4865_v12 = vpop.eup %4864 }
0x140f   :  { %v4867_v33 = vpop.eup %4866  ;;  %v2399_v34 = vsel %vm342_vm3, %v4865_v12, 0.0 }
0x1410   :  { %2159 = vadd.xlane.f32.xlu1 %v2158_v32  ;;  %v4869_v35 = vpop.eup %4868  ;;  %2400 = vadd.xlane.f32.xlu0 %v2399_v34  ;;  %v2402_v36 = vsel %vm342_vm3, %v4867_v33, 0.0 }
0x1411   :  { %v2161_v37 = vsel %vm342_vm3, %v4869_v35, 0.0 }
0x1414   :  { %2403 = vadd.xlane.f32.xlu1 %v2402_v36  ;;  %2162 = vadd.xlane.f32.xlu0 %v2161_v37 }
0x1425   :  { %2411 = vrot.lane.b32.xlu1 %v5636_v14, %s4955_s20 }
0x1429   :  { %2695 = vrot.lane.b32.xlu1 %v5632_v57, %s4956_s21 }
0x142a   :  { %2413 = vrot.lane.b32.xlu0 %v5632_v57, %s4955_s20 }
0x142d   :  { %2687 = vrot.lane.b32.xlu1 %v5636_v14, %s4957_s1 }
0x142e   :  { %2697 = vrot.lane.b32.xlu0 %v5638_v15, %s4956_s21 }
0x1431   :  { %2691 = vrot.lane.b32.xlu1 %v5638_v15, %s4957_s1 }
0x1432   :  { %2693 = vrot.lane.b32.xlu0 %v5636_v14, %s4956_s21 }
0x1436   :  { %2689 = vrot.lane.b32.xlu0 %v5632_v57, %s4957_s1  ;;  %s6135_s1 = smov 48  }
0x1489   :  { %v2157_v63 = vpop.xlane.xlu0 %2156 }
0x148a   :  { %4870 = vrcp.f32 %v2157_v63 }
0x1495   :  { %v2398_v4 = vpop.xlane.xlu1 %2397 }
0x1497   :  { %v4871_v39 = vpop.eup %4870 }
0x1498   :  { %v2167_v20 = vmul.f32 %v4871_v39, %v4859_v18 }
0x1499   :  { %v2160_v40 = vpop.xlane.xlu1 %2159  ;;  %v2401_v42 = vpop.xlane.xlu0 %2400 }
0x149a   :  { %4872 = vrcp.f32 %v2160_v40  ;;  %4546 = vmatmul.mubr.msk.f32.vlgmr.msra.gmra.mxu1 %vm342_vm3, %v2167_v20 }
0x149b   :  { %4570 = vmatpush3.msra.mxu1 %v2416_v38  ;;  %4548 = vmatprep.mubr.msk.f32.mxu1 %vm4950_vm1, %v4949_v22 }
0x149c   :  { %4571 = vmatprep.subr.mxu1 %v4949_v22 }
0x149d   :  { %v2404_v43 = vpop.xlane.xlu1 %2403  ;;  %v2163_v10 = vpop.xlane.xlu0 %2162 }
0x149e   :  { %4874 = vrcp.f32 %v2163_v10 }
0x149f   :  { %4876 = vrcp.f32 %v2398_v4 }
0x14a0   :  { %4878 = vrcp.f32 %v2401_v42 }
0x14a1   :  { %v2414_v44 = vpop.permute.xlu0 %2413  ;;  %v2412_v45 = vpop.permute.xlu1 %2411  ;;  %4880 = vrcp.f32 %v2404_v43 }
0x14a2   :  { %4572 = vmatpush3.msra.mxu1 %v2414_v44 }
0x14a3   :  { %4573 = vmatprep.subr.mxu1 %v4949_v22 }
0x14a4   :  { %4574 = vmatpush3.msra.mxu1 %v2412_v45 }
0x14a5   :  { %4595 = vmatprep.subr.mxu1 %v4949_v22  ;;  %v2698_v6 = vpop.permute.xlu0 %2697  ;;  %v2696_v7 = vpop.permute.xlu1 %2695 }
0x14a7   :  { %v4873_v47 = vpop.eup %4872 }
0x14a8   :  { %v2168_v49 = vmul.f32 %v4873_v47, %v4863_v30 }
0x14a9   :  { %v2694_v18 = vpop.permute.xlu0 %2693  ;;  %v2688_v21 = vpop.permute.xlu1 %2687 }
0x14aa   :  { %4549 = vmatmul.mubr.msk.f32.gmra.mxu1 %vm342_vm3, %v2168_v49 }
0x14ab   :  { %4551 = vmatprep.mubr.msk.f32.mxu1 %vm4950_vm1, %v4949_v22  ;;  %v4875_v46 = vpop.eup %4874 }
0x14ac   :  { %v2169_v53 = vmul.f32 %v4875_v46, %v4869_v35  ;;  %v4877_v50 = vpop.eup %4876 }
0x14ad   :  { %v2408_v51 = vmul.f32 %v4877_v50, %v4861_v28  ;;  %v4879_v62 = vpop.eup %4878  ;;  %v2690_v23 = vpop.permute.xlu0 %2689 }
0x14ae   :  { %4552 = vmatmul.mubr.msk.f32.gmra.mxu1 %vm342_vm3, %v2169_v53  ;;  %v2409_v48 = vmul.f32 %v4879_v62, %v4865_v12  ;;  %v4881_v8 = vpop.eup %4880  ;;  %v2692_v24 = vpop.permute.xlu1 %2691 }
0x14af   :  { %4575 = vmatprep.mubr.msk.f32.mxu1 %vm4950_vm1, %v4949_v22  ;;  %v2410_v52 = vmul.f32 %v4881_v8, %v4867_v33 }
0x14b2   :  { %4576 = vmatmul.mubr.msk.f32.vlgmr.msra.gmra.mxu1 %vm342_vm3, %v2408_v51 }
0x14b3   :  { %4578 = vmatprep.mubr.msk.f32.mxu1 %vm4950_vm1, %v4949_v22  ;;  %4596 = vmatpush3.msra.mxu1 %v3973_v54 }
0x14b4   :  { %4621 = vmatprep.subr.mxu1 %v4949_v22 }
0x14b6   :  { %4579 = vmatmul.mubr.msk.f32.gmra.mxu1 %vm342_vm3, %v2409_v48 }
0x14b7   :  { %4581 = vmatprep.mubr.msk.f32.mxu1 %vm4950_vm1, %v4949_v22 }
0x14ba   :  { %4582 = vmatmul.mubr.msk.f32.gmra.mxu1 %vm342_vm3, %v2410_v52 }
0x14bb   :  { %4597 = vmatprep.mubr.msk.f32.mxu1 %vm4950_vm1, %v4949_v22 }
0x155a   :  { %v2254_v11 = vpop.f32.mrf.mxu1 }
0x155b   :  { %4598 = vmatmul.mubr.msk.f32.vlgmr.msra.gmra.mxu1 %vm243_vm2, %v2254_v11 }
0x155c   :  { %v4547_v58 = vpop.f32.mrf.mxu1  ;;  %4600 = vmatprep.mubr.msk.f32.mxu1 %vm4950_vm1, %v4949_v22 }
0x156a   :  { %v2259_v59 = vpop.f32.mrf.mxu1 }
0x156b   :  { %4601 = vmatmul.mubr.msk.f32.gmra.mxu1 %vm243_vm2, %v2259_v59 }
0x156c   :  { %v4550_v60 = vpop.f32.mrf.mxu1  ;;  %4603 = vmatprep.mubr.msk.f32.mxu1 %vm4950_vm1, %v4949_v22 }
0x156e   :  { %v2264_v0 = vpop.f32.mrf.mxu1 }
0x156f   :  { %4604 = vmatmul.mubr.msk.f32.gmra.mxu1 %vm243_vm2, %v2264_v0 }
0x1570   :  { %v4553_v1 = vpop.f32.mrf.mxu1  ;;  %4627 = vmatprep.mubr.msk.f32.mxu1 %vm4950_vm1, %v4949_v22 }
0x1572   :  { %v2495_v5 = vpop.f32.mrf.mxu1 }
0x1573   :  { %4587 = vmatmul.mubr.msk.f32.vlgmr.msra.gmra.mxu0 %vm243_vm2, %v2495_v5 }
0x1574   :  { %4607 = vmatpush3.xpose.msk.msra.mxu0 %vm243_vm2, %v2698_v6  ;;  %v4577_v13 = vpop.f32.mrf.mxu1  ;;  %4589 = vmatprep.mubr.msk.f32.mxu0 %vm4950_vm1, %v4949_v22 }
0x1575   :  { %4608 = vmatprep.subr.mxu0 %v4949_v22 }
0x1576   :  { %v2500_v56 = vpop.f32.mrf.mxu1 }
0x1577   :  { %4590 = vmatmul.mubr.msk.f32.gmra.mxu0 %vm243_vm2, %v2500_v56 }
0x1578   :  { %4609 = vmatpush3.xpose.msk.msra.mxu0 %vm243_vm2, %v2696_v7  ;;  %v4580_v9 = vpop.f32.mrf.mxu1  ;;  %4592 = vmatprep.mubr.msk.f32.mxu0 %vm4950_vm1, %v4949_v22 }
0x1579   :  { %4610 = vmatprep.subr.mxu0 %v4949_v22 }
0x157a   :  { %v2505_v16 = vpop.f32.mrf.mxu1 }
0x157b   :  { %4593 = vmatmul.mubr.msk.f32.gmra.mxu0 %vm243_vm2, %v2505_v16 }
0x157c   :  { %4611 = vmatpush3.xpose.msk.msra.mxu0 %vm243_vm2, %v2694_v18  ;;  %v4583_v19 = vpop.f32.mrf.mxu1  ;;  %4612 = vmatprep.mubr.msk.f32.mxu0 %vm4950_vm1, %v4949_v22 }
0x157d   :  { %4636 = vmatprep.subr.mxu0 %v4949_v22 }
0x157f   :  { %4613 = vmatmul.mubr.msk.f32.vlgmr.msra.gmra.mxu0 %vm243_vm2, %v2688_v21 }
0x1580   :  { %4615 = vmatprep.mubr.msk.f32.mxu0 %vm4950_vm1, %v4949_v22 }
0x1583   :  { %4616 = vmatmul.mubr.msk.f32.gmra.mxu0 %vm243_vm2, %v2690_v23 }
0x1584   :  { %4618 = vmatprep.mubr.msk.f32.mxu0 %vm4950_vm1, %v4949_v22 }
0x1587   :  { %4619 = vmatmul.mubr.msk.f32.gmra.mxu0 %vm243_vm2, %v2692_v24 }
0x1588   :  { %4638 = vmatprep.mubr.msk.f32.mxu0 %vm4950_vm1, %v4949_v22 }
0x161b   :  { %v2673_v25 = vpop.f32.mrf.mxu1 }
0x161d   :  { %v4599_v26 = vpop.f32.mrf.mxu1 }
0x162b   :  { %v2678_v27 = vpop.f32.mrf.mxu1 }
0x162d   :  { %v4602_v28 = vpop.f32.mrf.mxu1 }
0x162f   :  { %v2683_v29 = vpop.f32.mrf.mxu1 }
0x1631   :  { %v4605_v30 = vpop.f32.mrf.mxu1 }
0x1633   :  { %v2584_v12 = vpop.f32.mrf.mxu0 }
0x1634   :  { %v5811_v32 = vadd.f32 %v2673_v25, %v2584_v12 }
0x1635   :  { %v4588_v33 = vpop.f32.mrf.mxu0 }
0x1637   :  { %v2589_v34 = vpop.f32.mrf.mxu0 }
0x1638   :  { %v5813_v35 = vadd.f32 %v2678_v27, %v2589_v34 }
0x1639   :  { %v4591_v36 = vpop.f32.mrf.mxu0 }
0x163a   :  { %v3975_v36 = vld [vmem:[%s6105_s7 + $0x30] sm:$0xff] }
0x163b   :  { %v2594_v37 = vpop.f32.mrf.mxu0  ;;  %4637 = vmatpush3.msra.mxu0 %v3975_v36 }
0x163c   :  { %v5815_v63 = vadd.f32 %v2683_v29, %v2594_v37  ;;  %4662 = vmatprep.subr.mxu0 %v4949_v22 }
0x163d   :  { %v4594_v38 = vpop.f32.mrf.mxu0 }
0x163f   :  { %v2777_v4 = vpop.f32.mrf.mxu0 }
0x1640   :  { %v2791_v39 = vmul.f32 0.35355338, %v2777_v4 }
0x1641   :  { %v4614_v20 = vpop.f32.mrf.mxu0 }
0x1642   :  { %v2794_v40 = vadd.f32 %v5692_v31, %v2791_v39 }
0x1643   :  { %v2782_v42 = vpop.f32.mrf.mxu0 }
0x1644   :  { %v2792_v43 = vmul.f32 0.35355338, %v2782_v42  ;;  %v2797_v10 = vsel %vm342_vm3, %v2794_v40, -inf }
0x1645   :  { %2798 = vmax.xlane.f32.xlu0 %v2797_v10  ;;  %v4617_v44 = vpop.f32.mrf.mxu0 }
0x1646   :  { %v2795_v45 = vadd.f32 %v5699_v17, %v2792_v43 }
0x1647   :  { %v2787_v47 = vpop.f32.mrf.mxu0 }
0x1648   :  { %v2793_v49 = vmul.f32 0.35355338, %v2787_v47  ;;  %v2800_v46 = vsel %vm342_vm3, %v2795_v45, -inf }
0x1649   :  { %2801 = vmax.xlane.f32.xlu1 %v2800_v46  ;;  %v4620_v53 = vpop.f32.mrf.mxu0 }
0x164a   :  { %v2796_v50 = vadd.f32 %v5706_v41, %v2793_v49 }
0x164c   :  { %v2803_v51 = vsel %vm342_vm3, %v2796_v50, -inf }
0x164d   :  { %2804 = vmax.xlane.f32.xlu0 %v2803_v51 }
0x165a   :  { %2832 = vrot.lane.b32.xlu1 %v5632_v57, %s6135_s1 }
0x165e   :  { %2830 = vrot.lane.b32.xlu1 %v5636_v14, %s6135_s1 }
0x1662   :  { %3030 = vrot.lane.b32.xlu1 %v5638_v15, %s6136_s4 }
0x1663   :  { %2834 = vrot.lane.b32.xlu0 %v5638_v15, %s6135_s1 }
0x1666   :  { %3026 = vrot.lane.b32.xlu1 %v5636_v14, %s6136_s4 }
0x16ce   :  { %v2799_v62 = vpop.xlane.xlu0 %2798 }
0x16cf   :  { %v2806_v48 = vsub.f32 %v2794_v40, %v2799_v62 }
0x16d1   :  { %v2809_v8 = vmul.f32 1.442695, %v2806_v48 }
0x16d2   :  { %v2802_v52 = vpop.xlane.xlu1 %2801 }
0x16d3   :  { %4882 = vpow2.f32 %v2809_v8  ;;  %v2807_v54 = vsub.f32 %v2795_v45, %v2802_v52 }
0x16d5   :  { %v2811_v2 = vmul.f32 1.442695, %v2807_v54 }
0x16d6   :  { %v2805_v11 = vpop.xlane.xlu0 %2804  ;;  %v2833_v59 = vpop.permute.xlu1 %2832 }
0x16d7   :  { %4884 = vpow2.f32 %v2811_v2  ;;  %v2808_v58 = vsub.f32 %v2796_v50, %v2805_v11 }
0x16d9   :  { %v2813_v60 = vmul.f32 1.442695, %v2808_v58 }
0x16da   :  { %v2835_v0 = vpop.permute.xlu0 %2834  ;;  %v2831_v1 = vpop.permute.xlu1 %2830 }
0x16db   :  { %4886 = vpow2.f32 %v2813_v60  ;;  %4622 = vmatpush3.msra.mxu1 %v2835_v0 }
0x16dc   :  { %4623 = vmatprep.subr.mxu1 %v4949_v22 }
0x16dd   :  { %4624 = vmatpush3.msra.mxu1 %v2833_v59 }
0x16de   :  { %4625 = vmatprep.subr.mxu1 %v4949_v22  ;;  %v3031_v16 = vpop.permute.xlu1 %3030 }
0x16df   :  { %4626 = vmatpush3.msra.mxu1 %v2831_v1 }
0x16e0   :  { %v4883_v5 = vpop.eup %4882  ;;  %4647 = vmatprep.subr.mxu1 %v4949_v22 }
0x16e1   :  { %v2815_v6 = vsel %vm342_vm3, %v4883_v5, 0.0 }
0x16e2   :  { %2816 = vadd.xlane.f32.xlu0 %v2815_v6  ;;  %v3027_v19 = vpop.permute.xlu1 %3026 }
0x16e4   :  { %v4885_v13 = vpop.eup %4884 }
0x16e5   :  { %v2818_v56 = vsel %vm342_vm3, %v4885_v13, 0.0 }
0x16e6   :  { %2819 = vadd.xlane.f32.xlu0 %v2818_v56 }
0x16e8   :  { %v4887_v7 = vpop.eup %4886 }
0x16e9   :  { %v2821_v9 = vsel %vm342_vm3, %v4887_v7, 0.0 }
0x16ea   :  { %2822 = vadd.xlane.f32.xlu1 %v2821_v9 }
0x16fb   :  { %3022 = vrot.lane.b32.xlu1 %v5632_v57, %s6137_s5 }
0x16fc   :  { %3028 = vrot.lane.b32.xlu0 %v5632_v57, %s6136_s4  ;;  %s4962_s4 = smov [#allocation2]  }
0x1700   :  { %3020 = vrot.lane.b32.xlu0 %v5636_v14, %s6137_s5 }
0x1704   :  { %3024 = vrot.lane.b32.xlu0 %v5638_v15, %s6137_s5  ;;  %s3892_s5 = sshll.u32 %s4962_s4, 4  ;;  %s3893_s5 = int_to_ptr.vmem [resolvable:$true] %s3892_s5 }
0x1705   :  { %s4927_s3 = scalar_lea.vmem %s3893_s5, 64  ;;  %p4932_p1 = scmp.lt.s32.totalorder %s3893_s5, %s3893_s5 }
0x1706   :  { %p4928_p0 = scmp.ne.s32.totalorder %s3893_s5, %s4927_s3  ;;  %p4933_p2 = scmp.lt.s32.totalorder %s4927_s3, %s4927_s3 }
0x1708   :  { %p4934_p3 = por %p4933_p2, %p4932_p1 }
0x170a   :  { %p4935_p4 = pnand %p4934_p3, %p4928_p0 }
0x176b   :  { %v2817_v18 = vpop.xlane.xlu0 %2816 }
0x176c   :  { %4888 = vrcp.f32 %v2817_v18 }
0x176f   :  { %v2820_v21 = vpop.xlane.xlu0 %2819 }
0x1770   :  { %4890 = vrcp.f32 %v2820_v21 }
0x1773   :  { %v2823_v23 = vpop.xlane.xlu1 %2822  ;;  %v3029_v28 = vpop.permute.xlu0 %3028 }
0x1774   :  { %4892 = vrcp.f32 %v2823_v23 }
0x1777   :  { %v3021_v12 = vpop.permute.xlu0 %3020  ;;  %v3023_v33 = vpop.permute.xlu1 %3022 }
0x1779   :  { %v4889_v24 = vpop.eup %4888 }
0x177a   :  { %v2827_v25 = vmul.f32 %v4889_v24, %v4883_v5 }
0x177b   :  { %v3025_v34 = vpop.permute.xlu0 %3024 }
0x177c   :  { %4628 = vmatmul.mubr.msk.f32.vlgmr.msra.gmra.mxu1 %vm342_vm3, %v2827_v25 }
0x177d   :  { %v4891_v26 = vpop.eup %4890  ;;  %4648 = vmatpush3.xpose.msk.msra.mxu1 %vm243_vm2, %v3031_v16  ;;  %4630 = vmatprep.mubr.msk.f32.mxu1 %vm4950_vm1, %v4949_v22 }
0x177e   :  { %4649 = vmatprep.subr.mxu1 %v4949_v22  ;;  %v2828_v27 = vmul.f32 %v4891_v26, %v4885_v13  ;;  %v3976_v26 = vld [vmem:[%s6105_s7 + $0x38] sm:$0xff] }
0x1780   :  { %4631 = vmatmul.mubr.msk.f32.gmra.mxu1 %vm342_vm3, %v2828_v27 }
0x1781   :  { %v4893_v29 = vpop.eup %4892  ;;  %4650 = vmatpush3.xpose.msk.msra.mxu1 %vm243_vm2, %v3029_v28  ;;  %4633 = vmatprep.mubr.msk.f32.mxu1 %vm4950_vm1, %v4949_v22 }
0x1782   :  { %4651 = vmatprep.subr.mxu1 %v4949_v22  ;;  %v2829_v30 = vmul.f32 %v4893_v29, %v4887_v7 }
0x1784   :  { %4634 = vmatmul.mubr.msk.f32.gmra.mxu1 %vm342_vm3, %v2829_v30 }
0x1785   :  { %4652 = vmatpush3.xpose.msk.msra.mxu1 %vm243_vm2, %v3027_v19  ;;  %4653 = vmatprep.mubr.msk.f32.mxu1 %vm4950_vm1, %v4949_v22 }
0x1786   :  { %4677 = vmatprep.subr.mxu1 %v4949_v22 }
0x1788   :  { %4654 = vmatmul.mubr.msk.f32.vlgmr.msra.gmra.mxu1 %vm243_vm2, %v3021_v12 }
0x1789   :  { %4656 = vmatprep.mubr.msk.f32.mxu1 %vm4950_vm1, %v4949_v22  ;;  %4678 = vmatpush3.msra.mxu1 %v3976_v26 }
0x178a   :  { %4705 = vmatprep.subr.mxu1 %v4949_v22 }
0x178c   :  { %4657 = vmatmul.mubr.msk.f32.gmra.mxu1 %vm243_vm2, %v3023_v33 }
0x178d   :  { %4659 = vmatprep.mubr.msk.f32.mxu1 %vm4950_vm1, %v4949_v22 }
0x1790   :  { %4660 = vmatmul.mubr.msk.f32.gmra.mxu1 %vm243_vm2, %v3025_v34 }
0x1791   :  { %4679 = vmatprep.mubr.msk.f32.mxu1 %vm4950_vm1, %v4949_v22 }
0x183c   :  { %v2914_v37 = vpop.f32.mrf.mxu1 }
0x183d   :  { %4639 = vmatmul.mubr.msk.f32.vlgmr.msra.gmra.mxu0 %vm243_vm2, %v2914_v37 }
0x183e   :  { %v4629_v38 = vpop.f32.mrf.mxu1  ;;  %4641 = vmatprep.mubr.msk.f32.mxu0 %vm4950_vm1, %v4949_v22 }
0x1840   :  { %v2919_v4 = vpop.f32.mrf.mxu1 }
0x1841   :  { %4642 = vmatmul.mubr.msk.f32.gmra.mxu0 %vm243_vm2, %v2919_v4 }
0x1842   :  { %v4632_v39 = vpop.f32.mrf.mxu1  ;;  %4644 = vmatprep.mubr.msk.f32.mxu0 %vm4950_vm1, %v4949_v22 }
0x1844   :  { %v2924_v20 = vpop.f32.mrf.mxu1 }
0x1845   :  { %4645 = vmatmul.mubr.msk.f32.gmra.mxu0 %vm243_vm2, %v2924_v20 }
0x1846   :  { %v4635_v40 = vpop.f32.mrf.mxu1  ;;  %4668 = vmatprep.mubr.msk.f32.mxu0 %vm4950_vm1, %v4949_v22 }
0x1847   :  { %v4026_v40 = vld [vmem:[%s6106_s8 + $0x1] ss:$0 sm:$0xff] }
0x1848   :  { %v3110_v42 = vpop.f32.mrf.mxu1 }
0x1849   :  { %v3124_v43 = vmul.f32 0.35355338, %v3110_v42 }
0x184a   :  { %v4655_v10 = vpop.f32.mrf.mxu1 }
0x184b   :  { %v3127_v44 = vadd.f32 %v5692_v31, %v3124_v43 }
0x184c   :  { %v3115_v45 = vpop.f32.mrf.mxu1 }
0x184d   :  { %v3125_v47 = vmul.f32 0.35355338, %v3115_v45  ;;  %v3130_v49 = vsel %vm342_vm3, %v3127_v44, -inf }
0x184e   :  { %3131 = vmax.xlane.f32.xlu1 %v3130_v49  ;;  %v4658_v46 = vpop.f32.mrf.mxu1 }
0x184f   :  { %v3128_v53 = vadd.f32 %v5699_v17, %v3125_v47 }
0x1850   :  { %v3120_v50 = vpop.f32.mrf.mxu1 }
0x1851   :  { %v3126_v51 = vmul.f32 0.35355338, %v3120_v50  ;;  %v3133_v62 = vsel %vm342_vm3, %v3128_v53, -inf }
0x1852   :  { %3134 = vmax.xlane.f32.xlu0 %v3133_v62  ;;  %v4661_v48 = vpop.f32.mrf.mxu1 }
0x1853   :  { %v3129_v8 = vadd.f32 %v5706_v41, %v3126_v51 }
0x1855   :  { %v3136_v52 = vsel %vm342_vm3, %v3129_v8, -inf }
0x1856   :  { %3137 = vmax.xlane.f32.xlu0 %v3136_v52 }
0x185f   :  { %3167 = vrot.lane.b32.xlu1 %v5638_v15, %s6138_s27 }
0x18d7   :  { %v3132_v31 = vpop.xlane.xlu1 %3131 }
0x18d8   :  { %v3139_v54 = vsub.f32 %v3127_v44, %v3132_v31 }
0x18da   :  { %v3142_v2 = vmul.f32 1.442695, %v3139_v54 }
0x18db   :  { %v3168_v11 = vpop.permute.xlu1 %3167  ;;  %v3135_v58 = vpop.xlane.xlu0 %3134 }
0x18dc   :  { %4894 = vpow2.f32 %v3142_v2  ;;  %v3140_v17 = vsub.f32 %v3128_v53, %v3135_v58  ;;  %4663 = vmatpush3.msra.mxu0 %v3168_v11 }
0x18dd   :  { %4664 = vmatprep.subr.mxu0 %v4949_v22 }
0x18de   :  { %v3144_v59 = vmul.f32 1.442695, %v3140_v17 }
0x18df   :  { %v3138_v60 = vpop.xlane.xlu0 %3137 }
0x18e0   :  { %4896 = vpow2.f32 %v3144_v59  ;;  %v3141_v41 = vsub.f32 %v3129_v8, %v3138_v60 }
0x18e2   :  { %v3146_v0 = vmul.f32 1.442695, %v3141_v41 }
0x18e4   :  { %4898 = vpow2.f32 %v3146_v0 }
0x18e9   :  { %v4895_v1 = vpop.eup %4894 }
0x18ea   :  { %v3148_v5 = vsel %vm342_vm3, %v4895_v1, 0.0 }
0x18eb   :  { %3149 = vadd.xlane.f32.xlu0 %v3148_v5 }
0x18ed   :  { %v4897_v15 = vpop.eup %4896 }
0x18ee   :  { %v3151_v6 = vsel %vm342_vm3, %v4897_v15, 0.0 }
0x18ef   :  { %3152 = vadd.xlane.f32.xlu1 %v3151_v6 }
0x18f1   :  { %v4899_v13 = vpop.eup %4898 }
0x18f2   :  { %v3154_v56 = vsel %vm342_vm3, %v4899_v13, 0.0 }
0x18f3   :  { %3155 = vadd.xlane.f32.xlu0 %v3154_v56  ;;  %v4033_v56 = vld [vmem:[%s6109_s11 + $0x30] sm:$0xff] }
0x18fd   :  { %v3003_v7 = vpop.f32.mrf.mxu0 }
0x18fe   :  { %v3017_v9 = vadd.f32 %v3003_v7, %v5811_v32  ;;  %v4032_v7 = vld [vmem:[%s6109_s11 + $0x28] sm:$0xff] }
0x18ff   :  { %v4640_v16 = vpop.f32.mrf.mxu0 }
0x1900   :  { %3163 = vrot.lane.b32.xlu1 %v5636_v14, %s6138_s27 }
0x1901   :  { %v3008_v18 = vpop.f32.mrf.mxu0 }
0x1902   :  { %v3018_v19 = vadd.f32 %v3008_v18, %v5813_v35 }
0x1903   :  { %v4643_v21 = vpop.f32.mrf.mxu0 }
0x1905   :  { %v3013_v23 = vpop.f32.mrf.mxu0 }
0x1906   :  { %v3019_v24 = vadd.f32 %v3013_v23, %v5815_v63 }
0x1907   :  { %v4646_v25 = vpop.f32.mrf.mxu0 }
0x1909   :  { %3165 = vrot.lane.b32.xlu0 %v5632_v57, %s6138_s27 }
0x1974   :  { %v3150_v32 = vpop.xlane.xlu0 %3149 }
0x1975   :  { %4900 = vrcp.f32 %v3150_v32 }
0x1978   :  { %v3153_v14 = vpop.xlane.xlu1 %3152 }
0x1979   :  { %4902 = vrcp.f32 %v3153_v14 }
0x197c   :  { %v3156_v35 = vpop.xlane.xlu0 %3155  ;;  %v3164_v28 = vpop.permute.xlu1 %3163 }
0x197d   :  { %4904 = vrcp.f32 %v3156_v35  ;;  %v4029_v35 = vld [vmem:[%s6107_s9 + $0x1] ss:$0 sm:$0xff] }
0x1980   :  { %v3166_v27 = vpop.permute.xlu0 %3165 }
0x1981   :  { %4665 = vmatpush3.msra.mxu0 %v3166_v27 }
0x1982   :  { %v4901_v63 = vpop.eup %4900  ;;  %4666 = vmatprep.subr.mxu0 %v4949_v22 }
0x1983   :  { %v3160_v57 = vmul.f32 %v4901_v63, %v4895_v1  ;;  %4667 = vmatpush3.msra.mxu0 %v3164_v28  ;;  %v4030_v63 = vld [vmem:[%s6108_s10 + $0x1] ss:$0 sm:$0xff] }
0x1984   :  { %4688 = vmatprep.subr.mxu0 %v4949_v22 }
0x1985   :  { %4669 = vmatmul.mubr.msk.f32.vlgmr.msra.gmra.mxu0 %vm342_vm3, %v3160_v57 }
0x1986   :  { %v4903_v29 = vpop.eup %4902  ;;  %4671 = vmatprep.mubr.msk.f32.mxu0 %vm4950_vm1, %v4949_v22 }
0x1987   :  { %v3161_v30 = vmul.f32 %v4903_v29, %v4897_v15 }
0x1989   :  { %4672 = vmatmul.mubr.msk.f32.gmra.mxu0 %vm342_vm3, %v3161_v30 }
0x198a   :  { %v4905_v12 = vpop.eup %4904  ;;  %4674 = vmatprep.mubr.msk.f32.mxu0 %vm4950_vm1, %v4949_v22 }
0x198b   :  { %v3162_v33 = vmul.f32 %v4905_v12, %v4899_v13  ;;  %v4034_v13 = vld [vmem:[%s6109_s11 + $0x38] sm:$0xff] }
0x198c   :  { %4689 = vmatpush3.msra.mxu0 %v4034_v13 }
0x198d   :  { %4675 = vmatmul.mubr.msk.f32.gmra.mxu0 %vm342_vm3, %v3162_v33  ;;  %4690 = vmatprep.subr.mxu0 %v4949_v22 }
0x198e   :  { %4696 = vmatprep.mubr.msk.f32.mxu0 %vm4950_vm1, %v4949_v22  ;;  %4691 = vmatpush3.msra.mxu0 %v4033_v56 }
0x198f   :  { %4692 = vmatprep.subr.mxu0 %v4949_v22 }
0x1990   :  { %4693 = vmatpush3.msra.mxu0 %v4032_v7 }
0x1991   :  { %4694 = vmatprep.subr.mxu0 %v4949_v22 }
0x1a45   :  { %v3247_v34 = vpop.f32.mrf.mxu0 }
0x1a46   :  { %4680 = vmatmul.mubr.msk.f32.vlgmr.msra.gmra.mxu1 %vm243_vm2, %v3247_v34 }
0x1a47   :  { %v4670_v36 = vpop.f32.mrf.mxu0  ;;  %4682 = vmatprep.mubr.msk.f32.mxu1 %vm4950_vm1, %v4949_v22 }
0x1a49   :  { %v3252_v37 = vpop.f32.mrf.mxu0 }
0x1a4a   :  { %4683 = vmatmul.mubr.msk.f32.gmra.mxu1 %vm243_vm2, %v3252_v37 }
0x1a4b   :  { %v4673_v38 = vpop.f32.mrf.mxu0  ;;  %4685 = vmatprep.mubr.msk.f32.mxu1 %vm4950_vm1, %v4949_v22 }
0x1a4d   :  { %v3257_v4 = vpop.f32.mrf.mxu0 }
0x1a4e   :  { %4686 = vmatmul.mubr.msk.f32.gmra.mxu1 %vm243_vm2, %v3257_v4  ;;  %v4055_v4 = vld [vmem:[%s6111_s13 + $0xf8] sm:$0xff] }
0x1a4f   :  { %v4676_v39 = vpop.f32.mrf.mxu0  ;;  %4737 = vmatprep.mubr.msk.f32.mxu1 %vm4950_vm1, %v4949_v22  ;;  %4706 = vmatpush3.msra.mxu1 %v4055_v4 }
0x1a50   :  { %4707 = vmatprep.subr.mxu1 %v4949_v22  ;;  %v4054_v39 = vld [vmem:[%s6111_s13 + $0xf0] sm:$0xff] }
0x1a51   :  { %4708 = vmatpush3.msra.mxu1 %v4054_v39 }
0x1a52   :  { %4709 = vmatprep.subr.mxu1 %v4949_v22 }
0x1b06   :  { %v3336_v20 = vpop.f32.mrf.mxu1 }
0x1b07   :  { %v3350_v42 = vadd.f32 %v3336_v20, %v3017_v9  ;;  %v4031_v9 = vld [vmem:[%s6109_s11 + $0x20] sm:$0xff]  ;;  %v4053_v20 = vld [vmem:[%s6111_s13 + $0xe8] sm:$0xff] }
0x1b08   :  { %v4681_v43 = vpop.f32.mrf.mxu1  ;;  %4695 = vmatpush3.msra.mxu0 %v4031_v9  ;;  %4710 = vmatpush3.msra.mxu1 %v4053_v20 }
0x1b09   :  { %v3361_v10 = vadd.f32 %v4026_v40, %v3350_v42  ;;  %4746 = vmatprep.subr.mxu0 %v4949_v22  ;;  %4711 = vmatprep.subr.mxu1 %v4949_v22  ;;  %v4051_v42 = vld [vmem:[%s6111_s13 + $0xd8] sm:$0xff]  ;;  %v4050_v43 = vld [vmem:[%s6111_s13 + $0xd0] sm:$0xff] }
0x1b0a   :  { %v3341_v44 = vpop.f32.mrf.mxu1 }
0x1b0b   :  { %v3351_v45 = vadd.f32 %v3341_v44, %v3018_v19  ;;  %v3364_v47 = vadd.f32 %v3361_v10, %v5611_v55  ;;  %v4049_v10 = vld [vmem:[%s6111_s13 + $0xc8] sm:$0xff]  ;;  %v4048_v44 = vld [vmem:[%s6111_s13 + $0xc0] sm:$0xff] }
0x1b0c   :  { %v4684_v49 = vpop.f32.mrf.mxu1 }
0x1b0d   :  { %v3362_v46 = vadd.f32 %v4026_v40, %v3351_v45  ;;  %v3371_v53 = vsel %vm71_vm0, %v3364_v47, 0.0  ;;  %v4047_v45 = vld [vmem:[%s6111_s13 + $0xb8] sm:$0xff]  ;;  %v4045_v49 = vld [vmem:[%s6111_s13 + $0xa8] sm:$0xff] }
0x1b0e   :  { %3372 = vadd.xlane.f32.xlu1 %v3371_v53  ;;  %v3346_v50 = vpop.f32.mrf.mxu1  ;;  %v4043_v53 = vld [vmem:[%s6111_s13 + $0x98] sm:$0xff] }
0x1b0f   :  { %v3352_v51 = vadd.f32 %v3346_v50, %v3019_v24  ;;  %v3365_v62 = vadd.f32 %v3362_v46, %v5617_v61  ;;  %v4044_v46 = vld [vmem:[%s6111_s13 + $0xa0] sm:$0xff]  ;;  %v4042_v50 = vld [vmem:[%s6111_s13 + $0x90] sm:$0xff] }
0x1b10   :  { %v4687_v48 = vpop.f32.mrf.mxu1 }
0x1b11   :  { %v3363_v8 = vadd.f32 %v4026_v40, %v3352_v51  ;;  %v3374_v52 = vsel %vm71_vm0, %v3365_v62, 0.0  ;;  %v4052_v40 = vld [vmem:[%s6111_s13 + $0xe0] sm:$0xff]  ;;  %v4041_v51 = vld [vmem:[%s6111_s13 + $0x88] sm:$0xff] }
0x1b12   :  { %3375 = vadd.xlane.f32.xlu0 %v3374_v52  ;;  %4712 = vmatpush3.msra.mxu1 %v4052_v40  ;;  %v4036_v48 = vld [vmem:[%s6110_s12 + $0x1] ss:$0 sm:$0xff] }
0x1b13   :  { %v3366_v31 = vadd.f32 %v3363_v8, %v5623_v3  ;;  %4713 = vmatprep.subr.mxu1 %v4949_v22 }
0x1b14   :  { %4714 = vmatpush3.msra.mxu1 %v4051_v42 }
0x1b15   :  { %v3377_v54 = vsel %vm71_vm0, %v3366_v31, 0.0  ;;  %4715 = vmatprep.subr.mxu1 %v4949_v22 }
0x1b16   :  { %3378 = vadd.xlane.f32.xlu0 %v3377_v54  ;;  %4716 = vmatpush3.msra.mxu1 %v4050_v43 }
0x1b17   :  { %4717 = vmatprep.subr.mxu1 %v4949_v22 }
0x1b18   :  { %4718 = vmatpush3.msra.mxu1 %v4049_v10 }
0x1b19   :  { %4719 = vmatprep.subr.mxu1 %v4949_v22 }
0x1b1a   :  { %4720 = vmatpush3.msra.mxu1 %v4048_v44 }
0x1b1b   :  { %4721 = vmatprep.subr.mxu1 %v4949_v22 }
0x1b1c   :  { %4722 = vmatpush3.msra.mxu1 %v4047_v45 }
0x1b1d   :  { %4723 = vmatprep.subr.mxu1 %v4949_v22 }
0x1b97   :  { %v3373_v55 = vpop.xlane.xlu1 %3372 }
0x1b98   :  { %v3380_v2 = vmul.f32 0.03125, %v3373_v55 }
0x1b9a   :  { %v3383_v11 = vsub.f32 %v3364_v47, %v3380_v2  ;;  %v4046_v47 = vld [vmem:[%s6111_s13 + $0xb0] sm:$0xff] }
0x1b9b   :  { %v3376_v58 = vpop.xlane.xlu0 %3375  ;;  %4724 = vmatpush3.msra.mxu1 %v4046_v47 }
0x1b9c   :  { %v3381_v17 = vmul.f32 0.03125, %v3376_v58  ;;  %v3386_v59 = vmul.f32 %v3383_v11, %v3383_v11  ;;  %4725 = vmatprep.subr.mxu1 %v4949_v22 }
0x1b9d   :  { %4726 = vmatpush3.msra.mxu1 %v4045_v49 }
0x1b9e   :  { %v3384_v60 = vsub.f32 %v3365_v62, %v3381_v17  ;;  %v3389_v41 = vsel %vm71_vm0, %v3386_v59, 0.0  ;;  %4727 = vmatprep.subr.mxu1 %v4949_v22  ;;  %v4040_v62 = vld [vmem:[%s6111_s13 + $0x80] sm:$0xff] }
0x1b9f   :  { %3390 = vadd.xlane.f32.xlu1 %v3389_v41  ;;  %v3379_v61 = vpop.xlane.xlu0 %3378  ;;  %4728 = vmatpush3.msra.mxu1 %v4044_v46 }
0x1ba0   :  { %v3382_v0 = vmul.f32 0.03125, %v3379_v61  ;;  %v3387_v1 = vmul.f32 %v3384_v60, %v3384_v60  ;;  %4729 = vmatprep.subr.mxu1 %v4949_v22 }
0x1ba1   :  { %4730 = vmatpush3.msra.mxu1 %v4043_v53 }
0x1ba2   :  { %v3385_v5 = vsub.f32 %v3366_v31, %v3382_v0  ;;  %v3392_v15 = vsel %vm71_vm0, %v3387_v1, 0.0  ;;  %4731 = vmatprep.subr.mxu1 %v4949_v22 }
0x1ba3   :  { %3393 = vadd.xlane.f32.xlu0 %v3392_v15  ;;  %4732 = vmatpush3.msra.mxu1 %v4042_v50 }
0x1ba4   :  { %v3388_v3 = vmul.f32 %v3385_v5, %v3385_v5  ;;  %4733 = vmatprep.subr.mxu1 %v4949_v22 }
0x1ba5   :  { %4734 = vmatpush3.msra.mxu1 %v4041_v51 }
0x1ba6   :  { %v3395_v6 = vsel %vm71_vm0, %v3388_v3, 0.0  ;;  %4735 = vmatprep.subr.mxu1 %v4949_v22 }
0x1ba7   :  { %3396 = vadd.xlane.f32.xlu1 %v3395_v6  ;;  %4736 = vmatpush3.msra.mxu1 %v4040_v62 }
0x1c28   :  { %v3391_v16 = vpop.xlane.xlu1 %3390 }
0x1c29   :  { %v3398_v18 = vmul.f32 0.03125, %v3391_v16 }
0x1c2b   :  { %v3401_v19 = vadd.f32 1e-12, %v3398_v18 }
0x1c2c   :  { %v3394_v21 = vpop.xlane.xlu0 %3393 }
0x1c2d   :  { %4906 = vrsqrt.f32 %v3401_v19  ;;  %v3399_v23 = vmul.f32 0.03125, %v3394_v21 }
0x1c2f   :  { %v3402_v24 = vadd.f32 1e-12, %v3399_v23 }
0x1c30   :  { %v3397_v25 = vpop.xlane.xlu1 %3396 }
0x1c31   :  { %4908 = vrsqrt.f32 %v3402_v24  ;;  %v3400_v26 = vmul.f32 0.03125, %v3397_v25 }
0x1c33   :  { %v3403_v32 = vadd.f32 1e-12, %v3400_v26 }
0x1c35   :  { %4910 = vrsqrt.f32 %v3403_v32 }
0x1c3a   :  { %v4907_v14 = vpop.eup %4906 }
0x1c3b   :  { %v3407_v27 = vmul.f32 %v4907_v14, %v3383_v11 }
0x1c3d   :  { %v3416_v28 = vmul.f32 %v4029_v35, %v3407_v27 }
0x1c3e   :  { %v4909_v57 = vpop.eup %4908 }
0x1c3f   :  { %v5961_v29 = vadd.f32 %v4030_v63, %v3416_v28  ;;  %v3408_v30 = vmul.f32 %v4909_v57, %v3384_v60 }
0x1c41   :  { %4697 = vmatmul.mubr.msk.f32.vlgmr.msra.gmra.mxu0 %vm71_vm0, %v5961_v29  ;;  %v3417_v12 = vmul.f32 %v4029_v35, %v3408_v30  ;;  %v4057_v30 = vld [vmem:[%s6112_s14 + $0x1] ss:$0 sm:$0xff] }
0x1c42   :  { %v4911_v33 = vpop.eup %4910  ;;  %4699 = vmatprep.mubr.msk.f32.mxu0 %vm4950_vm1, %v4949_v22 }
0x1c43   :  { %v5967_v34 = vadd.f32 %v4030_v63, %v3417_v12  ;;  %v3409_v36 = vmul.f32 %v4911_v33, %v3385_v5 }
0x1c45   :  { %4700 = vmatmul.mubr.msk.f32.gmra.mxu0 %vm71_vm0, %v5967_v34  ;;  %v3418_v37 = vmul.f32 %v4029_v35, %v3409_v36 }
0x1c46   :  { %4702 = vmatprep.mubr.msk.f32.mxu0 %vm4950_vm1, %v4949_v22 }
0x1c47   :  { %v5973_v38 = vadd.f32 %v4030_v63, %v3418_v37 }
0x1c49   :  { %4703 = vmatmul.mubr.msk.f32.gmra.mxu0 %vm71_vm0, %v5973_v38 }
0x1c4a   :  { %4752 = vmatprep.mubr.msk.f32.mxu0 %vm4950_vm1, %v4949_v22 }
0x1d01   :  { %v3516_v8 = vpop.f32.mrf.mxu0 }
0x1d02   :  { %v3517_v52 = vadd.f32 %v4036_v48, %v3516_v8 }
0x1d03   :  { %v4698_v31 = vpop.f32.mrf.mxu0 }
0x1d04   :  { %v3530_v54 = vmul.f32 %v3517_v52, %v3517_v52 }
0x1d05   :  { %v3521_v55 = vpop.f32.mrf.mxu0 }
0x1d06   :  { %v3533_v2 = vmul.f32 %v3530_v54, %v3517_v52  ;;  %v3522_v11 = vadd.f32 %v4036_v48, %v3521_v55 }
0x1d07   :  { %v4701_v58 = vpop.f32.mrf.mxu0 }
0x1d08   :  { %v3536_v17 = vmul.f32 0.044715, %v3533_v2  ;;  %v3531_v59 = vmul.f32 %v3522_v11, %v3522_v11 }
0x1d09   :  { %v3526_v60 = vpop.f32.mrf.mxu0 }
0x1d0a   :  { %v3539_v41 = vadd.f32 %v3536_v17, %v3517_v52  ;;  %v3534_v61 = vmul.f32 %v3531_v59, %v3522_v11  ;;  %v3527_v0 = vadd.f32 %v4036_v48, %v3526_v60 }
0x1d0b   :  { %v4704_v1 = vpop.f32.mrf.mxu0 }
0x1d0c   :  { %v3542_v5 = vmul.f32 0.7978846, %v3539_v41  ;;  %v3537_v15 = vmul.f32 0.044715, %v3534_v61  ;;  %v3532_v3 = vmul.f32 %v3527_v0, %v3527_v0 }
0x1d0e   :  { %4912 = vtanh.f32 %v3542_v5  ;;  %v3540_v6 = vadd.f32 %v3537_v15, %v3522_v11  ;;  %v3535_v13 = vmul.f32 %v3532_v3, %v3527_v0  ;;  %v4060_v15 = vld [vmem:[%s6113_s15 + $0x1] ss:$0 sm:$0xff]  ;;  %s6139_s15 = sld [smem:[#allocation7_spill]] }
0x1d10   :  { %v3543_v56 = vmul.f32 0.7978846, %v3540_v6  ;;  %v3538_v7 = vmul.f32 0.044715, %v3535_v13 }
0x1d12   :  { %4914 = vtanh.f32 %v3543_v56  ;;  %v3541_v9 = vadd.f32 %v3538_v7, %v3527_v0  ;;  %v4061_v7 = vld [vmem:[%s6114_s16 + $0x1] ss:$0 sm:$0xff] }
0x1d14   :  { %v3544_v16 = vmul.f32 0.7978846, %v3541_v9 }
0x1d16   :  { %4916 = vtanh.f32 %v3544_v16 }
0x1d1b   :  { %v4913_v18 = vpop.eup %4912 }
0x1d1c   :  { %v3548_v19 = vadd.f32 1.0, %v4913_v18 }
0x1d1e   :  { %v3551_v21 = vmul.f32 0.5, %v3548_v19 }
0x1d1f   :  { %v4915_v23 = vpop.eup %4914 }
0x1d20   :  { %v3554_v24 = vmul.f32 %v3551_v21, %v3517_v52  ;;  %v3549_v25 = vadd.f32 1.0, %v4915_v23  ;;  %v3726_v23 = vld [vmem:[%s6139_s15] sm:$0x7] }
0x1d22   :  { %4738 = vmatmul.mubr.f32.vlgmr.msra.gmra.mxu1 %v3554_v24  ;;  %v3552_v26 = vmul.f32 0.5, %v3549_v25  ;;  %v3803_v24 = vld [vmem:[%s6115_s17 + $0x18] sm:$0xff]  ;;  %v3802_v25 = vld [vmem:[%s6115_s17 + $0x10] sm:$0xff] }
0x1d23   :  { %v4917_v32 = vpop.eup %4916  ;;  %4740 = vmatprep.mubr.msk.f32.mxu1 %vm4950_vm1, %v4949_v22 }
0x1d24   :  { %v3555_v14 = vmul.f32 %v3552_v26, %v3522_v11  ;;  %v3550_v35 = vadd.f32 1.0, %v4917_v32  ;;  %v3801_v26 = vld [vmem:[%s6115_s17 + $0x8] sm:$0xff]  ;;  %v3800_v32 = vld [vmem:[%s6115_s17] sm:$0xff] }
0x1d26   :  { %4741 = vmatmul.mubr.f32.gmra.mxu1 %v3555_v14  ;;  %v3553_v27 = vmul.f32 0.5, %v3550_v35 }
0x1d27   :  { %4743 = vmatprep.mubr.msk.f32.mxu1 %vm4950_vm1, %v4949_v22 }
0x1d28   :  { %v3556_v63 = vmul.f32 %v3553_v27, %v3527_v0  ;;  %v4063_v27 = vld [vmem:[%s6116_s18] ss:$0 sm:$0xff] }
0x1d2a   :  { %4744 = vmatmul.mubr.f32.gmra.mxu1 %v3556_v63 }
0x1de2   :  { %v3648_v28 = vpop.f32.mrf.mxu1 }
0x1de3   :  { %v3649_v39 = vadd.f32 %v4057_v30, %v3648_v28 }
0x1de4   :  { %v4739_v57 = vpop.f32.mrf.mxu1 }
0x1de5   :  { %v3662_v10 = vadd.f32 %v3649_v39, %v5961_v29 }
0x1de6   :  { %v3653_v12 = vpop.f32.mrf.mxu1 }
0x1de7   :  { %v3654_v33 = vadd.f32 %v4057_v30, %v3653_v12  ;;  %v3669_v45 = vsel %vm71_vm0, %v3662_v10, 0.0 }
0x1de8   :  { %v4742_v36 = vpop.f32.mrf.mxu1 }
0x1de9   :  { %v3663_v37 = vadd.f32 %v3654_v33, %v5967_v34 }
0x1dea   :  { %v3658_v4 = vpop.f32.mrf.mxu1 }
0x1deb   :  { %v3659_v20 = vadd.f32 %v4057_v30, %v3658_v4  ;;  %v3672_v40 = vsel %vm71_vm0, %v3663_v37, 0.0 }
0x1dec   :  { %3673 = vadd.xlane.f32.xlu1 %v3672_v40  ;;  %v4745_v42 = vpop.f32.mrf.mxu1 }
0x1ded   :  { %v3664_v43 = vadd.f32 %v3659_v20, %v5973_v38 }
0x1def   :  { %v3675_v44 = vsel %vm71_vm0, %v3664_v43, 0.0 }
0x1df0   :  { %3676 = vadd.xlane.f32.xlu0 %v3675_v44 }
0x1df4   :  { %3670 = vadd.xlane.f32.xlu0 %v3669_v45 }
0x1e75   :  { %v3674_v47 = vpop.xlane.xlu1 %3673 }
0x1e76   :  { %v3679_v49 = vmul.f32 0.03125, %v3674_v47 }
0x1e78   :  { %v3682_v34 = vsub.f32 %v3663_v37, %v3679_v49 }
0x1e79   :  { %v3677_v46 = vpop.xlane.xlu0 %3676 }
0x1e7a   :  { %v3680_v53 = vmul.f32 0.03125, %v3677_v46  ;;  %v3685_v50 = vmul.f32 %v3682_v34, %v3682_v34 }
0x1e7c   :  { %v3683_v51 = vsub.f32 %v3664_v43, %v3680_v53  ;;  %v3690_v62 = vsel %vm71_vm0, %v3685_v50, 0.0 }
0x1e7d   :  { %3691 = vadd.xlane.f32.xlu0 %v3690_v62  ;;  %v3671_v48 = vpop.xlane.xlu0 %3670 }
0x1e7e   :  { %v3678_v38 = vmul.f32 0.03125, %v3671_v48  ;;  %v3686_v8 = vmul.f32 %v3683_v51, %v3683_v51 }
0x1e80   :  { %v3681_v29 = vsub.f32 %v3662_v10, %v3678_v38  ;;  %v3693_v52 = vsel %vm71_vm0, %v3686_v8, 0.0 }
0x1e81   :  { %3694 = vadd.xlane.f32.xlu1 %v3693_v52 }
0x1e82   :  { %v3684_v31 = vmul.f32 %v3681_v29, %v3681_v29 }
0x1e84   :  { %v3687_v54 = vsel %vm71_vm0, %v3684_v31, 0.0 }
0x1e85   :  { %3688 = vadd.xlane.f32.xlu1 %v3687_v54 }
0x1f06   :  { %v3692_v55 = vpop.xlane.xlu0 %3691 }
0x1f07   :  { %v3697_v2 = vmul.f32 0.03125, %v3692_v55 }
0x1f09   :  { %v3700_v11 = vadd.f32 1e-12, %v3697_v2 }
0x1f0a   :  { %v3695_v58 = vpop.xlane.xlu1 %3694 }
0x1f0b   :  { %4918 = vrsqrt.f32 %v3700_v11  ;;  %v3698_v17 = vmul.f32 0.03125, %v3695_v58 }
0x1f0d   :  { %v3701_v59 = vadd.f32 1e-12, %v3698_v17 }
0x1f0e   :  { %v3689_v60 = vpop.xlane.xlu1 %3688 }
0x1f0f   :  { %4920 = vrsqrt.f32 %v3701_v59  ;;  %v3696_v41 = vmul.f32 0.03125, %v3689_v60 }
0x1f11   :  { %v3699_v61 = vadd.f32 1e-12, %v3696_v41 }
0x1f13   :  { %4922 = vrsqrt.f32 %v3699_v61 }
0x1f18   :  { %v4919_v0 = vpop.eup %4918 }
0x1f19   :  { %v3706_v1 = vmul.f32 %v4919_v0, %v3682_v34 }
0x1f1b   :  { %v3715_v13 = vmul.f32 %v4060_v15, %v3706_v1 }
0x1f1c   :  { %v4921_v5 = vpop.eup %4920 }
0x1f1d   :  { %v3707_v3 = vmul.f32 %v4921_v5, %v3683_v51  ;;  %v3724_v18 = vadd.f32 %v4061_v7, %v3715_v13 }
0x1f1f   :  { %v3716_v6 = vmul.f32 %v4060_v15, %v3707_v3 }
0x1f20   :  { %v4923_v56 = vpop.eup %4922 }
0x1f21   :  { %v3725_v9 = vadd.f32 %v4061_v7, %v3716_v6  ;;  %v3705_v16 = vmul.f32 %v4923_v56, %v3681_v29 }
0x1f23   :  { %4747 = vmatpush3.msra.mxu0 %v3725_v9  ;;  %v3714_v19 = vmul.f32 %v4060_v15, %v3705_v16 }
0x1f24   :  { %4748 = vmatprep.subr.mxu0 %v4949_v22 }
0x1f25   :  { %4749 = vmatpush3.msra.mxu0 %v3724_v18  ;;  %v3723_v21 = vadd.f32 %v4061_v7, %v3714_v19 }
0x1f26   :  { %4750 = vmatprep.subr.mxu0 %v4949_v22 }
0x1f27   :  { %4751 = vmatpush3.msra.mxu0 %v3723_v21 }
0x1f28   :  { %4753 = vmatmul.mubr.msk.f32.vlgmr.msra.gmra.mxu0 %vm342_vm3, %v3726_v23  ;;  %4755 = vmatprep.subr.mxu0 %v4949_v22 }
0x1f29   :  { %4756 = vmatpush3.msra.mxu0 %v3803_v24  ;;  %4763 = vmatprep.mubr.msk.f32.mxu0 %vm4950_vm1, %v4949_v22 }
0x1f2a   :  { %4757 = vmatprep.subr.mxu0 %v4949_v22 }
0x1f2b   :  { %4758 = vmatpush3.msra.mxu0 %v3802_v25 }
0x1f2c   :  { %4759 = vmatprep.subr.mxu0 %v4949_v22 }
0x1f2d   :  { %4760 = vmatpush3.msra.mxu0 %v3801_v26 }
0x1f2e   :  { %4761 = vmatprep.subr.mxu0 %v4949_v22 }
0x1f2f   :  { %4762 = vmatpush3.msra.mxu0 %v3800_v32 }
0x1fe8   :  { %v3796_v14 = vpop.f32.mrf.mxu0 }
0x1fe9   :  { %4764 = vmatmul.mubr.msk.f32.vlgmr.msra.gmra.mxu0 %vm71_vm0, %v3796_v14 }
0x1fea   :  { %v4754_v35 = vpop.f32.mrf.mxu0 }
0x20a9   :  { %v3880_v63 = vpop.f32.mrf.mxu0 }
0x20aa   :  { %v3881_v28 = vadd.f32 %v4063_v27, %v3880_v63 }
0x20ab   :  { %v4765_v22 = vpop.f32.mrf.mxu0 }
0x20ac   :  { %3885 = vst.msk [vmem:[#allocation2] sm:$0x7] %vm3884_vm4, %v3881_v28 }
0x20ad   :  { %4938 = shalt.err (!%p4935_p4)
}
0x20ae   :  { %3895 = dma.vmem_to_hbm [thread:$0]  %s3893_s5, 64, %s6117_s19, [#allocation3]  }
0x20af   :  { %4947 = dma.done.wait [#allocation3], 64  }
0x20b0   :  { %4948 = vsyncadd [#allocation3], 4294967232 }
0x20b1   :  { %3899 = vsyncpa [#allocation3], 1 }

</bundles_post_ra>
